<compile_context>
chip_gen: v5e
topology: v5e:2x2
jax: 0.10.0
libtpu: 0.0.40
codegen_flags: <defaults>
</compile_context>

<pallas_src>
import functools

import jax
import jax.numpy as jnp
from jax import lax
from jax.experimental import pallas as pl
from jax.experimental.pallas import tpu as pltpu

S = 49     # spatial locations (7x7) — fixed by the module (affine_v/g/h use 49)
DV = 512   # video feature dim   — fixed by the module (affine_video: 512 -> H)
DA = 128   # audio feature dim   — fixed by the module (affine_audio: 128 -> H)


def _avga_kernel(tb, v_ref, a_ref,
                 wv_ref, bv_ref, wa_ref, ba_ref,
                 wvq_ref, wg_ref, wh_ref,
                 out_ref):
    """One grid step processes `tb` (batch*time) elements.

    v_ref  : (tb*S, DV)  flattened visual features (49 consecutive rows / elem)
    a_ref  : (tb, DA)    audio features
    out_ref: (tb, DV)    attended 512-d visual vector per element
    """
    f32 = jnp.float32
    tbs = tb * S

    v = v_ref[...]                                   # (tbs, DV)  f32 or bf16
    a = a_ref[...]                                   # (tb, DA)   f32

    # ---- hidden projections (MXU, f32 accumulation) -------------------------
    v_h = jnp.maximum(
        jnp.dot(v, wv_ref[...], preferred_element_type=f32) + bv_ref[...],
        0.0)                                         # (tbs, H)  relu(affine_video)
    a_h = jnp.maximum(
        jnp.dot(a, wa_ref[...], preferred_element_type=f32) + ba_ref[...],
        0.0)                                         # (tb, H)   relu(affine_audio)

    # ---- attention-logit pieces (both on the MXU) ----------------------------
    cv = jnp.dot(v_h, wvq_ref[...], preferred_element_type=f32)    # (tbs, S)
    cg = jnp.dot(a_h, wg_ref[...], preferred_element_type=f32)     # (tb, S)  affine_g

    # ---- group-index machinery: flat row r = b*S + s -------------------------
    # Built from 2-D iotas + compares + one keepdims lane-sum (no int div/mod).
    # Recomputed each grid step; it's ~5M VPU element-ops that hide completely
    # under the (much larger) video HBM stream.
    r_i = lax.broadcasted_iota(jnp.int32, (tbs, tb), 0)            # value r
    b_i = lax.broadcasted_iota(jnp.int32, (tbs, tb), 1)            # candidate b
    ge = r_i >= b_i * S
    gather = (ge & (r_i < (b_i + 1) * S)).astype(f32)              # (tbs, tb) onehot(b(r))

    b_of_r = jnp.sum(ge.astype(f32), axis=1, keepdims=True) - 1.0  # (tbs, 1) = b(r)
    r_full = lax.broadcasted_iota(jnp.int32, (tbs, S), 0).astype(f32)
    lane_s = lax.broadcasted_iota(jnp.int32, (tbs, S), 1).astype(f32)
    msel = (lane_s == (r_full - b_of_r * float(S))).astype(f32)    # (tbs, S) onehot(s(r))

    b_j = lax.broadcasted_iota(jnp.int32, (tb, tbs), 0)
    r_j = lax.broadcasted_iota(jnp.int32, (tb, tbs), 1)
    scatter = ((r_j >= b_j * S) & (r_j < (b_j + 1) * S)).astype(f32)  # (tb, tbs)

    # ---- content_v = affine_v(v_h) + affine_g(a_h).unsqueeze(2) --------------
    cg_rows = jnp.dot(gather, cg, preferred_element_type=f32)      # (tbs, S) = cg[b(r), :]
    cg_flat = jnp.sum(cg_rows * msel, axis=1, keepdims=True)       # (tbs, 1) = cg[b(r), s(r)]
    content = cv + cg_flat                                         # (tbs, S)

    # ---- z = affine_h(tanh(content))  (contract the 49 "k" lanes) ------------
    z_flat = jnp.sum(jnp.tanh(content) * wh_ref[...], axis=1,
                     keepdims=True)                                # (tbs, 1)

    # ---- softmax over the 49 spatial locations of each element ---------------
    # scatter z into a lane-dense (tb, S) layout so max/exp/sum are lane ops.
    z_g = jnp.dot(scatter, z_flat * msel, preferred_element_type=f32)   # (tb, S)
    z_g = z_g - jnp.max(z_g, axis=1, keepdims=True)
    e = jnp.exp(z_g)
    alpha = e / jnp.sum(e, axis=1, keepdims=True)                  # (tb, S)

    # ---- c_t = alpha^T @ V as ONE block-diagonal MXU matmul -------------------
    att = lax.dot_general(alpha, msel, (((1,), (1,)), ((), ())),
                          preferred_element_type=f32)              # (tb, tbs) = alpha[b, s(r)]
    att = att * scatter                                            # zero cross-group weights
    out = jnp.dot(att.astype(v.dtype), v, preferred_element_type=f32)   # (tb, DV)
    out_ref[...] = out.astype(out_ref.dtype)


def avga_forward(audio, video, params, *, tb=32):
    """audio: (B, T, 128), video: (B, T, 49, 512) -> (B, T, 512)."""
    B, T = video.shape[0], video.shape[1]
    BT = B * T
    H = params["W_audio"].shape[0]

    # ---- tile size along the flattened batch*time axis -----------------------
    # HBM-bound on the video stream: tb=32 (~3.2 MiB f32 block) already sits at
    # ~86% of HBM roofline while staying well inside VMEM on v5e/v6e/v7x.
    tb = int(max(1, min(tb, BT)))
    if tb < BT:
        tb = max(8, (tb // 8) * 8)      # keep the (8,128) sublane rule for multi-block grids
    bt_pad = ((BT + tb - 1) // tb) * tb

    # Free (row-major) reshapes; video keeps its input dtype (bf16 OK — the
    # kernel is HBM-bound on this stream, so no f32 upcast pass is forced).
    v = video.reshape(BT * S, DV)
    a = audio.reshape(BT, DA).astype(jnp.float32)

    if bt_pad != BT:
        # pad with whole zero groups; their finite outputs are sliced off below.
        v = jnp.pad(v, ((0, (bt_pad - BT) * S), (0, 0)))
        a = jnp.pad(a, ((0, bt_pad - BT), (0, 0)))

    # pre-transpose weights so the kernel does plain x @ W
    wv_t = params["W_video"].T.astype(v.dtype)             # (DV, H)
    wa_t = params["W_audio"].T.astype(jnp.float32)         # (DA, H)
    bv = params["b_video"].reshape(1, H).astype(jnp.float32)
    ba = params["b_audio"].reshape(1, H).astype(jnp.float32)
    wvq_t = params["W_v"].T.astype(jnp.float32)            # (H, S)
    wg_t = params["W_g"].T.astype(jnp.float32)             # (H, S)
    wh = params["W_h"].reshape(1, S).astype(jnp.float32)   # (1, S)

    const = lambda i: (0, 0)   # weights: same block every step -> fetched once

    out = pl.pallas_call(
        functools.partial(_avga_kernel, tb),
        out_shape=jax.ShapeDtypeStruct((bt_pad, DV), jnp.float32),
        grid_spec=pltpu.PrefetchScalarGridSpec(
            num_scalar_prefetch=0,
            grid=(bt_pad // tb,),
            in_specs=[
                pl.BlockSpec((tb * S, DV), lambda i: (i, 0)),   # video (flat rows)
                pl.BlockSpec((tb, DA), lambda i: (i, 0)),       # audio
                pl.BlockSpec((DV, H), const),                   # W_video^T
                pl.BlockSpec((1, H), const),                    # b_video
                pl.BlockSpec((DA, H), const),                   # W_audio^T
                pl.BlockSpec((1, H), const),                    # b_audio
                pl.BlockSpec((H, S), const),                    # W_v^T
                pl.BlockSpec((H, S), const),                    # W_g^T
                pl.BlockSpec((1, S), const),                    # W_h
            ],
            out_specs=pl.BlockSpec((tb, DV), lambda i: (i, 0)),
        ),
        compiler_params=pltpu.CompilerParams(
            dimension_semantics=("parallel",),
            vmem_limit_bytes=48 * 1024 * 1024,
        ),
    )(v, a, wv_t, bv, wa_t, ba, wvq_t, wg_t, wh)

    return out[:BT].reshape(B, T, DV)


# ---------------- deterministic parameter init (matches __init__ shapes) -----
def _xavier_uniform(key, shape):
    fan_out, fan_in = shape
    bound = (6.0 / (fan_in + fan_out)) ** 0.5
    return jax.random.uniform(key, shape, jnp.float32, -bound, bound)


def init_params(key, hidden=128):
    ks = jax.random.split(key, 7)
    return {
        "W_audio": _xavier_uniform(ks[0], (hidden, DA)),
        "b_audio": jax.random.uniform(ks[1], (hidden,), jnp.float32,
                                      -1.0 / DA ** 0.5, 1.0 / DA ** 0.5),
        "W_video": _xavier_uniform(ks[2], (hidden, DV)),
        "b_video": jax.random.uniform(ks[3], (hidden,), jnp.float32,
                                      -1.0 / DV ** 0.5, 1.0 / DV ** 0.5),
        "W_v": _xavier_uniform(ks[4], (S, hidden)),
        "W_g": _xavier_uniform(ks[5], (S, hidden)),
        "W_h": _xavier_uniform(ks[6], (1, S)),
    }


# ---------------- pure-JAX reference (mirrors the PyTorch forward) -----------
def avga_reference(audio, video, params):
    B, T = video.shape[:2]
    V = video.reshape(B * T, S, DV).astype(jnp.float32)
    a = audio.reshape(B * T, DA).astype(jnp.float32)
    v_h = jax.nn.relu(V @ params["W_video"].T + params["b_video"])
    a_h = jax.nn.relu(a @ params["W_audio"].T + params["b_audio"])
    content = jnp.einsum("bsh,kh->bsk", v_h, params["W_v"]) \
        + (a_h @ params["W_g"].T)[:, :, None]
    z = jnp.einsum("bsk,k->bs", jnp.tanh(content), params["W_h"][0])
    alpha = jax.nn.softmax(z, axis=-1)
    c = jnp.einsum("bs,bsd->bd", alpha, V)
    return c.reshape(B, T, DV)


if __name__ == "__main__":
    key = jax.random.PRNGKey(0)
    kp, ka1, kv1, ka2, kv2 = jax.random.split(key, 5)

    hidden = 128   # feature dims (128 audio / 512 video / 49 spatial) fixed by module
    params = init_params(kp, hidden)

    # case 1: tiny shapes — single grid step (full-block path)
    B1, T1 = 2, 4
    audio1 = jax.random.normal(ka1, (B1, T1, DA), jnp.float32)
    video1 = jax.random.normal(kv1, (B1, T1, S, DV), jnp.float32)
    out1 = jax.block_until_ready(avga_forward(audio1, video1, params))
    ref1 = avga_reference(audio1, video1, params)
    assert out1.shape == (B1, T1, DV), out1.shape
    assert jnp.allclose(out1, ref1, atol=2e-4, rtol=2e-4), \
        float(jnp.max(jnp.abs(out1 - ref1)))

    # case 2: multi-step grid with batch*time tail padding (B*T=80 -> 3 steps of 32)
    B2, T2 = 4, 20
    audio2 = jax.random.normal(ka2, (B2, T2, DA), jnp.float32)
    video2 = jax.random.normal(kv2, (B2, T2, S, DV), jnp.float32)
    out2 = jax.block_until_ready(avga_forward(audio2, video2, params))
    ref2 = avga_reference(audio2, video2, params)
    assert out2.shape == (B2, T2, DV), out2.shape
    assert jnp.allclose(out2, ref2, atol=2e-4, rtol=2e-4), \
        float(jnp.max(jnp.abs(out2 - ref2)))

    print("KERNEL_OK")
</pallas_src>

<mosaic_0001>
module attributes {stable_mosaic.version = 11 : i64} {
  func.func @_avga_kernel(%arg0: i32, %arg1: memref<392x512xf32, #tpu.memory_space<vmem>>, %arg2: memref<8x128xf32, #tpu.memory_space<vmem>>, %arg3: memref<512x128xf32, #tpu.memory_space<vmem>>, %arg4: memref<1x128xf32, #tpu.memory_space<vmem>>, %arg5: memref<128x128xf32, #tpu.memory_space<vmem>>, %arg6: memref<1x128xf32, #tpu.memory_space<vmem>>, %arg7: memref<128x49xf32, #tpu.memory_space<vmem>>, %arg8: memref<128x49xf32, #tpu.memory_space<vmem>>, %arg9: memref<1x49xf32, #tpu.memory_space<vmem>>, %arg10: memref<8x512xf32, #tpu.memory_space<vmem>>) attributes {dimension_semantics = [#tpu.dimension_semantics<parallel>], iteration_bounds = array<i64: 1>, scalar_prefetch = 0 : i64, scratch_operands = 0 : i64, tpu.core_type = #tpu.core_type<tc>, window_params = [{transform_indices = @transform_0, window_bounds = array<i64: 392, 512>}, {transform_indices = @transform_1, window_bounds = array<i64: 8, 128>}, {pipeline_mode = #tpu.pipeline_mode<synchronous>, transform_indices = @transform_2, window_bounds = array<i64: 512, 128>}, {pipeline_mode = #tpu.pipeline_mode<synchronous>, transform_indices = @transform_3, window_bounds = array<i64: 1, 128>}, {pipeline_mode = #tpu.pipeline_mode<synchronous>, transform_indices = @transform_4, window_bounds = array<i64: 128, 128>}, {pipeline_mode = #tpu.pipeline_mode<synchronous>, transform_indices = @transform_5, window_bounds = array<i64: 1, 128>}, {pipeline_mode = #tpu.pipeline_mode<synchronous>, transform_indices = @transform_6, window_bounds = array<i64: 128, 49>}, {pipeline_mode = #tpu.pipeline_mode<synchronous>, transform_indices = @transform_7, window_bounds = array<i64: 128, 49>}, {pipeline_mode = #tpu.pipeline_mode<synchronous>, transform_indices = @transform_8, window_bounds = array<i64: 1, 49>}, {transform_indices = @transform_9, window_bounds = array<i64: 8, 512>}]} {
    %c0 = arith.constant 0 : index
    %c0_0 = arith.constant 0 : index
    %0 = vector.load %arg1[%c0, %c0_0] : memref<392x512xf32, #tpu.memory_space<vmem>>, vector<392x512xf32>
    %c0_1 = arith.constant 0 : index
    %c0_2 = arith.constant 0 : index
    %1 = vector.load %arg2[%c0_1, %c0_2] : memref<8x128xf32, #tpu.memory_space<vmem>>, vector<8x128xf32>
    %c0_3 = arith.constant 0 : index
    %c0_4 = arith.constant 0 : index
    %2 = vector.load %arg3[%c0_3, %c0_4] : memref<512x128xf32, #tpu.memory_space<vmem>>, vector<512x128xf32>
    %cst = arith.constant dense<0.000000e+00> : vector<392x128xf32>
    %3 = tpu.matmul %0, %2, %cst {dimension_numbers = #tpu.dot_dimension_numbers<[1], [0], [0], [1], [0, 0, 1, 1], [], []>} : vector<392x512xf32>, vector<512x128xf32>, vector<392x128xf32> -> vector<392x128xf32>
    %c0_5 = arith.constant 0 : index
    %c0_6 = arith.constant 0 : index
    %4 = vector.load %arg4[%c0_5, %c0_6] : memref<1x128xf32, #tpu.memory_space<vmem>>, vector<1x128xf32>
    %5 = vector.broadcast %4 : vector<1x128xf32> to vector<392x128xf32>
    %6 = arith.addf %3, %5 : vector<392x128xf32>
    %cst_7 = arith.constant 0.000000e+00 : f32
    %7 = vector.broadcast %cst_7 : f32 to vector<392x128xf32>
    %8 = arith.maximumf %6, %7 : vector<392x128xf32>
    %c0_8 = arith.constant 0 : index
    %c0_9 = arith.constant 0 : index
    %9 = vector.load %arg5[%c0_8, %c0_9] : memref<128x128xf32, #tpu.memory_space<vmem>>, vector<128x128xf32>
    %cst_10 = arith.constant dense<0.000000e+00> : vector<8x128xf32>
    %10 = tpu.matmul %1, %9, %cst_10 {dimension_numbers = #tpu.dot_dimension_numbers<[1], [0], [0], [1], [0, 0, 1, 1], [], []>} : vector<8x128xf32>, vector<128x128xf32>, vector<8x128xf32> -> vector<8x128xf32>
    %c0_11 = arith.constant 0 : index
    %c0_12 = arith.constant 0 : index
    %11 = vector.load %arg6[%c0_11, %c0_12] : memref<1x128xf32, #tpu.memory_space<vmem>>, vector<1x128xf32>
    %12 = vector.broadcast %11 : vector<1x128xf32> to vector<8x128xf32>
    %13 = arith.addf %10, %12 : vector<8x128xf32>
    %cst_13 = arith.constant 0.000000e+00 : f32
    %14 = vector.broadcast %cst_13 : f32 to vector<8x128xf32>
    %15 = arith.maximumf %13, %14 : vector<8x128xf32>
    %c0_14 = arith.constant 0 : index
    %c0_15 = arith.constant 0 : index
    %16 = vector.load %arg7[%c0_14, %c0_15] : memref<128x49xf32, #tpu.memory_space<vmem>>, vector<128x49xf32>
    %cst_16 = arith.constant dense<0.000000e+00> : vector<392x49xf32>
    %17 = tpu.matmul %8, %16, %cst_16 {dimension_numbers = #tpu.dot_dimension_numbers<[1], [0], [0], [1], [0, 0, 1, 1], [], []>} : vector<392x128xf32>, vector<128x49xf32>, vector<392x49xf32> -> vector<392x49xf32>
    %c0_17 = arith.constant 0 : index
    %c0_18 = arith.constant 0 : index
    %18 = vector.load %arg8[%c0_17, %c0_18] : memref<128x49xf32, #tpu.memory_space<vmem>>, vector<128x49xf32>
    %cst_19 = arith.constant dense<0.000000e+00> : vector<8x49xf32>
    %19 = tpu.matmul %15, %18, %cst_19 {dimension_numbers = #tpu.dot_dimension_numbers<[1], [0], [0], [1], [0, 0, 1, 1], [], []>} : vector<8x128xf32>, vector<128x49xf32>, vector<8x49xf32> -> vector<8x49xf32>
    %20 = tpu.iota {dimensions = array<i32: 0>} : vector<392x8xi32>
    %21 = tpu.iota {dimensions = array<i32: 1>} : vector<392x8xi32>
    %c49_i32 = arith.constant 49 : i32
    %22 = vector.broadcast %c49_i32 : i32 to vector<392x8xi32>
    %23 = arith.muli %21, %22 : vector<392x8xi32>
    %24 = arith.cmpi sge, %20, %23 : vector<392x8xi32>
    %c1_i32 = arith.constant 1 : i32
    %25 = vector.broadcast %c1_i32 : i32 to vector<392x8xi32>
    %26 = arith.addi %21, %25 : vector<392x8xi32>
    %c49_i32_20 = arith.constant 49 : i32
    %27 = vector.broadcast %c49_i32_20 : i32 to vector<392x8xi32>
    %28 = arith.muli %26, %27 : vector<392x8xi32>
    %29 = arith.cmpi slt, %20, %28 : vector<392x8xi32>
    %30 = arith.andi %24, %29 : vector<392x8xi1>
    %31 = arith.extui %30 : vector<392x8xi1> to vector<392x8xi32>
    %32 = arith.sitofp %31 : vector<392x8xi32> to vector<392x8xf32>
    %33 = arith.extui %24 : vector<392x8xi1> to vector<392x8xi32>
    %34 = arith.sitofp %33 : vector<392x8xi32> to vector<392x8xf32>
    %cst_21 = arith.constant dense<0.000000e+00> : vector<392xf32>
    %35 = vector.multi_reduction <add>, %34, %cst_21 [1] : vector<392x8xf32> to vector<392xf32>
    %36 = vector.shape_cast %35 : vector<392xf32> to vector<392x1xf32>
    %cst_22 = arith.constant 1.000000e+00 : f32
    %37 = vector.broadcast %cst_22 : f32 to vector<392x1xf32>
    %38 = arith.subf %36, %37 : vector<392x1xf32>
    %39 = tpu.iota {dimensions = array<i32: 0>} : vector<392x49xi32>
    %40 = arith.sitofp %39 : vector<392x49xi32> to vector<392x49xf32>
    %41 = tpu.iota {dimensions = array<i32: 1>} : vector<392x49xi32>
    %42 = arith.sitofp %41 : vector<392x49xi32> to vector<392x49xf32>
    %cst_23 = arith.constant 4.900000e+01 : f32
    %43 = vector.broadcast %cst_23 : f32 to vector<392x1xf32>
    %44 = arith.mulf %38, %43 : vector<392x1xf32>
    %45 = vector.broadcast %44 : vector<392x1xf32> to vector<392x49xf32>
    %46 = arith.subf %40, %45 : vector<392x49xf32>
    %47 = arith.cmpf oeq, %42, %46 : vector<392x49xf32>
    %48 = arith.extui %47 : vector<392x49xi1> to vector<392x49xi32>
    %49 = arith.sitofp %48 : vector<392x49xi32> to vector<392x49xf32>
    %50 = tpu.iota {dimensions = array<i32: 0>} : vector<8x392xi32>
    %51 = tpu.iota {dimensions = array<i32: 1>} : vector<8x392xi32>
    %c49_i32_24 = arith.constant 49 : i32
    %52 = vector.broadcast %c49_i32_24 : i32 to vector<8x392xi32>
    %53 = arith.muli %50, %52 : vector<8x392xi32>
    %54 = arith.cmpi sge, %51, %53 : vector<8x392xi32>
    %c1_i32_25 = arith.constant 1 : i32
    %55 = vector.broadcast %c1_i32_25 : i32 to vector<8x392xi32>
    %56 = arith.addi %50, %55 : vector<8x392xi32>
    %c49_i32_26 = arith.constant 49 : i32
    %57 = vector.broadcast %c49_i32_26 : i32 to vector<8x392xi32>
    %58 = arith.muli %56, %57 : vector<8x392xi32>
    %59 = arith.cmpi slt, %51, %58 : vector<8x392xi32>
    %60 = arith.andi %54, %59 : vector<8x392xi1>
    %61 = arith.extui %60 : vector<8x392xi1> to vector<8x392xi32>
    %62 = arith.sitofp %61 : vector<8x392xi32> to vector<8x392xf32>
    %cst_27 = arith.constant dense<0.000000e+00> : vector<392x49xf32>
    %63 = tpu.matmul %32, %19, %cst_27 {dimension_numbers = #tpu.dot_dimension_numbers<[1], [0], [0], [1], [0, 0, 1, 1], [], []>} : vector<392x8xf32>, vector<8x49xf32>, vector<392x49xf32> -> vector<392x49xf32>
    %64 = arith.mulf %63, %49 : vector<392x49xf32>
    %cst_28 = arith.constant dense<0.000000e+00> : vector<392xf32>
    %65 = vector.multi_reduction <add>, %64, %cst_28 [1] : vector<392x49xf32> to vector<392xf32>
    %66 = vector.shape_cast %65 : vector<392xf32> to vector<392x1xf32>
    %67 = vector.broadcast %66 : vector<392x1xf32> to vector<392x49xf32>
    %68 = arith.addf %17, %67 : vector<392x49xf32>
    %69 = math.tanh %68 : vector<392x49xf32>
    %c0_29 = arith.constant 0 : index
    %c0_30 = arith.constant 0 : index
    %70 = vector.load %arg9[%c0_29, %c0_30] : memref<1x49xf32, #tpu.memory_space<vmem>>, vector<1x49xf32>
    %71 = vector.broadcast %70 : vector<1x49xf32> to vector<392x49xf32>
    %72 = arith.mulf %69, %71 : vector<392x49xf32>
    %cst_31 = arith.constant dense<0.000000e+00> : vector<392xf32>
    %73 = vector.multi_reduction <add>, %72, %cst_31 [1] : vector<392x49xf32> to vector<392xf32>
    %74 = vector.shape_cast %73 : vector<392xf32> to vector<392x1xf32>
    %75 = vector.broadcast %74 : vector<392x1xf32> to vector<392x49xf32>
    %76 = arith.mulf %75, %49 : vector<392x49xf32>
    %cst_32 = arith.constant dense<0.000000e+00> : vector<8x49xf32>
    %77 = tpu.matmul %62, %76, %cst_32 {dimension_numbers = #tpu.dot_dimension_numbers<[1], [0], [0], [1], [0, 0, 1, 1], [], []>} : vector<8x392xf32>, vector<392x49xf32>, vector<8x49xf32> -> vector<8x49xf32>
    %cst_33 = arith.constant dense<0xFF800000> : vector<8xf32>
    %78 = vector.multi_reduction <maximumf>, %77, %cst_33 [1] : vector<8x49xf32> to vector<8xf32>
    %79 = vector.shape_cast %78 : vector<8xf32> to vector<8x1xf32>
    %80 = vector.broadcast %79 : vector<8x1xf32> to vector<8x49xf32>
    %81 = arith.subf %77, %80 : vector<8x49xf32>
    %82 = math.exp %81 : vector<8x49xf32>
    %cst_34 = arith.constant dense<0.000000e+00> : vector<8xf32>
    %83 = vector.multi_reduction <add>, %82, %cst_34 [1] : vector<8x49xf32> to vector<8xf32>
    %84 = vector.shape_cast %83 : vector<8xf32> to vector<8x1xf32>
    %85 = vector.broadcast %84 : vector<8x1xf32> to vector<8x49xf32>
    %86 = arith.divf %82, %85 : vector<8x49xf32>
    %cst_35 = arith.constant dense<0.000000e+00> : vector<8x392xf32>
    %87 = tpu.matmul %86, %49, %cst_35 {dimension_numbers = #tpu.dot_dimension_numbers<[1], [1], [0], [0], [0, 0, 1, 0], [], []>} : vector<8x49xf32>, vector<392x49xf32>, vector<8x392xf32> -> vector<8x392xf32>
    %88 = arith.mulf %87, %62 : vector<8x392xf32>
    %cst_36 = arith.constant dense<0.000000e+00> : vector<8x512xf32>
    %89 = tpu.matmul %88, %0, %cst_36 {dimension_numbers = #tpu.dot_dimension_numbers<[1], [0], [0], [1], [0, 0, 1, 1], [], []>} : vector<8x392xf32>, vector<392x512xf32>, vector<8x512xf32> -> vector<8x512xf32>
    %c0_37 = arith.constant 0 : index
    %c0_38 = arith.constant 0 : index
    %90 = vector.load %arg10[%c0_37, %c0_38] : memref<8x512xf32, #tpu.memory_space<vmem>>, vector<8x512xf32>
    tpu.vector_store %arg10[%c0_37, %c0_38], %89 {strides = array<i32>} : memref<8x512xf32, #tpu.memory_space<vmem>>, vector<8x512xf32>,
    return
  }
  func.func @transform_0(%arg0: i32) -> (i32, i32) {
    %c0_i32 = arith.constant 0 : i32
    %c0_i32_0 = arith.constant 0 : i32
    return %arg0, %c0_i32 : i32, i32
  }
  func.func @transform_1(%arg0: i32) -> (i32, i32) {
    %c0_i32 = arith.constant 0 : i32
    %c0_i32_0 = arith.constant 0 : i32
    return %arg0, %c0_i32 : i32, i32
  }
  func.func @transform_2(%arg0: i32) -> (i32, i32) {
    %c0_i32 = arith.constant 0 : i32
    %c0_i32_0 = arith.constant 0 : i32
    %c0_i32_1 = arith.constant 0 : i32
    return %c0_i32, %c0_i32_0 : i32, i32
  }
  func.func @transform_3(%arg0: i32) -> (i32, i32) {
    %c0_i32 = arith.constant 0 : i32
    %c0_i32_0 = arith.constant 0 : i32
    %c0_i32_1 = arith.constant 0 : i32
    return %c0_i32, %c0_i32_0 : i32, i32
  }
  func.func @transform_4(%arg0: i32) -> (i32, i32) {
    %c0_i32 = arith.constant 0 : i32
    %c0_i32_0 = arith.constant 0 : i32
    %c0_i32_1 = arith.constant 0 : i32
    return %c0_i32, %c0_i32_0 : i32, i32
  }
  func.func @transform_5(%arg0: i32) -> (i32, i32) {
    %c0_i32 = arith.constant 0 : i32
    %c0_i32_0 = arith.constant 0 : i32
    %c0_i32_1 = arith.constant 0 : i32
    return %c0_i32, %c0_i32_0 : i32, i32
  }
  func.func @transform_6(%arg0: i32) -> (i32, i32) {
    %c0_i32 = arith.constant 0 : i32
    %c0_i32_0 = arith.constant 0 : i32
    %c0_i32_1 = arith.constant 0 : i32
    return %c0_i32, %c0_i32_0 : i32, i32
  }
  func.func @transform_7(%arg0: i32) -> (i32, i32) {
    %c0_i32 = arith.constant 0 : i32
    %c0_i32_0 = arith.constant 0 : i32
    %c0_i32_1 = arith.constant 0 : i32
    return %c0_i32, %c0_i32_0 : i32, i32
  }
  func.func @transform_8(%arg0: i32) -> (i32, i32) {
    %c0_i32 = arith.constant 0 : i32
    %c0_i32_0 = arith.constant 0 : i32
    %c0_i32_1 = arith.constant 0 : i32
    return %c0_i32, %c0_i32_0 : i32, i32
  }
  func.func @transform_9(%arg0: i32) -> (i32, i32) {
    %c0_i32 = arith.constant 0 : i32
    %c0_i32_0 = arith.constant 0 : i32
    return %arg0, %c0_i32 : i32, i32
  }
}

</mosaic_0001>

<bundles_post_ra>
// kernel: tpu_custom_call.1
= control target key start
LH: loop header
LB: loop body
LE: loop exit
PB: predicated region body
PF: predicated region fallthrough
CT: control target
= control target key end

     0   :  { %14 = vsyncpa [#allocation3], 0  ;;  %s6792_s0 = inlined_call_operand.hbm [shape: f32[392,512], index: 0, kind: input, shape index: {}]   ;;  %s6793_s1 = inlined_call_operand.vmem [shape: f32[8,128], index: 1, kind: input, shape index: {}]   ;;  %s6794_s2 = inlined_call_operand.hbm [shape: f32[512,128], index: 2, kind: input, shape index: {}]   ;;  %s6795_s3 = inlined_call_operand.vmem [shape: f32[1,128], index: 3, kind: input, shape index: {}]   ;;  %s6796_s4 = inlined_call_operand.vmem [shape: f32[128,128], index: 4, kind: input, shape index: {}]   ;;  %s6797_s5 = inlined_call_operand.vmem [shape: f32[1,128], index: 5, kind: input, shape index: {}]   ;;  %s6798_s6 = inlined_call_operand.vmem [shape: f32[128,49], index: 6, kind: input, shape index: {}]   ;;  %s6799_s7 = inlined_call_operand.vmem [shape: f32[128,49], index: 7, kind: input, shape index: {}]   ;;  %s6800_s8 = inlined_call_operand.vmem [shape: f32[1,49], index: 8, kind: input, shape index: {}]   ;;  %s6801_s9 = inlined_call_operand.hbm [shape: f32[8,512], index: 9, kind: output, shape index: {}]  }
   0x1   :  { %15 = vsyncpa [#allocation6], 0 }
   0x2   :  { %16 = vsyncpa [#allocation4], 0  ;;  %s21_s11 = sshll.u32 %s6792_s0, 4  ;;  %s4400_s12 = smov [#allocation2]   ;;  %s22_s11 = int_to_ptr.hbm [resolvable:$true] %s21_s11 }
   0x3   :  { %s23_s13 = sshll.u32 %s4400_s12, 4  ;;  %s36_s16 = sshll.u32 %s6794_s2, 4  ;;  %s24_s13 = int_to_ptr.vmem [resolvable:$true] %s23_s13  ;;  %s37_s16 = int_to_ptr.hbm [resolvable:$true] %s36_s16 }
   0x4   :  { %s4401_s17 = smov 512   ;;  %s4402_s18 = smov 32  }
   0x5   :  { %29 = dma.hbm_to_vmem [thread:$0]  %s22_s11, 25088, %s24_s13, [#allocation3], %s4401_s17, %s4401_s17, %s4402_s18  }
   0x6   :  { %s4403_s19 = smov [#allocation5]   ;;  %s4404_s21 = smov 128  }
   0x7   :  { %s38_s20 = sshll.u32 %s4403_s19, 4  ;;  %s4405_s22 = smov 8   ;;  %s39_s20 = int_to_ptr.vmem [resolvable:$true] %s38_s20 }
   0x8   :  { %44 = dma.hbm_to_vmem [thread:$0]  %s37_s16, 8192, %s39_s20, [#allocation6], %s4404_s21, %s4404_s21, %s4405_s22  }
   0x9   :  { %4394 = dma.done.wait [#allocation3], 25088  }
   0xa   :  { %4395 = vsyncadd [#allocation3], 4294942208 }
   0xb   :  { %4396 = dma.done.wait [#allocation6], 8192  }
   0xc   :  { %4397 = vsyncadd [#allocation6], 4294959104  ;;  %v277_v0 = vld [vmem:[#allocation5 + $0x78] sm:$0xff]  ;;  %v276_v3 = vld [vmem:[#allocation5 + $0x70] sm:$0xff]  ;;  %vm1526_vm1 = vcmask 64512   ;;  %s3689_s30 = sshll.u32 %s6801_s9, 4  ;;  %s3690_s30 = int_to_ptr.hbm [resolvable:$true] %s3689_s30 }
   0xd   :  { %v309_v1 = vld [vmem:[#allocation5 + $0x178] sm:$0xff]  ;;  %330 = vmatpush.msra.mxu0 %v277_v0  ;;  %v308_v5 = vld [vmem:[#allocation5 + $0x170] sm:$0xff]  ;;  %v275_v7 = vld [vmem:[#allocation5 + $0x68] sm:$0xff] }
   0xe   :  { %v325_v2 = vld [vmem:[#allocation5 + $0x1f8] sm:$0xff]  ;;  %658 = vmatpush.msra.mxu2 %v309_v1  ;;  %v324_v6 = vld [vmem:[#allocation5 + $0x1f0] sm:$0xff]  ;;  %v307_v9 = vld [vmem:[#allocation5 + $0x168] sm:$0xff] }
   0xf   :  { %v293_v4 = vld [vmem:[#allocation5 + $0xf8] sm:$0xff]  ;;  %822 = vmatpush.msra.mxu3 %v325_v2  ;;  %v292_v8 = vld [vmem:[#allocation5 + $0xf0] sm:$0xff]  ;;  %331 = vmatpush.msra.mxu0 %v276_v3  ;;  %v323_v10 = vld [vmem:[#allocation5 + $0x1e8] sm:$0xff] }
  0x10   :  { %494 = vmatpush.msra.mxu1 %v293_v4  ;;  %659 = vmatpush.msra.mxu2 %v308_v5  ;;  %v274_v11 = vld [vmem:[#allocation5 + $0x60] sm:$0xff]  ;;  %v291_v12 = vld [vmem:[#allocation5 + $0xe8] sm:$0xff]  ;;  %v273_v16 = vld [vmem:[#allocation5 + $0x58] sm:$0xff] }
  0x11   :  { %823 = vmatpush.msra.mxu3 %v324_v6  ;;  %v306_v13 = vld [vmem:[#allocation5 + $0x160] sm:$0xff]  ;;  %332 = vmatpush.msra.mxu0 %v275_v7  ;;  %v305_v17 = vld [vmem:[#allocation5 + $0x158] sm:$0xff]  ;;  %v272_v20 = vld [vmem:[#allocation5 + $0x50] sm:$0xff] }
  0x12   :  { %495 = vmatpush.msra.mxu1 %v292_v8  ;;  %660 = vmatpush.msra.mxu2 %v307_v9  ;;  %v322_v14 = vld [vmem:[#allocation5 + $0x1e0] sm:$0xff]  ;;  %v321_v18 = vld [vmem:[#allocation5 + $0x1d8] sm:$0xff]  ;;  %v304_v21 = vld [vmem:[#allocation5 + $0x150] sm:$0xff] }
  0x13   :  { %v290_v15 = vld [vmem:[#allocation5 + $0xe0] sm:$0xff]  ;;  %824 = vmatpush.msra.mxu3 %v323_v10  ;;  %333 = vmatpush.msra.mxu0 %v274_v11  ;;  %v289_v19 = vld [vmem:[#allocation5 + $0xd8] sm:$0xff]  ;;  %v320_v22 = vld [vmem:[#allocation5 + $0x1d0] sm:$0xff] }
  0x14   :  { %496 = vmatpush.msra.mxu1 %v291_v12  ;;  %661 = vmatpush.msra.mxu2 %v306_v13  ;;  %v288_v23 = vld [vmem:[#allocation5 + $0xd0] sm:$0xff]  ;;  %v271_v24 = vld [vmem:[#allocation5 + $0x48] sm:$0xff]  ;;  %v270_v28 = vld [vmem:[#allocation5 + $0x40] sm:$0xff] }
  0x15   :  { %825 = vmatpush.msra.mxu3 %v322_v14  ;;  %334 = vmatpush.msra.mxu0 %v273_v16  ;;  %v303_v25 = vld [vmem:[#allocation5 + $0x148] sm:$0xff]  ;;  %v302_v29 = vld [vmem:[#allocation5 + $0x140] sm:$0xff]  ;;  %v269_v32 = vld [vmem:[#allocation5 + $0x38] sm:$0xff] }
  0x16   :  { %497 = vmatpush.msra.mxu1 %v290_v15  ;;  %662 = vmatpush.msra.mxu2 %v305_v17  ;;  %v319_v26 = vld [vmem:[#allocation5 + $0x1c8] sm:$0xff]  ;;  %v318_v30 = vld [vmem:[#allocation5 + $0x1c0] sm:$0xff]  ;;  %v301_v33 = vld [vmem:[#allocation5 + $0x138] sm:$0xff] }
  0x17   :  { %826 = vmatpush.msra.mxu3 %v321_v18  ;;  %335 = vmatpush.msra.mxu0 %v272_v20  ;;  %v287_v27 = vld [vmem:[#allocation5 + $0xc8] sm:$0xff]  ;;  %v286_v31 = vld [vmem:[#allocation5 + $0xc0] sm:$0xff]  ;;  %v317_v34 = vld [vmem:[#allocation5 + $0x1b8] sm:$0xff] }
  0x18   :  { %498 = vmatpush.msra.mxu1 %v289_v19  ;;  %663 = vmatpush.msra.mxu2 %v304_v21  ;;  %v285_v35 = vld [vmem:[#allocation5 + $0xb8] sm:$0xff]  ;;  %v268_v36 = vld [vmem:[#allocation5 + $0x30] sm:$0xff]  ;;  %v267_v40 = vld [vmem:[#allocation5 + $0x28] sm:$0xff] }
  0x19   :  { %827 = vmatpush.msra.mxu3 %v320_v22  ;;  %336 = vmatpush.msra.mxu0 %v271_v24  ;;  %v300_v37 = vld [vmem:[#allocation5 + $0x130] sm:$0xff]  ;;  %v299_v41 = vld [vmem:[#allocation5 + $0x128] sm:$0xff]  ;;  %v266_v44 = vld [vmem:[#allocation5 + $0x20] sm:$0xff] }
  0x1a   :  { %499 = vmatpush.msra.mxu1 %v288_v23  ;;  %664 = vmatpush.msra.mxu2 %v303_v25  ;;  %v316_v38 = vld [vmem:[#allocation5 + $0x1b0] sm:$0xff]  ;;  %v315_v42 = vld [vmem:[#allocation5 + $0x1a8] sm:$0xff]  ;;  %v298_v45 = vld [vmem:[#allocation5 + $0x120] sm:$0xff] }
  0x1b   :  { %828 = vmatpush.msra.mxu3 %v319_v26  ;;  %337 = vmatpush.msra.mxu0 %v270_v28  ;;  %v284_v39 = vld [vmem:[#allocation5 + $0xb0] sm:$0xff]  ;;  %v283_v43 = vld [vmem:[#allocation5 + $0xa8] sm:$0xff]  ;;  %v314_v46 = vld [vmem:[#allocation5 + $0x1a0] sm:$0xff] }
  0x1c   :  { %500 = vmatpush.msra.mxu1 %v287_v27  ;;  %665 = vmatpush.msra.mxu2 %v302_v29  ;;  %v282_v47 = vld [vmem:[#allocation5 + $0xa0] sm:$0xff]  ;;  %v265_v48 = vld [vmem:[#allocation5 + $0x18] sm:$0xff]  ;;  %v264_v52 = vld [vmem:[#allocation5 + $0x10] sm:$0xff] }
  0x1d   :  { %829 = vmatpush.msra.mxu3 %v318_v30  ;;  %338 = vmatpush.msra.mxu0 %v269_v32  ;;  %v297_v49 = vld [vmem:[#allocation5 + $0x118] sm:$0xff]  ;;  %v296_v53 = vld [vmem:[#allocation5 + $0x110] sm:$0xff]  ;;  %v263_v55 = vld [vmem:[#allocation5 + $0x8] sm:$0xff] }
  0x1e   :  { %501 = vmatpush.msra.mxu1 %v286_v31  ;;  %666 = vmatpush.msra.mxu2 %v301_v33  ;;  %v313_v50 = vld [vmem:[#allocation5 + $0x198] sm:$0xff]  ;;  %v312_v54 = vld [vmem:[#allocation5 + $0x190] sm:$0xff]  ;;  %v295_v57 = vld [vmem:[#allocation5 + $0x108] sm:$0xff] }
  0x1f   :  { %830 = vmatpush.msra.mxu3 %v317_v34  ;;  %339 = vmatpush.msra.mxu0 %v268_v36  ;;  %v281_v51 = vld [vmem:[#allocation5 + $0x98] sm:$0xff]  ;;  %v280_v56 = vld [vmem:[#allocation5 + $0x90] sm:$0xff]  ;;  %v311_v58 = vld [vmem:[#allocation5 + $0x188] sm:$0xff] }
  0x20   :  { %502 = vmatpush.msra.mxu1 %v285_v35  ;;  %667 = vmatpush.msra.mxu2 %v300_v37  ;;  %v279_v59 = vld [vmem:[#allocation5 + $0x88] sm:$0xff]  ;;  %v262_v60 = vld [vmem:[#allocation5] sm:$0xff]  ;;  %v67_v0 = vld [vmem:[#allocation2 + $0x10] sm:$0xff] }
  0x21   :  { %831 = vmatpush.msra.mxu3 %v316_v38  ;;  %340 = vmatpush.msra.mxu0 %v267_v40  ;;  %v294_v61 = vld [vmem:[#allocation5 + $0x100] sm:$0xff]  ;;  %v68_v1 = vld [vmem:[#allocation2 + $0x18] sm:$0xff]  ;;  %v66_v3 = vld [vmem:[#allocation2 + $0x8] sm:$0xff] }
  0x22   :  { %503 = vmatpush.msra.mxu1 %v284_v39  ;;  %668 = vmatpush.msra.mxu2 %v299_v41  ;;  %v310_v62 = vld [vmem:[#allocation5 + $0x180] sm:$0xff]  ;;  %v71_v5 = vld [vmem:[#allocation2 + $0x30] sm:$0xff]  ;;  %v72_v6 = vld [vmem:[#allocation2 + $0x38] sm:$0xff] }
  0x23   :  { %832 = vmatpush.msra.mxu3 %v315_v42  ;;  %341 = vmatpush.msra.mxu0 %v266_v44  ;;  %v65_v63 = vld [vmem:[#allocation2] sm:$0xff]  ;;  %v70_v7 = vld [vmem:[#allocation2 + $0x28] sm:$0xff]  ;;  %v75_v9 = vld [vmem:[#allocation2 + $0x50] sm:$0xff] }
  0x24   :  { %504 = vmatpush.msra.mxu1 %v283_v43  ;;  %669 = vmatpush.msra.mxu2 %v298_v45  ;;  %v278_v2 = vld [vmem:[#allocation5 + $0x80] sm:$0xff]  ;;  %v76_v10 = vld [vmem:[#allocation2 + $0x58] sm:$0xff]  ;;  %v74_v11 = vld [vmem:[#allocation2 + $0x48] sm:$0xff] }
  0x25   :  { %833 = vmatpush.msra.mxu3 %v314_v46  ;;  %342 = vmatpush.msra.mxu0 %v265_v48  ;;  %v69_v4 = vld [vmem:[#allocation2 + $0x20] sm:$0xff]  ;;  %v79_v13 = vld [vmem:[#allocation2 + $0x70] sm:$0xff]  ;;  %v80_v14 = vld [vmem:[#allocation2 + $0x78] sm:$0xff] }
  0x26   :  { %505 = vmatpush.msra.mxu1 %v282_v47  ;;  %670 = vmatpush.msra.mxu2 %v297_v49  ;;  %v73_v8 = vld [vmem:[#allocation2 + $0x40] sm:$0xff]  ;;  %v78_v15 = vld [vmem:[#allocation2 + $0x68] sm:$0xff]  ;;  %v83_v17 = vld [vmem:[#allocation2 + $0x90] sm:$0xff] }
  0x27   :  { %834 = vmatpush.msra.mxu3 %v313_v50  ;;  %343 = vmatpush.msra.mxu0 %v264_v52  ;;  %v77_v12 = vld [vmem:[#allocation2 + $0x60] sm:$0xff]  ;;  %v84_v18 = vld [vmem:[#allocation2 + $0x98] sm:$0xff]  ;;  %v82_v19 = vld [vmem:[#allocation2 + $0x88] sm:$0xff] }
  0x28   :  { %506 = vmatpush.msra.mxu1 %v281_v51  ;;  %671 = vmatpush.msra.mxu2 %v296_v53  ;;  %v81_v16 = vld [vmem:[#allocation2 + $0x80] sm:$0xff]  ;;  %v87_v21 = vld [vmem:[#allocation2 + $0xb0] sm:$0xff]  ;;  %v88_v22 = vld [vmem:[#allocation2 + $0xb8] sm:$0xff] }
  0x29   :  { %835 = vmatpush.msra.mxu3 %v312_v54  ;;  %344 = vmatpush.msra.mxu0 %v263_v55  ;;  %v85_v20 = vld [vmem:[#allocation2 + $0xa0] sm:$0xff]  ;;  %v86_v23 = vld [vmem:[#allocation2 + $0xa8] sm:$0xff]  ;;  %v91_v25 = vld [vmem:[#allocation2 + $0xd0] sm:$0xff] }
  0x2a   :  { %507 = vmatpush.msra.mxu1 %v280_v56  ;;  %672 = vmatpush.msra.mxu2 %v295_v57  ;;  %v89_v24 = vld [vmem:[#allocation2 + $0xc0] sm:$0xff]  ;;  %v92_v26 = vld [vmem:[#allocation2 + $0xd8] sm:$0xff]  ;;  %v90_v27 = vld [vmem:[#allocation2 + $0xc8] sm:$0xff] }
  0x2b   :  { %836 = vmatpush.msra.mxu3 %v311_v58  ;;  %345 = vmatpush.msra.mxu0 %v262_v60  ;;  %v93_v28 = vld [vmem:[#allocation2 + $0xe0] sm:$0xff]  ;;  %v95_v29 = vld [vmem:[#allocation2 + $0xf0] sm:$0xff]  ;;  %v96_v30 = vld [vmem:[#allocation2 + $0xf8] sm:$0xff] }
  0x2c   :  { %508 = vmatpush.msra.mxu1 %v279_v59  ;;  %673 = vmatpush.msra.mxu2 %v294_v61  ;;  %v94_v31 = vld [vmem:[#allocation2 + $0xe8] sm:$0xff]  ;;  %v97_v32 = vld [vmem:[#allocation2 + $0x100] sm:$0xff]  ;;  %v99_v33 = vld [vmem:[#allocation2 + $0x110] sm:$0xff] }
  0x2d   :  { %837 = vmatpush.msra.mxu3 %v310_v62  ;;  %346 = vmatmul.f32.vlgmr.msra.gmra.mxu0 %v65_v63  ;;  %v100_v34 = vld [vmem:[#allocation2 + $0x118] sm:$0xff]  ;;  %v98_v35 = vld [vmem:[#allocation2 + $0x108] sm:$0xff]  ;;  %v101_v36 = vld [vmem:[#allocation2 + $0x120] sm:$0xff] }
  0x2e   :  { %674 = vmatmul.f32.vlgmr.msra.gmra.mxu2 %v67_v0  ;;  %838 = vmatmul.f32.vlgmr.msra.gmra.mxu3 %v68_v1  ;;  %v103_v37 = vld [vmem:[#allocation2 + $0x130] sm:$0xff]  ;;  %v104_v38 = vld [vmem:[#allocation2 + $0x138] sm:$0xff]  ;;  %v102_v39 = vld [vmem:[#allocation2 + $0x128] sm:$0xff] }
  0x2f   :  { %509 = vmatpush.msra.mxu1 %v278_v2  ;;  %v105_v40 = vld [vmem:[#allocation2 + $0x140] sm:$0xff]  ;;  %v107_v41 = vld [vmem:[#allocation2 + $0x150] sm:$0xff]  ;;  %v108_v42 = vld [vmem:[#allocation2 + $0x158] sm:$0xff] }
  0x30   :  { %510 = vmatmul.f32.vlgmr.msra.gmra.mxu1 %v66_v3  ;;  %v106_v43 = vld [vmem:[#allocation2 + $0x148] sm:$0xff]  ;;  %v109_v44 = vld [vmem:[#allocation2 + $0x160] sm:$0xff]  ;;  %v111_v45 = vld [vmem:[#allocation2 + $0x170] sm:$0xff] }
  0x31   :  { %v112_v46 = vld [vmem:[#allocation2 + $0x178] sm:$0xff]  ;;  %v110_v47 = vld [vmem:[#allocation2 + $0x168] sm:$0xff]  ;;  %v113_v48 = vld [vmem:[#allocation2 + $0x180] sm:$0xff] }
  0x32   :  { %v115_v49 = vld [vmem:[#allocation2 + $0x190] sm:$0xff]  ;;  %v116_v50 = vld [vmem:[#allocation2 + $0x198] sm:$0xff]  ;;  %v114_v51 = vld [vmem:[#allocation2 + $0x188] sm:$0xff] }
  0x33   :  { %v117_v52 = vld [vmem:[#allocation2 + $0x1a0] sm:$0xff]  ;;  %v119_v53 = vld [vmem:[#allocation2 + $0x1b0] sm:$0xff]  ;;  %v120_v54 = vld [vmem:[#allocation2 + $0x1b8] sm:$0xff] }
  0x34   :  { %v118_v55 = vld [vmem:[#allocation2 + $0x1a8] sm:$0xff]  ;;  %v121_v56 = vld [vmem:[#allocation2 + $0x1c0] sm:$0xff]  ;;  %v123_v57 = vld [vmem:[#allocation2 + $0x1d0] sm:$0xff] }
  0x35   :  { %349 = vmatmul.f32.gmra.mxu0 %v69_v4  ;;  %v124_v58 = vld [vmem:[#allocation2 + $0x1d8] sm:$0xff]  ;;  %v122_v59 = vld [vmem:[#allocation2 + $0x1c8] sm:$0xff]  ;;  %v125_v60 = vld [vmem:[#allocation2 + $0x1e0] sm:$0xff] }
  0x36   :  { %677 = vmatmul.f32.gmra.mxu2 %v71_v5  ;;  %841 = vmatmul.f32.gmra.mxu3 %v72_v6  ;;  %v127_v61 = vld [vmem:[#allocation2 + $0x1f0] sm:$0xff]  ;;  %v128_v62 = vld [vmem:[#allocation2 + $0x1f8] sm:$0xff]  ;;  %v126_v63 = vld [vmem:[#allocation2 + $0x1e8] sm:$0xff] }
  0x37   :  { %v4468_v0 = vld [vmem:[%s6795_s3] ss:$0 sm:$0xff]  ;;  %v131_v3 = vld [vmem:[#allocation2 + $0x210] sm:$0xff]  ;;  %v132_v4 = vld [vmem:[#allocation2 + $0x218] sm:$0xff] }
  0x38   :  { %513 = vmatmul.f32.gmra.mxu1 %v70_v7  ;;  %v129_v2 = vld [vmem:[#allocation2 + $0x200] sm:$0xff]  ;;  %v130_v7 = vld [vmem:[#allocation2 + $0x208] sm:$0xff] }
  0x3d   :  { %352 = vmatmul.f32.gmra.mxu0 %v73_v8 }
  0x3e   :  { %680 = vmatmul.f32.gmra.mxu2 %v75_v9  ;;  %844 = vmatmul.f32.gmra.mxu3 %v76_v10 }
  0x40   :  { %516 = vmatmul.f32.gmra.mxu1 %v74_v11 }
  0x45   :  { %355 = vmatmul.f32.gmra.mxu0 %v77_v12 }
  0x46   :  { %683 = vmatmul.f32.gmra.mxu2 %v79_v13  ;;  %847 = vmatmul.f32.gmra.mxu3 %v80_v14  ;;  %v133_v13 = vld [vmem:[#allocation2 + $0x220] sm:$0xff]  ;;  %v135_v14 = vld [vmem:[#allocation2 + $0x230] sm:$0xff] }
  0x48   :  { %519 = vmatmul.f32.gmra.mxu1 %v78_v15  ;;  %v136_v15 = vld [vmem:[#allocation2 + $0x238] sm:$0xff] }
  0x4d   :  { %358 = vmatmul.f32.gmra.mxu0 %v81_v16 }
  0x4e   :  { %686 = vmatmul.f32.gmra.mxu2 %v83_v17  ;;  %850 = vmatmul.f32.gmra.mxu3 %v84_v18 }
  0x50   :  { %522 = vmatmul.f32.gmra.mxu1 %v82_v19  ;;  %v134_v19 = vld [vmem:[#allocation2 + $0x228] sm:$0xff] }
  0x55   :  { %361 = vmatmul.f32.gmra.mxu0 %v85_v20 }
  0x56   :  { %689 = vmatmul.f32.gmra.mxu2 %v87_v21  ;;  %853 = vmatmul.f32.gmra.mxu3 %v88_v22 }
  0x58   :  { %525 = vmatmul.f32.gmra.mxu1 %v86_v23 }
  0x5d   :  { %364 = vmatmul.f32.gmra.mxu0 %v89_v24 }
  0x5e   :  { %692 = vmatmul.f32.gmra.mxu2 %v91_v25  ;;  %856 = vmatmul.f32.gmra.mxu3 %v92_v26  ;;  %v137_v25 = vld [vmem:[#allocation2 + $0x240] sm:$0xff]  ;;  %v139_v26 = vld [vmem:[#allocation2 + $0x250] sm:$0xff] }
  0x60   :  { %528 = vmatmul.f32.gmra.mxu1 %v90_v27  ;;  %v140_v27 = vld [vmem:[#allocation2 + $0x258] sm:$0xff] }
  0x65   :  { %367 = vmatmul.f32.gmra.mxu0 %v93_v28 }
  0x66   :  { %695 = vmatmul.f32.gmra.mxu2 %v95_v29  ;;  %859 = vmatmul.f32.gmra.mxu3 %v96_v30 }
  0x68   :  { %531 = vmatmul.f32.gmra.mxu1 %v94_v31  ;;  %v138_v31 = vld [vmem:[#allocation2 + $0x248] sm:$0xff] }
  0x6d   :  { %370 = vmatmul.f32.gmra.mxu0 %v97_v32 }
  0x6e   :  { %698 = vmatmul.f32.gmra.mxu2 %v99_v33  ;;  %862 = vmatmul.f32.gmra.mxu3 %v100_v34 }
  0x70   :  { %534 = vmatmul.f32.gmra.mxu1 %v98_v35 }
  0x75   :  { %373 = vmatmul.f32.gmra.mxu0 %v101_v36 }
  0x76   :  { %701 = vmatmul.f32.gmra.mxu2 %v103_v37  ;;  %865 = vmatmul.f32.gmra.mxu3 %v104_v38  ;;  %v141_v37 = vld [vmem:[#allocation2 + $0x260] sm:$0xff]  ;;  %v143_v38 = vld [vmem:[#allocation2 + $0x270] sm:$0xff] }
  0x78   :  { %537 = vmatmul.f32.gmra.mxu1 %v102_v39  ;;  %v144_v39 = vld [vmem:[#allocation2 + $0x278] sm:$0xff] }
  0x7d   :  { %376 = vmatmul.f32.gmra.mxu0 %v105_v40 }
  0x7e   :  { %704 = vmatmul.f32.gmra.mxu2 %v107_v41  ;;  %868 = vmatmul.f32.gmra.mxu3 %v108_v42 }
  0x80   :  { %540 = vmatmul.f32.gmra.mxu1 %v106_v43  ;;  %v142_v43 = vld [vmem:[#allocation2 + $0x268] sm:$0xff] }
  0x85   :  { %379 = vmatmul.f32.gmra.mxu0 %v109_v44 }
  0x86   :  { %707 = vmatmul.f32.gmra.mxu2 %v111_v45  ;;  %871 = vmatmul.f32.gmra.mxu3 %v112_v46 }
  0x88   :  { %543 = vmatmul.f32.gmra.mxu1 %v110_v47 }
  0x8d   :  { %382 = vmatmul.f32.gmra.mxu0 %v113_v48 }
  0x8e   :  { %710 = vmatmul.f32.gmra.mxu2 %v115_v49  ;;  %874 = vmatmul.f32.gmra.mxu3 %v116_v50  ;;  %v145_v49 = vld [vmem:[#allocation2 + $0x280] sm:$0xff]  ;;  %v147_v50 = vld [vmem:[#allocation2 + $0x290] sm:$0xff] }
  0x90   :  { %546 = vmatmul.f32.gmra.mxu1 %v114_v51  ;;  %v148_v51 = vld [vmem:[#allocation2 + $0x298] sm:$0xff] }
  0x95   :  { %385 = vmatmul.f32.gmra.mxu0 %v117_v52 }
  0x96   :  { %713 = vmatmul.f32.gmra.mxu2 %v119_v53  ;;  %877 = vmatmul.f32.gmra.mxu3 %v120_v54 }
  0x98   :  { %549 = vmatmul.f32.gmra.mxu1 %v118_v55  ;;  %v146_v55 = vld [vmem:[#allocation2 + $0x288] sm:$0xff] }
  0x9d   :  { %388 = vmatmul.f32.gmra.mxu0 %v121_v56 }
  0x9e   :  { %716 = vmatmul.f32.gmra.mxu2 %v123_v57  ;;  %880 = vmatmul.f32.gmra.mxu3 %v124_v58 }
  0xa0   :  { %552 = vmatmul.f32.gmra.mxu1 %v122_v59 }
  0xa5   :  { %391 = vmatmul.f32.gmra.mxu0 %v125_v60 }
  0xa6   :  { %719 = vmatmul.f32.gmra.mxu2 %v127_v61  ;;  %883 = vmatmul.f32.gmra.mxu3 %v128_v62  ;;  %v149_v61 = vld [vmem:[#allocation2 + $0x2a0] sm:$0xff]  ;;  %v151_v62 = vld [vmem:[#allocation2 + $0x2b0] sm:$0xff] }
  0xa8   :  { %555 = vmatmul.f32.gmra.mxu1 %v126_v63  ;;  %v152_v63 = vld [vmem:[#allocation2 + $0x2b8] sm:$0xff] }
  0xaa   :  { %v347_v1 = vpop.f32.mrf.mxu0 }
  0xab   :  { %v348_v5 = vadd.f32 %v4468_v0, %v347_v1 }
  0xad   :  { %v511_v6 = vpop.f32.mrf.mxu1  ;;  %394 = vmatmul.f32.gmra.mxu0 %v129_v2 }
  0xae   :  { %722 = vmatmul.f32.gmra.mxu2 %v131_v3  ;;  %886 = vmatmul.f32.gmra.mxu3 %v132_v4  ;;  %v512_v8 = vadd.f32 %v511_v6, %v348_v5  ;;  %v150_v4 = vld [vmem:[#allocation2 + $0x2a8] sm:$0xff] }
  0xb0   :  { %558 = vmatmul.f32.gmra.mxu1 %v130_v7 }
  0xb1   :  { %v675_v9 = vpop.f32.mrf.mxu2  ;;  %v839_v10 = vpop.f32.mrf.mxu3 }
  0xb2   :  { %v676_v11 = vadd.f32 %v675_v9, %v512_v8  ;;  %v350_v12 = vpop.f32.mrf.mxu0 }
  0xb3   :  { %v351_v17 = vadd.f32 %v4468_v0, %v350_v12  ;;  %v156_v12 = vld [vmem:[#allocation2 + $0x2d8] sm:$0xff] }
  0xb4   :  { %v4471_v16 = vadd.f32 %v839_v10, %v676_v11  ;;  %v153_v10 = vld [vmem:[#allocation2 + $0x2c0] sm:$0xff]  ;;  %v155_v11 = vld [vmem:[#allocation2 + $0x2d0] sm:$0xff] }
  0xb5   :  { %v514_v18 = vpop.f32.mrf.mxu1  ;;  %397 = vmatmul.f32.gmra.mxu0 %v133_v13 }
  0xb6   :  { %725 = vmatmul.f32.gmra.mxu2 %v135_v14  ;;  %889 = vmatmul.f32.gmra.mxu3 %v136_v15  ;;  %v515_v20 = vadd.f32 %v514_v18, %v351_v17  ;;  %v154_v17 = vld [vmem:[#allocation2 + $0x2c8] sm:$0xff] }
  0xb8   :  { %561 = vmatmul.f32.gmra.mxu1 %v134_v19 }
  0xb9   :  { %v678_v21 = vpop.f32.mrf.mxu2  ;;  %v842_v22 = vpop.f32.mrf.mxu3 }
  0xba   :  { %v679_v23 = vadd.f32 %v678_v21, %v515_v20  ;;  %v353_v24 = vpop.f32.mrf.mxu0 }
  0xbb   :  { %v354_v29 = vadd.f32 %v4468_v0, %v353_v24  ;;  %v159_v24 = vld [vmem:[#allocation2 + $0x2f0] sm:$0xff] }
  0xbc   :  { %v4474_v28 = vadd.f32 %v842_v22, %v679_v23  ;;  %v157_v23 = vld [vmem:[#allocation2 + $0x2e0] sm:$0xff] }
  0xbd   :  { %v517_v30 = vpop.f32.mrf.mxu1  ;;  %400 = vmatmul.f32.gmra.mxu0 %v137_v25  ;;  %v160_v25 = vld [vmem:[#allocation2 + $0x2f8] sm:$0xff] }
  0xbe   :  { %728 = vmatmul.f32.gmra.mxu2 %v139_v26  ;;  %892 = vmatmul.f32.gmra.mxu3 %v140_v27  ;;  %v518_v32 = vadd.f32 %v517_v30, %v354_v29  ;;  %v158_v30 = vld [vmem:[#allocation2 + $0x2e8] sm:$0xff] }
  0xc0   :  { %564 = vmatmul.f32.gmra.mxu1 %v138_v31 }
  0xc1   :  { %v681_v33 = vpop.f32.mrf.mxu2  ;;  %v845_v34 = vpop.f32.mrf.mxu3 }
  0xc2   :  { %v682_v35 = vadd.f32 %v681_v33, %v518_v32  ;;  %v356_v36 = vpop.f32.mrf.mxu0 }
  0xc3   :  { %v357_v41 = vadd.f32 %v4468_v0, %v356_v36  ;;  %v161_v36 = vld [vmem:[#allocation2 + $0x300] sm:$0xff] }
  0xc4   :  { %v4477_v40 = vadd.f32 %v845_v34, %v682_v35 }
  0xc5   :  { %v520_v42 = vpop.f32.mrf.mxu1  ;;  %403 = vmatmul.f32.gmra.mxu0 %v141_v37  ;;  %v163_v37 = vld [vmem:[#allocation2 + $0x310] sm:$0xff] }
  0xc6   :  { %731 = vmatmul.f32.gmra.mxu2 %v143_v38  ;;  %895 = vmatmul.f32.gmra.mxu3 %v144_v39  ;;  %v521_v44 = vadd.f32 %v520_v42, %v357_v41  ;;  %v164_v38 = vld [vmem:[#allocation2 + $0x318] sm:$0xff] }
  0xc8   :  { %567 = vmatmul.f32.gmra.mxu1 %v142_v43  ;;  %v162_v43 = vld [vmem:[#allocation2 + $0x308] sm:$0xff] }
  0xc9   :  { %v684_v45 = vpop.f32.mrf.mxu2  ;;  %v848_v46 = vpop.f32.mrf.mxu3 }
  0xca   :  { %v685_v47 = vadd.f32 %v684_v45, %v521_v44  ;;  %v359_v48 = vpop.f32.mrf.mxu0 }
  0xcb   :  { %v360_v53 = vadd.f32 %v4468_v0, %v359_v48 }
  0xcc   :  { %v4480_v52 = vadd.f32 %v848_v46, %v685_v47 }
  0xcd   :  { %v523_v54 = vpop.f32.mrf.mxu1  ;;  %406 = vmatmul.f32.gmra.mxu0 %v145_v49  ;;  %v165_v49 = vld [vmem:[#allocation2 + $0x320] sm:$0xff] }
  0xce   :  { %734 = vmatmul.f32.gmra.mxu2 %v147_v50  ;;  %898 = vmatmul.f32.gmra.mxu3 %v148_v51  ;;  %v524_v56 = vadd.f32 %v523_v54, %v360_v53  ;;  %v167_v50 = vld [vmem:[#allocation2 + $0x330] sm:$0xff]  ;;  %v168_v51 = vld [vmem:[#allocation2 + $0x338] sm:$0xff] }
  0xd0   :  { %570 = vmatmul.f32.gmra.mxu1 %v146_v55 }
  0xd1   :  { %v687_v57 = vpop.f32.mrf.mxu2  ;;  %v851_v58 = vpop.f32.mrf.mxu3 }
  0xd2   :  { %v688_v59 = vadd.f32 %v687_v57, %v524_v56  ;;  %v362_v60 = vpop.f32.mrf.mxu0  ;;  %v166_v56 = vld [vmem:[#allocation2 + $0x328] sm:$0xff] }
  0xd3   :  { %v363_v2 = vadd.f32 %v4468_v0, %v362_v60 }
  0xd4   :  { %v4483_v1 = vadd.f32 %v851_v58, %v688_v59 }
  0xd5   :  { %v526_v3 = vpop.f32.mrf.mxu1  ;;  %409 = vmatmul.f32.gmra.mxu0 %v149_v61 }
  0xd6   :  { %737 = vmatmul.f32.gmra.mxu2 %v151_v62  ;;  %901 = vmatmul.f32.gmra.mxu3 %v152_v63  ;;  %v527_v5 = vadd.f32 %v526_v3, %v363_v2  ;;  %v169_v62 = vld [vmem:[#allocation2 + $0x340] sm:$0xff]  ;;  %v171_v63 = vld [vmem:[#allocation2 + $0x350] sm:$0xff]  ;;  %v172_v2 = vld [vmem:[#allocation2 + $0x358] sm:$0xff] }
  0xd8   :  { %573 = vmatmul.f32.gmra.mxu1 %v150_v4 }
  0xd9   :  { %v690_v6 = vpop.f32.mrf.mxu2  ;;  %v854_v7 = vpop.f32.mrf.mxu3 }
  0xda   :  { %v691_v8 = vadd.f32 %v690_v6, %v527_v5  ;;  %v365_v9 = vpop.f32.mrf.mxu0  ;;  %v170_v6 = vld [vmem:[#allocation2 + $0x348] sm:$0xff] }
  0xdb   :  { %v366_v14 = vadd.f32 %v4468_v0, %v365_v9 }
  0xdc   :  { %v4486_v13 = vadd.f32 %v854_v7, %v691_v8 }
  0xdd   :  { %v529_v15 = vpop.f32.mrf.mxu1  ;;  %412 = vmatmul.f32.gmra.mxu0 %v153_v10 }
  0xde   :  { %740 = vmatmul.f32.gmra.mxu2 %v155_v11  ;;  %904 = vmatmul.f32.gmra.mxu3 %v156_v12  ;;  %v530_v18 = vadd.f32 %v529_v15, %v366_v14  ;;  %v173_v12 = vld [vmem:[#allocation2 + $0x360] sm:$0xff]  ;;  %v175_v14 = vld [vmem:[#allocation2 + $0x370] sm:$0xff]  ;;  %v176_v15 = vld [vmem:[#allocation2 + $0x378] sm:$0xff] }
  0xe0   :  { %576 = vmatmul.f32.gmra.mxu1 %v154_v17 }
  0xe1   :  { %v693_v19 = vpop.f32.mrf.mxu2  ;;  %v857_v20 = vpop.f32.mrf.mxu3 }
  0xe2   :  { %v694_v21 = vadd.f32 %v693_v19, %v530_v18  ;;  %v368_v22 = vpop.f32.mrf.mxu0 }
  0xe3   :  { %v369_v27 = vadd.f32 %v4468_v0, %v368_v22 }
  0xe4   :  { %v4489_v26 = vadd.f32 %v857_v20, %v694_v21  ;;  %v174_v20 = vld [vmem:[#allocation2 + $0x368] sm:$0xff] }
  0xe5   :  { %v532_v29 = vpop.f32.mrf.mxu1  ;;  %415 = vmatmul.f32.gmra.mxu0 %v157_v23 }
  0xe6   :  { %743 = vmatmul.f32.gmra.mxu2 %v159_v24  ;;  %907 = vmatmul.f32.gmra.mxu3 %v160_v25  ;;  %v533_v31 = vadd.f32 %v532_v29, %v369_v27  ;;  %v177_v27 = vld [vmem:[#allocation2 + $0x380] sm:$0xff]  ;;  %v179_v29 = vld [vmem:[#allocation2 + $0x390] sm:$0xff] }
  0xe8   :  { %579 = vmatmul.f32.gmra.mxu1 %v158_v30  ;;  %v180_v30 = vld [vmem:[#allocation2 + $0x398] sm:$0xff] }
  0xe9   :  { %v696_v32 = vpop.f32.mrf.mxu2  ;;  %v860_v33 = vpop.f32.mrf.mxu3 }
  0xea   :  { %v697_v34 = vadd.f32 %v696_v32, %v533_v31  ;;  %v371_v35 = vpop.f32.mrf.mxu0 }
  0xeb   :  { %v372_v41 = vadd.f32 %v4468_v0, %v371_v35 }
  0xec   :  { %v4492_v39 = vadd.f32 %v860_v33, %v697_v34  ;;  %v178_v34 = vld [vmem:[#allocation2 + $0x388] sm:$0xff] }
  0xed   :  { %v535_v42 = vpop.f32.mrf.mxu1  ;;  %418 = vmatmul.f32.gmra.mxu0 %v161_v36 }
  0xee   :  { %746 = vmatmul.f32.gmra.mxu2 %v163_v37  ;;  %910 = vmatmul.f32.gmra.mxu3 %v164_v38  ;;  %v536_v44 = vadd.f32 %v535_v42, %v372_v41  ;;  %v181_v42 = vld [vmem:[#allocation2 + $0x3a0] sm:$0xff] }
  0xf0   :  { %582 = vmatmul.f32.gmra.mxu1 %v162_v43  ;;  %v183_v43 = vld [vmem:[#allocation2 + $0x3b0] sm:$0xff] }
  0xf1   :  { %v699_v45 = vpop.f32.mrf.mxu2  ;;  %v863_v46 = vpop.f32.mrf.mxu3 }
  0xf2   :  { %v700_v47 = vadd.f32 %v699_v45, %v536_v44  ;;  %v374_v48 = vpop.f32.mrf.mxu0  ;;  %v184_v44 = vld [vmem:[#allocation2 + $0x3b8] sm:$0xff] }
  0xf3   :  { %v375_v54 = vadd.f32 %v4468_v0, %v374_v48  ;;  %v182_v48 = vld [vmem:[#allocation2 + $0x3a8] sm:$0xff] }
  0xf4   :  { %v4495_v53 = vadd.f32 %v863_v46, %v700_v47 }
  0xf5   :  { %v538_v55 = vpop.f32.mrf.mxu1  ;;  %421 = vmatmul.f32.gmra.mxu0 %v165_v49 }
  0xf6   :  { %749 = vmatmul.f32.gmra.mxu2 %v167_v50  ;;  %913 = vmatmul.f32.gmra.mxu3 %v168_v51  ;;  %v539_v57 = vadd.f32 %v538_v55, %v375_v54 }
  0xf8   :  { %585 = vmatmul.f32.gmra.mxu1 %v166_v56  ;;  %v185_v56 = vld [vmem:[#allocation2 + $0x3c0] sm:$0xff] }
  0xf9   :  { %v702_v58 = vpop.f32.mrf.mxu2  ;;  %v866_v59 = vpop.f32.mrf.mxu3 }
  0xfa   :  { %v703_v60 = vadd.f32 %v702_v58, %v539_v57  ;;  %v377_v61 = vpop.f32.mrf.mxu0  ;;  %v187_v57 = vld [vmem:[#allocation2 + $0x3d0] sm:$0xff]  ;;  %v188_v58 = vld [vmem:[#allocation2 + $0x3d8] sm:$0xff] }
  0xfb   :  { %v378_v4 = vadd.f32 %v4468_v0, %v377_v61 }
  0xfc   :  { %v4498_v3 = vadd.f32 %v866_v59, %v703_v60 }
  0xfd   :  { %v541_v5 = vpop.f32.mrf.mxu1  ;;  %424 = vmatmul.f32.gmra.mxu0 %v169_v62  ;;  %v186_v62 = vld [vmem:[#allocation2 + $0x3c8] sm:$0xff] }
  0xfe   :  { %752 = vmatmul.f32.gmra.mxu2 %v171_v63  ;;  %916 = vmatmul.f32.gmra.mxu3 %v172_v2  ;;  %v542_v7 = vadd.f32 %v541_v5, %v378_v4 }
 0x100   :  { %588 = vmatmul.f32.gmra.mxu1 %v170_v6 }
 0x101   :  { %v705_v8 = vpop.f32.mrf.mxu2  ;;  %v869_v9 = vpop.f32.mrf.mxu3 }
 0x102   :  { %v706_v10 = vadd.f32 %v705_v8, %v542_v7  ;;  %v380_v11 = vpop.f32.mrf.mxu0  ;;  %v189_v7 = vld [vmem:[#allocation2 + $0x3e0] sm:$0xff]  ;;  %v191_v8 = vld [vmem:[#allocation2 + $0x3f0] sm:$0xff] }
 0x103   :  { %v381_v18 = vadd.f32 %v4468_v0, %v380_v11 }
 0x104   :  { %v4501_v17 = vadd.f32 %v869_v9, %v706_v10  ;;  %v192_v9 = vld [vmem:[#allocation2 + $0x3f8] sm:$0xff] }
 0x105   :  { %v544_v19 = vpop.f32.mrf.mxu1  ;;  %427 = vmatmul.f32.gmra.mxu0 %v173_v12 }
 0x106   :  { %755 = vmatmul.f32.gmra.mxu2 %v175_v14  ;;  %919 = vmatmul.f32.gmra.mxu3 %v176_v15  ;;  %v545_v21 = vadd.f32 %v544_v19, %v381_v18  ;;  %v190_v14 = vld [vmem:[#allocation2 + $0x3e8] sm:$0xff] }
 0x108   :  { %591 = vmatmul.f32.gmra.mxu1 %v174_v20 }
 0x109   :  { %v708_v22 = vpop.f32.mrf.mxu2  ;;  %v872_v23 = vpop.f32.mrf.mxu3 }
 0x10a   :  { %v709_v24 = vadd.f32 %v708_v22, %v545_v21  ;;  %v383_v25 = vpop.f32.mrf.mxu0  ;;  %v193_v22 = vld [vmem:[#allocation2 + $0x400] sm:$0xff] }
 0x10b   :  { %v384_v32 = vadd.f32 %v4468_v0, %v383_v25 }
 0x10c   :  { %v4504_v31 = vadd.f32 %v872_v23, %v709_v24  ;;  %v195_v23 = vld [vmem:[#allocation2 + $0x410] sm:$0xff]  ;;  %v196_v24 = vld [vmem:[#allocation2 + $0x418] sm:$0xff] }
 0x10d   :  { %v547_v33 = vpop.f32.mrf.mxu1  ;;  %430 = vmatmul.f32.gmra.mxu0 %v177_v27 }
 0x10e   :  { %758 = vmatmul.f32.gmra.mxu2 %v179_v29  ;;  %922 = vmatmul.f32.gmra.mxu3 %v180_v30  ;;  %v548_v35 = vadd.f32 %v547_v33, %v384_v32  ;;  %v194_v30 = vld [vmem:[#allocation2 + $0x408] sm:$0xff] }
 0x110   :  { %594 = vmatmul.f32.gmra.mxu1 %v178_v34 }
 0x111   :  { %v711_v36 = vpop.f32.mrf.mxu2  ;;  %v875_v37 = vpop.f32.mrf.mxu3 }
 0x112   :  { %v712_v38 = vadd.f32 %v711_v36, %v548_v35  ;;  %v386_v41 = vpop.f32.mrf.mxu0 }
 0x113   :  { %v387_v46 = vadd.f32 %v4468_v0, %v386_v41  ;;  %v200_v41 = vld [vmem:[#allocation2 + $0x438] sm:$0xff] }
 0x114   :  { %v4507_v45 = vadd.f32 %v875_v37, %v712_v38  ;;  %v197_v37 = vld [vmem:[#allocation2 + $0x420] sm:$0xff]  ;;  %v199_v38 = vld [vmem:[#allocation2 + $0x430] sm:$0xff] }
 0x115   :  { %v550_v47 = vpop.f32.mrf.mxu1  ;;  %433 = vmatmul.f32.gmra.mxu0 %v181_v42 }
 0x116   :  { %761 = vmatmul.f32.gmra.mxu2 %v183_v43  ;;  %925 = vmatmul.f32.gmra.mxu3 %v184_v44  ;;  %v551_v49 = vadd.f32 %v550_v47, %v387_v46  ;;  %v198_v46 = vld [vmem:[#allocation2 + $0x428] sm:$0xff] }
 0x118   :  { %597 = vmatmul.f32.gmra.mxu1 %v182_v48 }
 0x119   :  { %v714_v50 = vpop.f32.mrf.mxu2  ;;  %v878_v51 = vpop.f32.mrf.mxu3 }
 0x11a   :  { %v715_v54 = vadd.f32 %v714_v50, %v551_v49  ;;  %v389_v55 = vpop.f32.mrf.mxu0 }
 0x11b   :  { %v390_v60 = vadd.f32 %v4468_v0, %v389_v55  ;;  %v203_v55 = vld [vmem:[#allocation2 + $0x450] sm:$0xff] }
 0x11c   :  { %v4510_v59 = vadd.f32 %v878_v51, %v715_v54  ;;  %v201_v54 = vld [vmem:[#allocation2 + $0x440] sm:$0xff] }
 0x11d   :  { %v553_v61 = vpop.f32.mrf.mxu1  ;;  %436 = vmatmul.f32.gmra.mxu0 %v185_v56  ;;  %v204_v56 = vld [vmem:[#allocation2 + $0x458] sm:$0xff] }
 0x11e   :  { %764 = vmatmul.f32.gmra.mxu2 %v187_v57  ;;  %928 = vmatmul.f32.gmra.mxu3 %v188_v58  ;;  %v554_v63 = vadd.f32 %v553_v61, %v390_v60  ;;  %v202_v61 = vld [vmem:[#allocation2 + $0x448] sm:$0xff] }
 0x120   :  { %600 = vmatmul.f32.gmra.mxu1 %v186_v62 }
 0x121   :  { %v717_v2 = vpop.f32.mrf.mxu2  ;;  %v881_v4 = vpop.f32.mrf.mxu3 }
 0x122   :  { %v718_v5 = vadd.f32 %v717_v2, %v554_v63  ;;  %v392_v6 = vpop.f32.mrf.mxu0 }
 0x123   :  { %v393_v11 = vadd.f32 %v4468_v0, %v392_v6  ;;  %v205_v6 = vld [vmem:[#allocation2 + $0x460] sm:$0xff] }
 0x124   :  { %v4513_v10 = vadd.f32 %v881_v4, %v718_v5 }
 0x125   :  { %v556_v12 = vpop.f32.mrf.mxu1  ;;  %439 = vmatmul.f32.gmra.mxu0 %v189_v7  ;;  %v207_v7 = vld [vmem:[#allocation2 + $0x470] sm:$0xff] }
 0x126   :  { %767 = vmatmul.f32.gmra.mxu2 %v191_v8  ;;  %931 = vmatmul.f32.gmra.mxu3 %v192_v9  ;;  %v557_v15 = vadd.f32 %v556_v12, %v393_v11  ;;  %v208_v8 = vld [vmem:[#allocation2 + $0x478] sm:$0xff] }
 0x128   :  { %603 = vmatmul.f32.gmra.mxu1 %v190_v14  ;;  %v206_v14 = vld [vmem:[#allocation2 + $0x468] sm:$0xff] }
 0x129   :  { %v720_v18 = vpop.f32.mrf.mxu2  ;;  %v884_v19 = vpop.f32.mrf.mxu3 }
 0x12a   :  { %v721_v20 = vadd.f32 %v720_v18, %v557_v15  ;;  %v395_v21 = vpop.f32.mrf.mxu0 }
 0x12b   :  { %v396_v27 = vadd.f32 %v4468_v0, %v395_v21 }
 0x12c   :  { %v4516_v25 = vadd.f32 %v884_v19, %v721_v20 }
 0x12d   :  { %v559_v29 = vpop.f32.mrf.mxu1  ;;  %442 = vmatmul.f32.gmra.mxu0 %v193_v22  ;;  %v209_v22 = vld [vmem:[#allocation2 + $0x480] sm:$0xff] }
 0x12e   :  { %770 = vmatmul.f32.gmra.mxu2 %v195_v23  ;;  %934 = vmatmul.f32.gmra.mxu3 %v196_v24  ;;  %v560_v32 = vadd.f32 %v559_v29, %v396_v27  ;;  %v211_v23 = vld [vmem:[#allocation2 + $0x490] sm:$0xff]  ;;  %v212_v24 = vld [vmem:[#allocation2 + $0x498] sm:$0xff] }
 0x130   :  { %606 = vmatmul.f32.gmra.mxu1 %v194_v30 }
 0x131   :  { %v723_v33 = vpop.f32.mrf.mxu2  ;;  %v887_v34 = vpop.f32.mrf.mxu3 }
 0x132   :  { %v724_v35 = vadd.f32 %v723_v33, %v560_v32  ;;  %v398_v36 = vpop.f32.mrf.mxu0  ;;  %v210_v32 = vld [vmem:[#allocation2 + $0x488] sm:$0xff] }
 0x133   :  { %v399_v43 = vadd.f32 %v4468_v0, %v398_v36 }
 0x134   :  { %v4519_v42 = vadd.f32 %v887_v34, %v724_v35 }
 0x135   :  { %v562_v44 = vpop.f32.mrf.mxu1  ;;  %445 = vmatmul.f32.gmra.mxu0 %v197_v37 }
 0x136   :  { %773 = vmatmul.f32.gmra.mxu2 %v199_v38  ;;  %937 = vmatmul.f32.gmra.mxu3 %v200_v41  ;;  %v563_v47 = vadd.f32 %v562_v44, %v399_v43  ;;  %v213_v38 = vld [vmem:[#allocation2 + $0x4a0] sm:$0xff]  ;;  %v215_v41 = vld [vmem:[#allocation2 + $0x4b0] sm:$0xff]  ;;  %v216_v43 = vld [vmem:[#allocation2 + $0x4b8] sm:$0xff] }
 0x138   :  { %609 = vmatmul.f32.gmra.mxu1 %v198_v46 }
 0x139   :  { %v726_v48 = vpop.f32.mrf.mxu2  ;;  %v890_v49 = vpop.f32.mrf.mxu3 }
 0x13a   :  { %v727_v50 = vadd.f32 %v726_v48, %v563_v47  ;;  %v401_v51 = vpop.f32.mrf.mxu0  ;;  %v214_v48 = vld [vmem:[#allocation2 + $0x4a8] sm:$0xff] }
 0x13b   :  { %v402_v58 = vadd.f32 %v4468_v0, %v401_v51 }
 0x13c   :  { %v4522_v57 = vadd.f32 %v890_v49, %v727_v50 }
 0x13d   :  { %v565_v60 = vpop.f32.mrf.mxu1  ;;  %448 = vmatmul.f32.gmra.mxu0 %v201_v54 }
 0x13e   :  { %776 = vmatmul.f32.gmra.mxu2 %v203_v55  ;;  %940 = vmatmul.f32.gmra.mxu3 %v204_v56  ;;  %v566_v62 = vadd.f32 %v565_v60, %v402_v58  ;;  %v217_v56 = vld [vmem:[#allocation2 + $0x4c0] sm:$0xff]  ;;  %v219_v58 = vld [vmem:[#allocation2 + $0x4d0] sm:$0xff]  ;;  %v220_v60 = vld [vmem:[#allocation2 + $0x4d8] sm:$0xff] }
 0x140   :  { %612 = vmatmul.f32.gmra.mxu1 %v202_v61 }
 0x141   :  { %v729_v63 = vpop.f32.mrf.mxu2  ;;  %v893_v2 = vpop.f32.mrf.mxu3 }
 0x142   :  { %v730_v4 = vadd.f32 %v729_v63, %v566_v62  ;;  %v404_v5 = vpop.f32.mrf.mxu0 }
 0x143   :  { %v405_v11 = vadd.f32 %v4468_v0, %v404_v5 }
 0x144   :  { %v4525_v9 = vadd.f32 %v893_v2, %v730_v4  ;;  %v218_v2 = vld [vmem:[#allocation2 + $0x4c8] sm:$0xff] }
 0x145   :  { %v568_v12 = vpop.f32.mrf.mxu1  ;;  %451 = vmatmul.f32.gmra.mxu0 %v205_v6 }
 0x146   :  { %779 = vmatmul.f32.gmra.mxu2 %v207_v7  ;;  %943 = vmatmul.f32.gmra.mxu3 %v208_v8  ;;  %v569_v15 = vadd.f32 %v568_v12, %v405_v11  ;;  %v221_v11 = vld [vmem:[#allocation2 + $0x4e0] sm:$0xff]  ;;  %v223_v12 = vld [vmem:[#allocation2 + $0x4f0] sm:$0xff] }
 0x148   :  { %615 = vmatmul.f32.gmra.mxu1 %v206_v14  ;;  %v224_v14 = vld [vmem:[#allocation2 + $0x4f8] sm:$0xff] }
 0x149   :  { %v732_v18 = vpop.f32.mrf.mxu2  ;;  %v896_v19 = vpop.f32.mrf.mxu3 }
 0x14a   :  { %v733_v20 = vadd.f32 %v732_v18, %v569_v15  ;;  %v407_v21 = vpop.f32.mrf.mxu0 }
 0x14b   :  { %v408_v29 = vadd.f32 %v4468_v0, %v407_v21 }
 0x14c   :  { %v4528_v27 = vadd.f32 %v896_v19, %v733_v20  ;;  %v222_v20 = vld [vmem:[#allocation2 + $0x4e8] sm:$0xff] }
 0x14d   :  { %v571_v30 = vpop.f32.mrf.mxu1  ;;  %454 = vmatmul.f32.gmra.mxu0 %v209_v22 }
 0x14e   :  { %782 = vmatmul.f32.gmra.mxu2 %v211_v23  ;;  %946 = vmatmul.f32.gmra.mxu3 %v212_v24  ;;  %v572_v33 = vadd.f32 %v571_v30, %v408_v29  ;;  %v225_v30 = vld [vmem:[#allocation2 + $0x500] sm:$0xff] }
 0x150   :  { %618 = vmatmul.f32.gmra.mxu1 %v210_v32  ;;  %v227_v32 = vld [vmem:[#allocation2 + $0x510] sm:$0xff] }
 0x151   :  { %v735_v34 = vpop.f32.mrf.mxu2  ;;  %v899_v35 = vpop.f32.mrf.mxu3 }
 0x152   :  { %v736_v36 = vadd.f32 %v735_v34, %v572_v33  ;;  %v410_v37 = vpop.f32.mrf.mxu0  ;;  %v228_v33 = vld [vmem:[#allocation2 + $0x518] sm:$0xff] }
 0x153   :  { %v411_v46 = vadd.f32 %v4468_v0, %v410_v37  ;;  %v226_v37 = vld [vmem:[#allocation2 + $0x508] sm:$0xff] }
 0x154   :  { %v4531_v44 = vadd.f32 %v899_v35, %v736_v36 }
 0x155   :  { %v574_v47 = vpop.f32.mrf.mxu1  ;;  %457 = vmatmul.f32.gmra.mxu0 %v213_v38 }
 0x156   :  { %785 = vmatmul.f32.gmra.mxu2 %v215_v41  ;;  %949 = vmatmul.f32.gmra.mxu3 %v216_v43  ;;  %v575_v49 = vadd.f32 %v574_v47, %v411_v46 }
 0x158   :  { %621 = vmatmul.f32.gmra.mxu1 %v214_v48  ;;  %v229_v48 = vld [vmem:[#allocation2 + $0x520] sm:$0xff] }
 0x159   :  { %v738_v50 = vpop.f32.mrf.mxu2  ;;  %v902_v51 = vpop.f32.mrf.mxu3 }
 0x15a   :  { %v739_v54 = vadd.f32 %v738_v50, %v575_v49  ;;  %v413_v55 = vpop.f32.mrf.mxu0  ;;  %v231_v49 = vld [vmem:[#allocation2 + $0x530] sm:$0xff]  ;;  %v232_v50 = vld [vmem:[#allocation2 + $0x538] sm:$0xff] }
 0x15b   :  { %v414_v62 = vadd.f32 %v4468_v0, %v413_v55  ;;  %v1050_v55 = vld [vmem:[%s6796_s4 + $0x78] sm:$0xff] }
 0x15c   :  { %v4534_v61 = vadd.f32 %v902_v51, %v739_v54  ;;  %1055 = vmatpush.msrb.mxu0 %v1050_v55 }
 0x15d   :  { %v577_v63 = vpop.f32.mrf.mxu1  ;;  %460 = vmatmul.f32.gmra.mxu0 %v217_v56  ;;  %v1091_v56 = vld [vmem:[%s6798_s6 + $0x78] sm:$0xff] }
 0x15e   :  { %788 = vmatmul.f32.gmra.mxu2 %v219_v58  ;;  %952 = vmatmul.f32.gmra.mxu3 %v220_v60  ;;  %v578_v4 = vadd.f32 %v577_v63, %v414_v62  ;;  %v1049_v58 = vld [vmem:[%s6796_s4 + $0x70] sm:$0xff] }
 0x15f   :  { %2552 = vmatpush.msrb.mxu3 %v1091_v56  ;;  %v1090_v60 = vld [vmem:[%s6798_s6 + $0x70] sm:$0xff]  ;;  %1056 = vmatpush.msrb.mxu0 %v1049_v58  ;;  %v241_v56 = vld [vmem:[#allocation2 + $0x580] sm:$0xff]  ;;  %v1081_v58 = vld [vmem:[%s6798_s6 + $0x28] sm:$0xff] }
 0x160   :  { %624 = vmatmul.f32.gmra.mxu1 %v218_v2 }
 0x161   :  { %v741_v5 = vpop.f32.mrf.mxu2  ;;  %v905_v6 = vpop.f32.mrf.mxu3  ;;  %2553 = vmatpush.msrb.mxu3 %v1090_v60  ;;  %v243_v60 = vld [vmem:[#allocation2 + $0x590] sm:$0xff] }
 0x162   :  { %v742_v7 = vadd.f32 %v741_v5, %v578_v4  ;;  %v416_v8 = vpop.f32.mrf.mxu0  ;;  %v233_v4 = vld [vmem:[#allocation2 + $0x540] sm:$0xff]  ;;  %v1048_v5 = vld [vmem:[%s6796_s4 + $0x68] sm:$0xff] }
 0x163   :  { %v417_v18 = vadd.f32 %v4468_v0, %v416_v8  ;;  %v236_v8 = vld [vmem:[#allocation2 + $0x558] sm:$0xff]  ;;  %1057 = vmatpush.msrb.mxu0 %v1048_v5  ;;  %v1041_v5 = vld [vmem:[%s6796_s4 + $0x30] sm:$0xff] }
 0x164   :  { %v4537_v15 = vadd.f32 %v905_v6, %v742_v7  ;;  %v1089_v6 = vld [vmem:[%s6798_s6 + $0x68] sm:$0xff]  ;;  %v235_v7 = vld [vmem:[#allocation2 + $0x550] sm:$0xff] }
 0x165   :  { %v580_v19 = vpop.f32.mrf.mxu1  ;;  %463 = vmatmul.f32.gmra.mxu0 %v221_v11  ;;  %2554 = vmatpush.msrb.mxu3 %v1089_v6  ;;  %v1047_v11 = vld [vmem:[%s6796_s4 + $0x60] sm:$0xff] }
 0x166   :  { %791 = vmatmul.f32.gmra.mxu2 %v223_v12  ;;  %955 = vmatmul.f32.gmra.mxu3 %v224_v14  ;;  %v581_v21 = vadd.f32 %v580_v19, %v417_v18  ;;  %v1088_v12 = vld [vmem:[%s6798_s6 + $0x60] sm:$0xff]  ;;  %v234_v18 = vld [vmem:[#allocation2 + $0x548] sm:$0xff]  ;;  %v1046_v19 = vld [vmem:[%s6796_s4 + $0x58] sm:$0xff] }
 0x167   :  { %2555 = vmatpush.msrb.mxu3 %v1088_v12  ;;  %1058 = vmatpush.msrb.mxu0 %v1047_v11  ;;  %v1080_v6 = vld [vmem:[%s6798_s6 + $0x20] sm:$0xff]  ;;  %v1040_v11 = vld [vmem:[%s6796_s4 + $0x28] sm:$0xff]  ;;  %v1079_v12 = vld [vmem:[%s6798_s6 + $0x18] sm:$0xff] }
 0x168   :  { %627 = vmatmul.f32.gmra.mxu1 %v222_v20  ;;  %v1087_v20 = vld [vmem:[%s6798_s6 + $0x58] sm:$0xff] }
 0x169   :  { %v744_v22 = vpop.f32.mrf.mxu2  ;;  %v908_v23 = vpop.f32.mrf.mxu3  ;;  %2556 = vmatpush.msrb.mxu3 %v1087_v20  ;;  %1059 = vmatpush.msrb.mxu0 %v1046_v19  ;;  %v1078_v19 = vld [vmem:[%s6798_s6 + $0x10] sm:$0xff] }
 0x16a   :  { %v745_v24 = vadd.f32 %v744_v22, %v581_v21  ;;  %v419_v29 = vpop.f32.mrf.mxu0  ;;  %v1045_v21 = vld [vmem:[%s6796_s4 + $0x50] sm:$0xff] }
 0x16b   :  { %v420_v35 = vadd.f32 %v4468_v0, %v419_v29  ;;  %v230_v0 = vld [vmem:[#allocation2 + $0x528] sm:$0xff]  ;;  %v1086_v22 = vld [vmem:[%s6798_s6 + $0x50] sm:$0xff]  ;;  %1060 = vmatpush.msrb.mxu0 %v1045_v21 }
 0x16c   :  { %v4540_v34 = vadd.f32 %v908_v23, %v745_v24  ;;  %2557 = vmatpush.msrb.mxu3 %v1086_v22 }
 0x16d   :  { %v583_v36 = vpop.f32.mrf.mxu1  ;;  %466 = vmatmul.f32.gmra.mxu0 %v225_v30  ;;  %v237_v30 = vld [vmem:[#allocation2 + $0x560] sm:$0xff] }
 0x16e   :  { %794 = vmatmul.f32.gmra.mxu2 %v227_v32  ;;  %958 = vmatmul.f32.gmra.mxu3 %v228_v33  ;;  %v584_v38 = vadd.f32 %v583_v36, %v420_v35  ;;  %v1085_v32 = vld [vmem:[%s6798_s6 + $0x48] sm:$0xff]  ;;  %v239_v33 = vld [vmem:[#allocation2 + $0x570] sm:$0xff]  ;;  %v240_v35 = vld [vmem:[#allocation2 + $0x578] sm:$0xff] }
 0x16f   :  { %2558 = vmatpush.msrb.mxu3 %v1085_v32  ;;  %v1044_v36 = vld [vmem:[%s6796_s4 + $0x48] sm:$0xff] }
 0x170   :  { %630 = vmatmul.f32.gmra.mxu1 %v226_v37  ;;  %v1084_v37 = vld [vmem:[%s6798_s6 + $0x40] sm:$0xff]  ;;  %1061 = vmatpush.msrb.mxu0 %v1044_v36  ;;  %v1077_v32 = vld [vmem:[%s6798_s6 + $0x8] sm:$0xff]  ;;  %v1038_v36 = vld [vmem:[%s6796_s4 + $0x18] sm:$0xff] }
 0x171   :  { %v747_v41 = vpop.f32.mrf.mxu2  ;;  %v911_v43 = vpop.f32.mrf.mxu3  ;;  %2559 = vmatpush.msrb.mxu3 %v1084_v37  ;;  %v1076_v37 = vld [vmem:[%s6798_s6] sm:$0xff] }
 0x172   :  { %v748_v46 = vadd.f32 %v747_v41, %v584_v38  ;;  %v4543_v47 = vpop.f32.mrf.mxu0  ;;  %v238_v41 = vld [vmem:[#allocation2 + $0x568] sm:$0xff] }
 0x174   :  { %v4545_v51 = vadd.f32 %v911_v43, %v748_v46  ;;  %v1043_v43 = vld [vmem:[%s6796_s4 + $0x40] sm:$0xff]  ;;  %v1083_v46 = vld [vmem:[%s6798_s6 + $0x38] sm:$0xff] }
 0x175   :  { %v4547_v54 = vpop.f32.mrf.mxu1  ;;  %469 = vmatmul.f32.gmra.mxu0 %v229_v48  ;;  %2560 = vmatpush.msrb.mxu3 %v1083_v46  ;;  %v1042_v48 = vld [vmem:[%s6796_s4 + $0x38] sm:$0xff]  ;;  %v1037_v46 = vld [vmem:[%s6796_s4 + $0x10] sm:$0xff] }
 0x176   :  { %797 = vmatmul.f32.gmra.mxu2 %v231_v49  ;;  %961 = vmatmul.f32.gmra.mxu3 %v232_v50  ;;  %v1082_v49 = vld [vmem:[%s6798_s6 + $0x30] sm:$0xff] }
 0x177   :  { %1062 = vmatpush.msrb.mxu0 %v1043_v43  ;;  %2561 = vmatpush.msrb.mxu3 %v1082_v49  ;;  %v246_v43 = vld [vmem:[#allocation2 + $0x5a8] sm:$0xff] }
 0x178   :  { %633 = vmatmul.f32.gmra.mxu1 %v230_v0 }
 0x179   :  { %v4561_v62 = vpop.f32.mrf.mxu2  ;;  %v4563_v63 = vpop.f32.mrf.mxu3  ;;  %1063 = vmatpush.msrb.mxu0 %v1042_v48  ;;  %2562 = vmatpush.msrb.mxu3 %v1081_v58  ;;  %v1036_v48 = vld [vmem:[%s6796_s4 + $0x8] sm:$0xff] }
 0x17a   :  { %v4565_v2 = vpop.f32.mrf.mxu0 }
 0x17b   :  { %2563 = vmatpush.msrb.mxu3 %v1080_v6  ;;  %1064 = vmatpush.msrb.mxu0 %v1041_v5  ;;  %v252_v5 = vld [vmem:[#allocation2 + $0x5d8] sm:$0xff]  ;;  %v1035_v6 = vld [vmem:[%s6796_s4] sm:$0xff] }
 0x17d   :  { %v4579_v14 = vpop.f32.mrf.mxu1  ;;  %472 = vmatmul.f32.gmra.mxu0 %v233_v4  ;;  %v244_v4 = vld [vmem:[#allocation2 + $0x598] sm:$0xff]  ;;  %2564 = vmatpush.msrb.mxu3 %v1079_v12 }
 0x17e   :  { %800 = vmatmul.f32.gmra.mxu2 %v235_v7  ;;  %964 = vmatmul.f32.gmra.mxu3 %v236_v8  ;;  %v242_v8 = vld [vmem:[#allocation2 + $0x588] sm:$0xff] }
 0x17f   :  { %1065 = vmatpush.msrb.mxu0 %v1040_v11  ;;  %2565 = vmatpush.msrb.mxu3 %v1078_v19  ;;  %v250_v11 = vld [vmem:[#allocation2 + $0x5c8] sm:$0xff] }
 0x180   :  { %636 = vmatmul.f32.gmra.mxu1 %v234_v18  ;;  %v1039_v18 = vld [vmem:[%s6796_s4 + $0x20] sm:$0xff] }
 0x181   :  { %v4593_v23 = vpop.f32.mrf.mxu2  ;;  %v4595_v24 = vpop.f32.mrf.mxu3  ;;  %1066 = vmatpush.msrb.mxu0 %v1039_v18  ;;  %2566 = vmatpush.msrb.mxu3 %v1077_v32  ;;  %v255_v32 = vld [vmem:[#allocation2 + $0x5f0] sm:$0xff] }
 0x182   :  { %v4597_v29 = vpop.f32.mrf.mxu0 }
 0x183   :  { %2567 = vmatpush.msrb.mxu3 %v1076_v37  ;;  %1067 = vmatpush.msrb.mxu0 %v1038_v36  ;;  %v254_v36 = vld [vmem:[#allocation2 + $0x5e8] sm:$0xff] }
 0x185   :  { %v4608_v38 = vpop.f32.mrf.mxu1  ;;  %475 = vmatmul.f32.gmra.mxu0 %v237_v30  ;;  %v245_v30 = vld [vmem:[#allocation2 + $0x5a0] sm:$0xff] }
 0x186   :  { %803 = vmatmul.f32.gmra.mxu2 %v239_v33  ;;  %967 = vmatmul.f32.gmra.mxu3 %v240_v35  ;;  %v247_v33 = vld [vmem:[#allocation2 + $0x5b0] sm:$0xff]  ;;  %v248_v35 = vld [vmem:[#allocation2 + $0x5b8] sm:$0xff] }
 0x187   :  { %1068 = vmatpush.msrb.mxu0 %v1037_v46 }
 0x188   :  { %639 = vmatmul.f32.gmra.mxu1 %v238_v41 }
 0x189   :  { %v4622_v50 = vpop.f32.mrf.mxu2  ;;  %v4624_v0 = vpop.f32.mrf.mxu3  ;;  %1069 = vmatpush.msrb.mxu0 %v1036_v48  ;;  %v257_v48 = vld [vmem:[#allocation2 + $0x600] sm:$0xff] }
 0x18a   :  { %v4626_v55 = vpop.f32.mrf.mxu0 }
 0x18b   :  { %1070 = vmatpush.msrb.mxu0 %v1035_v6  ;;  %v258_v6 = vld [vmem:[#allocation2 + $0x608] sm:$0xff] }
 0x18d   :  { %v4637_v7 = vpop.f32.mrf.mxu1  ;;  %478 = vmatmul.f32.gmra.mxu0 %v241_v56 }
 0x18e   :  { %806 = vmatmul.f32.gmra.mxu2 %v243_v60  ;;  %970 = vmatmul.f32.gmra.mxu3 %v244_v4  ;;  %v249_v60 = vld [vmem:[#allocation2 + $0x5c0] sm:$0xff]  ;;  %v251_v4 = vld [vmem:[#allocation2 + $0x5d0] sm:$0xff] }
 0x190   :  { %642 = vmatmul.f32.gmra.mxu1 %v242_v8 }
 0x191   :  { %v4651_v20 = vpop.f32.mrf.mxu2  ;;  %v4653_v21 = vpop.f32.mrf.mxu3 }
 0x192   :  { %v4655_v22 = vpop.f32.mrf.mxu0 }
 0x195   :  { %v4666_v41 = vpop.f32.mrf.mxu1  ;;  %481 = vmatmul.f32.gmra.mxu0 %v245_v30  ;;  %v253_v30 = vld [vmem:[#allocation2 + $0x5e0] sm:$0xff] }
 0x196   :  { %809 = vmatmul.f32.gmra.mxu2 %v247_v33  ;;  %973 = vmatmul.f32.gmra.mxu3 %v248_v35  ;;  %v256_v33 = vld [vmem:[#allocation2 + $0x5f8] sm:$0xff] }
 0x198   :  { %645 = vmatmul.f32.gmra.mxu1 %v246_v43 }
 0x199   :  { %v4674_v49 = vpop.f32.mrf.mxu2  ;;  %v4676_v56 = vpop.f32.mrf.mxu3 }
 0x19a   :  { %v4678_v58 = vpop.f32.mrf.mxu0 }
 0x19d   :  { %v4683_v8 = vpop.f32.mrf.mxu1  ;;  %484 = vmatmul.f32.gmra.mxu0 %v249_v60  ;;  %v259_v60 = vld [vmem:[#allocation2 + $0x610] sm:$0xff] }
 0x19e   :  { %812 = vmatmul.f32.gmra.mxu2 %v251_v4  ;;  %976 = vmatmul.f32.gmra.mxu3 %v252_v5  ;;  %v260_v4 = vld [vmem:[#allocation2 + $0x618] sm:$0xff] }
 0x1a0   :  { %648 = vmatmul.f32.gmra.mxu1 %v250_v11 }
 0x1a1   :  { %v4685_v12 = vpop.f32.mrf.mxu2  ;;  %v4687_v18 = vpop.f32.mrf.mxu3 }
 0x1a2   :  { %v4689_v19 = vpop.f32.mrf.mxu0 }
 0x1a5   :  { %v4691_v35 = vpop.f32.mrf.mxu1  ;;  %487 = vmatmul.f32.gmra.mxu0 %v253_v30 }
 0x1a6   :  { %815 = vmatmul.f32.gmra.mxu2 %v255_v32  ;;  %979 = vmatmul.f32.gmra.mxu3 %v256_v33  ;;  %v261_v33 = vld [vmem:[%s6793_s1] sm:$0xff] }
 0x1a8   :  { %651 = vmatmul.f32.gmra.mxu1 %v254_v36  ;;  %v986_v36 = vmax.f32 %v4471_v16, 0.0 }
 0x1a9   :  { %v4693_v37 = vpop.f32.mrf.mxu2  ;;  %v4695_v43 = vpop.f32.mrf.mxu3 }
 0x1aa   :  { %6896 = vst [vmem:[#allocation11_spill] sm:$0xff] %v4693_v37  ;;  %v4697_v46 = vpop.f32.mrf.mxu0 }
 0x1ab   :  { %6897 = vst [vmem:[#allocation12_spill] sm:$0xff] %v4695_v43 }
 0x1ac   :  { %6898 = vst [vmem:[#allocation13_spill] sm:$0xff] %v4697_v46 }
 0x1ad   :  { %v4699_v5 = vpop.f32.mrf.mxu1  ;;  %490 = vmatmul.f32.gmra.mxu0 %v257_v48 }
 0x1ae   :  { %6899 = vst [vmem:[#allocation14_spill] sm:$0xff] %v4699_v5  ;;  %818 = vmatmul.f32.gmra.mxu2 %v259_v60  ;;  %982 = vmatmul.f32.gmra.mxu3 %v260_v4 }
 0x1b0   :  { %654 = vmatmul.f32.gmra.mxu1 %v258_v6  ;;  %v987_v6 = vmax.f32 %v4474_v28, 0.0  ;;  %v989_v28 = vmax.f32 %v4480_v52, 0.0 }
 0x1b1   :  { %v4701_v11 = vpop.f32.mrf.mxu2  ;;  %v4703_v30 = vpop.f32.mrf.mxu3 }
 0x1b2   :  { %6900 = vst [vmem:[#allocation15_spill] sm:$0xff] %v4701_v11  ;;  %v4705_v32 = vpop.f32.mrf.mxu0 }
 0x1b3   :  { %6901 = vst [vmem:[#allocation16_spill] sm:$0xff] %v4703_v30 }
 0x1b4   :  { %6902 = vst [vmem:[#allocation17_spill] sm:$0xff] %v4705_v32 }
 0x1b5   :  { %v4711_v43 = vpop.f32.mrf.mxu1  ;;  %1071 = vmatmul.f32.vlgmr.msrb.gmra.mxu0 %v261_v33  ;;  %v988_v33 = vmax.f32 %v4477_v40, 0.0  ;;  %v990_v40 = vmax.f32 %v4483_v1, 0.0 }
 0x1b6   :  { %6903 = vst [vmem:[#allocation18_spill] sm:$0xff] %v4711_v43  ;;  %2568 = vmatmul.f32.vlgmr.msrb.gmra.mxu3 %v986_v36 }
 0x1b9   :  { %v4713_v48 = vpop.f32.mrf.mxu2  ;;  %v4715_v60 = vpop.f32.mrf.mxu3 }
 0x1ba   :  { %6904 = vst [vmem:[#allocation19_spill] sm:$0xff] %v4713_v48  ;;  %v4717_v4 = vpop.f32.mrf.mxu0 }
 0x1bb   :  { %6905 = vst [vmem:[#allocation20_spill] sm:$0xff] %v4715_v60 }
 0x1bc   :  { %6906 = vst [vmem:[#allocation21_spill] sm:$0xff] %v4717_v4 }
 0x1bd   :  { %v4720_v30 = vpop.f32.mrf.mxu1 }
 0x1be   :  { %6907 = vst [vmem:[#allocation22_spill] sm:$0xff] %v4720_v30  ;;  %2571 = vmatmul.f32.gmra.mxu3 %v987_v6 }
 0x1c1   :  { %v4722_v32 = vpop.f32.mrf.mxu2  ;;  %v4724_v11 = vpop.f32.mrf.mxu3 }
 0x1c2   :  { %6908 = vst [vmem:[#allocation23_spill] sm:$0xff] %v4722_v32  ;;  %v4726_v16 = vpop.f32.mrf.mxu0 }
 0x1c3   :  { %6909 = vst [vmem:[#allocation24_spill] sm:$0xff] %v4724_v11 }
 0x1c4   :  { %6910 = vst [vmem:[#allocation25_spill] sm:$0xff] %v4726_v16 }
 0x1c5   :  { %v4729_v36 = vpop.f32.mrf.mxu1 }
 0x1c6   :  { %6911 = vst [vmem:[#allocation26_spill] sm:$0xff] %v4729_v36  ;;  %2574 = vmatmul.f32.gmra.mxu3 %v988_v33  ;;  %v4748_v33 = vld [vmem:[%s6795_s3] ss:$0 sm:$0xff] }
 0x1c9   :  { %v4731_v48 = vpop.f32.mrf.mxu2  ;;  %v4733_v60 = vpop.f32.mrf.mxu3 }
 0x1ca   :  { %6912 = vst [vmem:[#allocation27_spill] sm:$0xff] %v4731_v48  ;;  %v4735_v4 = vpop.f32.mrf.mxu0 }
 0x1cb   :  { %6913 = vst [vmem:[#allocation28_spill] sm:$0xff] %v4733_v60 }
 0x1cc   :  { %6914 = vst [vmem:[#allocation29_spill] sm:$0xff] %v4735_v4 }
 0x1cd   :  { %v4738_v6 = vpop.f32.mrf.mxu1 }
 0x1ce   :  { %6915 = vst [vmem:[#allocation30_spill] sm:$0xff] %v4738_v6  ;;  %2577 = vmatmul.f32.gmra.mxu3 %v989_v28 }
 0x1d1   :  { %v4740_v32 = vpop.f32.mrf.mxu2  ;;  %v4742_v11 = vpop.f32.mrf.mxu3 }
 0x1d2   :  { %6916 = vst [vmem:[#allocation31_spill] sm:$0xff] %v4740_v32  ;;  %v458_v16 = vpop.f32.mrf.mxu0  ;;  %v991_v32 = vmax.f32 %v4486_v13, 0.0 }
 0x1d3   :  { %6917 = vst [vmem:[#allocation32_spill] sm:$0xff] %v4742_v11  ;;  %v459_v60 = vadd.f32 %v4748_v33, %v458_v16 }
 0x1d5   :  { %v622_v4 = vpop.f32.mrf.mxu1 }
 0x1d6   :  { %2580 = vmatmul.f32.gmra.mxu3 %v990_v40  ;;  %v623_v52 = vadd.f32 %v622_v4, %v459_v60  ;;  %v992_v60 = vmax.f32 %v4489_v26, 0.0 }
 0x1d9   :  { %v786_v48 = vpop.f32.mrf.mxu2  ;;  %v950_v6 = vpop.f32.mrf.mxu3 }
 0x1da   :  { %v787_v28 = vadd.f32 %v786_v48, %v623_v52  ;;  %v461_v36 = vpop.f32.mrf.mxu0 }
 0x1db   :  { %v462_v1 = vadd.f32 %v4748_v33, %v461_v36 }
 0x1dc   :  { %v4752_v11 = vadd.f32 %v950_v6, %v787_v28 }
 0x1dd   :  { %v625_v30 = vpop.f32.mrf.mxu1 }
 0x1de   :  { %2583 = vmatmul.f32.gmra.mxu3 %v991_v32  ;;  %v626_v43 = vadd.f32 %v625_v30, %v462_v1  ;;  %v993_v30 = vmax.f32 %v4492_v39, 0.0  ;;  %v1107_v39 = vld [vmem:[%s6799_s7 + $0x78] sm:$0xff] }
 0x1df   :  { %1108 = vmatpush.msrb.mxu1 %v1107_v39  ;;  %v1102_v39 = vld [vmem:[%s6799_s7 + $0x50] sm:$0xff] }
 0x1e1   :  { %v789_v5 = vpop.f32.mrf.mxu2  ;;  %v953_v46 = vpop.f32.mrf.mxu3 }
 0x1e2   :  { %v790_v37 = vadd.f32 %v789_v5, %v626_v43  ;;  %v464_v16 = vpop.f32.mrf.mxu0 }
 0x1e3   :  { %v465_v40 = vadd.f32 %v4748_v33, %v464_v16 }
 0x1e4   :  { %v4757_v4 = vadd.f32 %v953_v46, %v790_v37 }
 0x1e5   :  { %v628_v48 = vpop.f32.mrf.mxu1 }
 0x1e6   :  { %v629_v52 = vadd.f32 %v628_v48, %v465_v40  ;;  %2586 = vmatmul.f32.gmra.mxu3 %v992_v60  ;;  %v994_v60 = vmax.f32 %v4495_v53, 0.0 }
 0x1e9   :  { %v792_v13 = vpop.f32.mrf.mxu2  ;;  %v956_v6 = vpop.f32.mrf.mxu3 }
 0x1ea   :  { %v793_v28 = vadd.f32 %v792_v13, %v629_v52  ;;  %v467_v36 = vpop.f32.mrf.mxu0 }
 0x1eb   :  { %v468_v32 = vadd.f32 %v4748_v33, %v467_v36 }
 0x1ec   :  { %v4761_v1 = vadd.f32 %v956_v6, %v793_v28 }
 0x1ed   :  { %v631_v43 = vpop.f32.mrf.mxu1 }
 0x1ee   :  { %v632_v5 = vadd.f32 %v631_v43, %v468_v32  ;;  %2589 = vmatmul.f32.gmra.mxu3 %v993_v30  ;;  %v1106_v30 = vld [vmem:[%s6799_s7 + $0x70] sm:$0xff]  ;;  %v995_v43 = vmax.f32 %v4498_v3, 0.0 }
 0x1ef   :  { %1109 = vmatpush.msrb.mxu1 %v1106_v30 }
 0x1f1   :  { %v795_v16 = vpop.f32.mrf.mxu2  ;;  %v959_v26 = vpop.f32.mrf.mxu3 }
 0x1f2   :  { %v796_v37 = vadd.f32 %v795_v16, %v632_v5  ;;  %v470_v46 = vpop.f32.mrf.mxu0  ;;  %v1105_v16 = vld [vmem:[%s6799_s7 + $0x68] sm:$0xff] }
 0x1f3   :  { %v471_v40 = vadd.f32 %v4748_v33, %v470_v46  ;;  %1110 = vmatpush.msrb.mxu1 %v1105_v16  ;;  %v1104_v46 = vld [vmem:[%s6799_s7 + $0x60] sm:$0xff]  ;;  %v1099_v16 = vld [vmem:[%s6799_s7 + $0x38] sm:$0xff] }
 0x1f4   :  { %v4765_v48 = vadd.f32 %v959_v26, %v796_v37 }
 0x1f5   :  { %v634_v52 = vpop.f32.mrf.mxu1  ;;  %1111 = vmatpush.msrb.mxu1 %v1104_v46 }
 0x1f6   :  { %v635_v13 = vadd.f32 %v634_v52, %v471_v40  ;;  %2592 = vmatmul.f32.gmra.mxu3 %v994_v60  ;;  %v1103_v40 = vld [vmem:[%s6799_s7 + $0x58] sm:$0xff] }
 0x1f7   :  { %1112 = vmatpush.msrb.mxu1 %v1103_v40  ;;  %v1098_v40 = vld [vmem:[%s6799_s7 + $0x30] sm:$0xff] }
 0x1f9   :  { %v798_v6 = vpop.f32.mrf.mxu2  ;;  %v962_v28 = vpop.f32.mrf.mxu3  ;;  %1113 = vmatpush.msrb.mxu1 %v1102_v39 }
 0x1fa   :  { %v799_v36 = vadd.f32 %v798_v6, %v635_v13  ;;  %v473_v32 = vpop.f32.mrf.mxu0 }
 0x1fb   :  { %v474_v53 = vadd.f32 %v4748_v33, %v473_v32  ;;  %v1101_v32 = vld [vmem:[%s6799_s7 + $0x48] sm:$0xff] }
 0x1fc   :  { %v4775_v5 = vadd.f32 %v962_v28, %v799_v36  ;;  %v996_v28 = vmax.f32 %v4501_v17, 0.0  ;;  %1114 = vmatpush.msrb.mxu1 %v1101_v32  ;;  %v1095_v32 = vld [vmem:[%s6799_s7 + $0x18] sm:$0xff] }
 0x1fd   :  { %v637_v26 = vpop.f32.mrf.mxu1 }
 0x1fe   :  { %v638_v37 = vadd.f32 %v637_v26, %v474_v53  ;;  %2595 = vmatmul.f32.gmra.mxu3 %v995_v43  ;;  %v1100_v43 = vld [vmem:[%s6799_s7 + $0x40] sm:$0xff] }
 0x1ff   :  { %1115 = vmatpush.msrb.mxu1 %v1100_v43 }
 0x201   :  { %v801_v3 = vpop.f32.mrf.mxu2  ;;  %v965_v60 = vpop.f32.mrf.mxu3  ;;  %1116 = vmatpush.msrb.mxu1 %v1099_v16  ;;  %v1094_v16 = vld [vmem:[%s6799_s7 + $0x10] sm:$0xff] }
 0x202   :  { %v802_v52 = vadd.f32 %v801_v3, %v638_v37  ;;  %v476_v13 = vpop.f32.mrf.mxu0 }
 0x203   :  { %v477_v6 = vadd.f32 %v4748_v33, %v476_v13  ;;  %1117 = vmatpush.msrb.mxu1 %v1098_v40  ;;  %v1097_v13 = vld [vmem:[%s6799_s7 + $0x28] sm:$0xff] }
 0x204   :  { %v4791_v36 = vadd.f32 %v965_v60, %v802_v52  ;;  %v997_v60 = vmax.f32 %v4504_v31, 0.0 }
 0x205   :  { %v640_v30 = vpop.f32.mrf.mxu1  ;;  %1118 = vmatpush.msrb.mxu1 %v1097_v13 }
 0x206   :  { %v641_v53 = vadd.f32 %v640_v30, %v477_v6  ;;  %2598 = vmatmul.f32.gmra.mxu3 %v996_v28  ;;  %v1096_v28 = vld [vmem:[%s6799_s7 + $0x20] sm:$0xff] }
 0x207   :  { %1119 = vmatpush.msrb.mxu1 %v1096_v28 }
 0x209   :  { %v804_v17 = vpop.f32.mrf.mxu2  ;;  %v968_v26 = vpop.f32.mrf.mxu3  ;;  %1120 = vmatpush.msrb.mxu1 %v1095_v32  ;;  %v999_v32 = vmax.f32 %v4510_v59, 0.0 }
 0x20a   :  { %v805_v37 = vadd.f32 %v804_v17, %v641_v53  ;;  %v479_v46 = vpop.f32.mrf.mxu0 }
 0x20b   :  { %v480_v3 = vadd.f32 %v4748_v33, %v479_v46  ;;  %1121 = vmatpush.msrb.mxu1 %v1094_v16  ;;  %v1093_v46 = vld [vmem:[%s6799_s7 + $0x8] sm:$0xff] }
 0x20c   :  { %v4807_v52 = vadd.f32 %v968_v26, %v805_v37  ;;  %v998_v26 = vmax.f32 %v4507_v45, 0.0 }
 0x20d   :  { %v643_v39 = vpop.f32.mrf.mxu1  ;;  %1122 = vmatpush.msrb.mxu1 %v1093_v46 }
 0x20e   :  { %v644_v6 = vadd.f32 %v643_v39, %v480_v3  ;;  %2601 = vmatmul.f32.gmra.mxu3 %v997_v60  ;;  %v1092_v60 = vld [vmem:[%s6799_s7] sm:$0xff] }
 0x20f   :  { %1123 = vmatpush.msrb.mxu1 %v1092_v60 }
 0x211   :  { %v807_v31 = vpop.f32.mrf.mxu2  ;;  %v971_v30 = vpop.f32.mrf.mxu3 }
 0x212   :  { %v808_v53 = vadd.f32 %v807_v31, %v644_v6  ;;  %v482_v43 = vpop.f32.mrf.mxu0 }
 0x213   :  { %v483_v17 = vadd.f32 %v4748_v33, %v482_v43 }
 0x214   :  { %v4823_v37 = vadd.f32 %v971_v30, %v808_v53 }
 0x215   :  { %v646_v40 = vpop.f32.mrf.mxu1 }
 0x216   :  { %v647_v3 = vadd.f32 %v646_v40, %v483_v17  ;;  %2604 = vmatmul.f32.gmra.mxu3 %v998_v26  ;;  %v1000_v40 = vmax.f32 %v4513_v10, 0.0  ;;  %v4020_v10 = vld [vmem:[%s6797_s5] ss:$0 sm:$0xff] }
 0x219   :  { %v810_v13 = vpop.f32.mrf.mxu2  ;;  %v974_v39 = vpop.f32.mrf.mxu3 }
 0x21a   :  { %v811_v6 = vadd.f32 %v810_v13, %v647_v3  ;;  %v485_v28 = vpop.f32.mrf.mxu0 }
 0x21b   :  { %v486_v45 = vadd.f32 %v4748_v33, %v485_v28 }
 0x21c   :  { %v4833_v31 = vadd.f32 %v974_v39, %v811_v6 }
 0x21d   :  { %v649_v30 = vpop.f32.mrf.mxu1 }
 0x21e   :  { %v650_v53 = vadd.f32 %v649_v30, %v486_v45  ;;  %2607 = vmatmul.f32.gmra.mxu3 %v999_v32  ;;  %v1001_v45 = vmax.f32 %v4516_v25, 0.0 }
 0x221   :  { %v813_v43 = vpop.f32.mrf.mxu2  ;;  %v977_v16 = vpop.f32.mrf.mxu3 }
 0x222   :  { %v814_v17 = vadd.f32 %v813_v43, %v650_v53  ;;  %v488_v26 = vpop.f32.mrf.mxu0  ;;  %v1128_v43 = vlaneseq }
 0x223   :  { %v489_v46 = vadd.f32 %v4748_v33, %v488_v26 }
 0x224   :  { %v4837_v60 = vadd.f32 %v977_v16, %v814_v17  ;;  %v4846_v17 = vshrl.u32 %v1128_v43, 7  ;;  %v4848_v26 = vand.u32 127, %v1128_v43 }
 0x225   :  { %v652_v3 = vpop.f32.mrf.mxu1 }
 0x226   :  { %v653_v13 = vadd.f32 %v652_v3, %v489_v46  ;;  %2610 = vmatmul.f32.gmra.mxu3 %v1000_v40  ;;  %6918 = vst [vmem:[#allocation33_spill] sm:$0xff] %v4846_v17  ;;  %v4851_v25 = vadd.s32 248, %v4846_v17 }
 0x227   :  { %6919 = vst [vmem:[#allocation34_spill] sm:$0xff] %v4848_v26 }
 0x229   :  { %v816_v28 = vpop.f32.mrf.mxu2  ;;  %v980_v59 = vpop.f32.mrf.mxu3 }
 0x22a   :  { %v817_v39 = vadd.f32 %v816_v28, %v653_v13  ;;  %v491_v6 = vpop.f32.mrf.mxu0  ;;  %v4854_v13 = vmul.u32 49, %v4848_v26 }
 0x22b   :  { %v492_v30 = vadd.f32 %v4748_v33, %v491_v6 }
 0x22c   :  { %v4840_v32 = vadd.f32 %v980_v59, %v817_v39  ;;  %v1002_v39 = vmax.f32 %v4519_v42, 0.0  ;;  %vm6802_vm0 = vcmp.ge.s32.totalorder %v4851_v25, %v4854_v13  ;;  %v4867_v42 = vadd.s32 104, %v4846_v17 }
 0x22d   :  { %v655_v53 = vpop.f32.mrf.mxu1  ;;  %vm1181_vm15 = vcmp.ge.s32.totalorder %v4846_v17, %v4854_v13 }
 0x22e   :  { %2613 = vmatmul.f32.gmra.mxu3 %v1001_v45  ;;  %v656_v16 = vadd.f32 %v655_v53, %v492_v30  ;;  %v6807_v30 = vmov 0.0   ;;  %vm6804_vm2 = vcmp.ge.s32.totalorder %v4867_v42, %v4854_v13 }
 0x22f   :  { %v3780_v53 = vsel %vm6802_vm0, 1.0, %v6807_v30 }
 0x230   :  { %v1620_v43 = vsel %vm1526_vm1, %v3780_v53, 0.0 }
 0x231   :  { %v819_v46 = vpop.f32.mrf.mxu2  ;;  %v983_v28 = vpop.f32.mrf.mxu3  ;;  %1621 = vadd.xlane.f32.xlu1 %v1620_v43 }
 0x232   :  { %v820_v40 = vadd.f32 %v819_v46, %v656_v16  ;;  %v1072_v3 = vpop.f32.mrf.mxu0  ;;  %v3762_v16 = vsel %vm6804_vm2, 1.0, %v6807_v30 }
 0x233   :  { %v1073_v59 = vadd.f32 %v4020_v10, %v1072_v3  ;;  %v1003_v10 = vmax.f32 %v4522_v57, 0.0  ;;  %v1566_v46 = vsel %vm1526_vm1, %v3762_v16, 0.0  ;;  %v1004_v3 = vmax.f32 %v4525_v9, 0.0 }
 0x234   :  { %v4857_v6 = vadd.f32 %v983_v28, %v820_v40  ;;  %v4878_v40 = vadd.s32 88, %v4846_v17  ;;  %v1006_v16 = vmax.f32 %v4531_v44, 0.0 }
 0x235   :  { %v1075_v45 = vmax.f32 %v1073_v59, 0.0 }
 0x236   :  { %2616 = vmatmul.f32.gmra.mxu3 %v1002_v39  ;;  %vm1192_vm3 = vcmp.ge.s32.totalorder %v4878_v40, %v4854_v13  ;;  %v4891_v39 = vadd.s32 80, %v4846_v17 }
 0x237   :  { %1124 = vmatmul.f32.vlgmr.msrb.gmra.mxu1 %v1075_v45  ;;  %v3760_v57 = vsel %vm1192_vm3, 1.0, %v6807_v30  ;;  %v1005_v45 = vmax.f32 %v4528_v27, 0.0 }
 0x238   :  { %v1560_v59 = vsel %vm1526_vm1, %v3760_v57, 0.0  ;;  %vm1191_vm4 = vcmp.ge.s32.totalorder %v4891_v39, %v4854_v13  ;;  %v4917_v57 = vadd.s32 64, %v4846_v17 }
 0x239   :  { %1567 = vadd.xlane.f32.xlu1 %v1566_v46  ;;  %v4887_v28 = vpop.f32.mrf.mxu3  ;;  %v3759_v9 = vsel %vm1191_vm4, 1.0, %v6807_v30 }
 0x23a   :  { %6920 = vst [vmem:[#allocation35_spill] sm:$0xff] %v4887_v28  ;;  %v1557_v53 = vsel %vm1526_vm1, %v3759_v9, 0.0  ;;  %vm1189_vm6 = vcmp.ge.s32.totalorder %v4917_v57, %v4854_v13  ;;  %v4928_v9 = vadd.s32 56, %v4846_v17 }
 0x23b   :  { %v3757_v44 = vsel %vm1189_vm6, 1.0, %v6807_v30 }
 0x23c   :  { %vm1188_vm7 = vcmp.ge.s32.totalorder %v4928_v9, %v4854_v13 }
 0x23e   :  { %2619 = vmatmul.f32.gmra.mxu3 %v1003_v10  ;;  %v4904_v10 = vadd.s32 72, %v4846_v17 }
 0x240   :  { %vm1190_vm5 = vcmp.ge.s32.totalorder %v4904_v10, %v4854_v13 }
 0x241   :  { %1561 = vadd.xlane.f32.xlu1 %v1560_v59  ;;  %v4901_v43 = vpop.f32.mrf.mxu3  ;;  %v3758_v27 = vsel %vm1190_vm5, 1.0, %v6807_v30  ;;  %v1007_v59 = vmax.f32 %v4534_v61, 0.0  ;;  %v3756_v61 = vsel %vm1188_vm7, 1.0, %v6807_v30 }
 0x242   :  { %6921 = vst [vmem:[#allocation36_spill] sm:$0xff] %v4901_v43  ;;  %v1554_v46 = vsel %vm1526_vm1, %v3758_v27, 0.0  ;;  %v1548_v27 = vsel %vm1526_vm1, %v3756_v61, 0.0  ;;  %v6954_v43 = vmov 0.0  }
 0x246   :  { %2622 = vmatmul.f32.gmra.mxu3 %v1004_v3 }
 0x249   :  { %1558 = vadd.xlane.f32.xlu1 %v1557_v53  ;;  %v4914_v3 = vpop.f32.mrf.mxu3  ;;  %v1008_v53 = vmax.f32 %v4537_v15, 0.0 }
 0x24a   :  { %6922 = vst [vmem:[#allocation37_spill] sm:$0xff] %v4914_v3 }
 0x24e   :  { %2625 = vmatmul.f32.gmra.mxu3 %v1005_v45  ;;  %v1551_v45 = vsel %vm1526_vm1, %v3757_v44, 0.0  ;;  %v423_v44 = vadd.f32 %v4748_v33, %v4543_v47 }
 0x250   :  { %v587_v61 = vadd.f32 %v4547_v54, %v423_v44  ;;  %v4975_v44 = vadd.s32 32, %v4846_v17 }
 0x251   :  { %1555 = vadd.xlane.f32.xlu1 %v1554_v46  ;;  %v4941_v46 = vadd.s32 48, %v4846_v17 }
 0x252   :  { %v751_v28 = vadd.f32 %v4561_v62, %v587_v61  ;;  %vm1185_vm10 = vcmp.ge.s32.totalorder %v4975_v44, %v4854_v13 }
 0x253   :  { %vm1187_vm8 = vcmp.ge.s32.totalorder %v4941_v46, %v4854_v13 }
 0x254   :  { %v3755_v15 = vsel %vm1187_vm8, 1.0, %v6807_v30 }
 0x256   :  { %2628 = vmatmul.f32.gmra.mxu3 %v1006_v16  ;;  %v4931_v16 = vpop.f32.mrf.mxu3 }
 0x257   :  { %6923 = vst [vmem:[#allocation38_spill] sm:$0xff] %v4931_v16  ;;  %v5271_v16 = vadd.s32 160, %v4846_v17 }
 0x259   :  { %1552 = vadd.xlane.f32.xlu1 %v1551_v45 }
 0x25e   :  { %2631 = vmatmul.f32.gmra.mxu3 %v1007_v59  ;;  %v1009_v59 = vmax.f32 %v4540_v34, 0.0  ;;  %v4952_v45 = vpop.f32.mrf.mxu3  ;;  %v4957_v34 = vadd.s32 40, %v4846_v17 }
 0x25f   :  { %6924 = vst [vmem:[#allocation39_spill] sm:$0xff] %v4952_v45 }
 0x260   :  { %vm1186_vm9 = vcmp.ge.s32.totalorder %v4957_v34, %v4854_v13 }
 0x261   :  { %1549 = vadd.xlane.f32.xlu1 %v1548_v27  ;;  %v1010_v27 = vmax.f32 %v4545_v51, 0.0  ;;  %v3754_v47 = vsel %vm1186_vm9, 1.0, %v6807_v30 }
 0x262   :  { %v1542_v54 = vsel %vm1526_vm1, %v3754_v47, 0.0  ;;  %v4992_v47 = vadd.s32 24, %v4846_v17 }
 0x264   :  { %vm1184_vm11 = vcmp.ge.s32.totalorder %v4992_v47, %v4854_v13 }
 0x266   :  { %2634 = vmatmul.f32.gmra.mxu3 %v1008_v53  ;;  %v1545_v53 = vsel %vm1526_vm1, %v3755_v15, 0.0  ;;  %v915_v15 = vadd.f32 %v4563_v63, %v751_v28  ;;  %v4971_v51 = vpop.f32.mrf.mxu3  ;;  %v429_v63 = vadd.f32 %v4748_v33, %v4597_v29  ;;  %v3752_v29 = vsel %vm1184_vm11, 1.0, %v6807_v30 }
 0x267   :  { %6925 = vst [vmem:[#allocation40_spill] sm:$0xff] %v4971_v51 }
 0x269   :  { %1546 = vadd.xlane.f32.xlu1 %v1545_v53  ;;  %v1011_v53 = vmax.f32 %v915_v15, 0.0 }
 0x26e   :  { %2637 = vmatmul.f32.gmra.mxu3 %v1009_v59  ;;  %v426_v59 = vadd.f32 %v4748_v33, %v4565_v2  ;;  %v3753_v2 = vsel %vm1185_vm10, 1.0, %v6807_v30 }
 0x270   :  { %v590_v62 = vadd.f32 %v4579_v14, %v426_v59  ;;  %v1539_v14 = vsel %vm1526_vm1, %v3753_v2, 0.0 }
 0x271   :  { %1543 = vadd.xlane.f32.xlu1 %v1542_v54 }
 0x272   :  { %v754_v61 = vadd.f32 %v4593_v23, %v590_v62  ;;  %v4989_v23 = vpop.f32.mrf.mxu3 }
 0x274   :  { %v918_v28 = vadd.f32 %v4595_v24, %v754_v61  ;;  %v432_v24 = vadd.f32 %v4748_v33, %v4626_v55 }
 0x276   :  { %2640 = vmatmul.f32.gmra.mxu3 %v1010_v27  ;;  %v593_v27 = vadd.f32 %v4608_v38, %v429_v63  ;;  %v1012_v59 = vmax.f32 %v918_v28, 0.0  ;;  %v1536_v38 = vsel %vm1526_vm1, %v3752_v29, 0.0  ;;  %v596_v62 = vadd.f32 %v4637_v7, %v432_v24 }
 0x278   :  { %v757_v54 = vadd.f32 %v4622_v50, %v593_v27  ;;  %v5007_v50 = vadd.s32 16, %v4846_v17  ;;  %v760_v61 = vadd.f32 %v4651_v20, %v596_v62 }
 0x279   :  { %1540 = vadd.xlane.f32.xlu1 %v1539_v14  ;;  %v5024_v14 = vadd.s32 8, %v4846_v17 }
 0x27a   :  { %v921_v15 = vadd.f32 %v4624_v0, %v757_v54  ;;  %v5010_v2 = vpop.f32.mrf.mxu3  ;;  %vm1183_vm12 = vcmp.ge.s32.totalorder %v5007_v50, %v4854_v13  ;;  %v435_v0 = vadd.f32 %v4748_v33, %v4655_v22  ;;  %v924_v63 = vadd.f32 %v4653_v21, %v760_v61 }
 0x27b   :  { %6926 = vst [vmem:[#allocation41_spill] sm:$0xff] %v5010_v2  ;;  %v3751_v55 = vsel %vm1183_vm12, 1.0, %v6807_v30  ;;  %vm1182_vm13 = vcmp.ge.s32.totalorder %v5024_v14, %v4854_v13  ;;  %v5064_v61 = vadd.s32 96, %v4846_v17 }
 0x27c   :  { %v1533_v7 = vsel %vm1526_vm1, %v3751_v55, 0.0  ;;  %v599_v20 = vadd.f32 %v4666_v41, %v435_v0  ;;  %v1014_v28 = vmax.f32 %v924_v63, 0.0  ;;  %v3750_v22 = vsel %vm1182_vm13, 1.0, %v6807_v30 }
 0x27d   :  { %v1530_v41 = vsel %vm1526_vm1, %v3750_v22, 0.0  ;;  %vm6805_vm0 = vcmp.ge.s32.totalorder %v5064_v61, %v4854_v13 }
 0x27e   :  { %2643 = vmatmul.f32.gmra.mxu3 %v1011_v53  ;;  %v1013_v53 = vmax.f32 %v921_v15, 0.0  ;;  %v763_v27 = vadd.f32 %v4674_v49, %v599_v20  ;;  %v5040_v49 = vadd.s32 240, %v4846_v17  ;;  %v441_v15 = vadd.f32 %v4748_v33, %v4689_v19 }
 0x27f   :  { %v3761_v63 = vsel %vm6805_vm0, 1.0, %v6807_v30 }
 0x280   :  { %v927_v54 = vadd.f32 %v4676_v56, %v763_v27  ;;  %vm6803_vm14 = vcmp.ge.s32.totalorder %v5040_v49, %v4854_v13  ;;  %v605_v55 = vadd.f32 %v4691_v35, %v441_v15  ;;  %v1563_v20 = vsel %vm1526_vm1, %v3761_v63, 0.0  ;;  %v6931_v35 = vld [vmem:[#allocation12_spill] sm:$0xff]  ;;  %v6938_v63 = vld [vmem:[#allocation18_spill] sm:$0xff] }
 0x281   :  { %1537 = vadd.xlane.f32.xlu1 %v1536_v38 }
 0x282   :  { %v5035_v21 = vpop.f32.mrf.mxu3  ;;  %v1015_v24 = vmax.f32 %v927_v54, 0.0  ;;  %v6932_v54 = vld [vmem:[#allocation14_spill] sm:$0xff] }
 0x283   :  { %6927 = vst [vmem:[#allocation42_spill] sm:$0xff] %v5035_v21 }
 0x286   :  { %2646 = vmatmul.f32.gmra.mxu3 %v1012_v59  ;;  %v438_v59 = vadd.f32 %v4748_v33, %v4678_v58  ;;  %v3779_v58 = vsel %vm6803_vm14, 1.0, %v6807_v30 }
 0x287   :  { %v1617_v56 = vsel %vm1526_vm1, %v3779_v58, 0.0 }
 0x288   :  { %v602_v29 = vadd.f32 %v4683_v8, %v438_v59  ;;  %v3749_v8 = vsel %vm1181_vm15, 1.0, %v6807_v30  ;;  %1618 = vadd.xlane.f32.xlu2 %v1617_v56  ;;  %v6935_v56 = vld [vmem:[#allocation15_spill] sm:$0xff] }
 0x289   :  { %1534 = vadd.xlane.f32.xlu1 %v1533_v7  ;;  %v6929_v7 = vld [vmem:[#allocation11_spill] sm:$0xff] }
 0x28a   :  { %v766_v38 = vadd.f32 %v4685_v12, %v602_v29  ;;  %v1527_v12 = vsel %vm1526_vm1, %v3749_v8, 0.0  ;;  %v769_v19 = vadd.f32 %v6929_v7, %v605_v55 }
 0x28c   :  { %v930_v62 = vadd.f32 %v4687_v18, %v766_v38  ;;  %v1230_v18 = vadd.s32 1, %v4848_v26  ;;  %v933_v22 = vadd.f32 %v6931_v35, %v769_v19  ;;  %v5106_v19 = vadd.s32 216, %v4846_v17  ;;  %v6939_v35 = vld [vmem:[#allocation19_spill] sm:$0xff] }
 0x28e   :  { %2649 = vmatmul.f32.gmra.mxu3 %v1013_v53  ;;  %v5061_v53 = vpop.f32.mrf.mxu3  ;;  %v1016_v0 = vmax.f32 %v930_v62, 0.0  ;;  %v5079_v59 = vmul.u32 49, %v1230_v18  ;;  %v1017_v58 = vmax.f32 %v933_v22, 0.0  ;;  %v6936_v62 = vld [vmem:[#allocation17_spill] sm:$0xff] }
 0x28f   :  { %6928 = vst [vmem:[#allocation43_spill] sm:$0xff] %v5061_v53  ;;  %v447_v55 = vadd.f32 %v4748_v33, %v6936_v62 }
 0x290   :  { %1564 = vadd.xlane.f32.xlu2 %v1563_v20  ;;  %vm1232_vm2 = vcmp.lt.s32.totalorder %v4846_v17, %v5079_v59 }
 0x291   :  { %1531 = vadd.xlane.f32.xlu1 %v1530_v41  ;;  %v5082_v41 = vadd.s32 224, %v4846_v17  ;;  %vm1281_vm0 = vmand %vm1181_vm15, %vm1232_vm2  ;;  %v611_v18 = vadd.f32 %v6938_v63, %v447_v55  ;;  %vm1233_vm2 = vcmp.lt.s32.totalorder %v5024_v14, %v5079_v59  ;;  %v5132_v55 = vadd.s32 208, %v4846_v17 }
 0x293   :  { %vm6806_vm14 = vcmp.ge.s32.totalorder %v5082_v41, %v4854_v13  ;;  %v775_v22 = vadd.f32 %v6939_v35, %v611_v18  ;;  %vm6810_vm15 = vcmp.ge.s32.totalorder %v5132_v55, %v4854_v13 }
 0x294   :  { %v3777_v15 = vsel %vm6806_vm14, 1.0, %v6807_v30  ;;  %vm6809_vm14 = vcmp.ge.s32.totalorder %v5106_v19, %v4854_v13 }
 0x296   :  { %2652 = vmatmul.f32.gmra.mxu3 %v1014_v28  ;;  %v6930_v28 = vld [vmem:[#allocation13_spill] sm:$0xff] }
 0x297   :  { %v444_v27 = vadd.f32 %v4748_v33, %v6930_v28  ;;  %v3700_v28 = vsel %vm1281_vm0, 1.0, %v6807_v30  ;;  %vm1282_vm0 = vmand %vm1182_vm13, %vm1233_vm2  ;;  %vm1234_vm13 = vcmp.lt.s32.totalorder %v5007_v50, %v5079_v59 }
 0x298   :  { %v3701_v18 = vsel %vm1282_vm0, 1.0, %v6807_v30  ;;  %vm1283_vm2 = vmand %vm1183_vm12, %vm1234_vm13  ;;  %vm1235_vm12 = vcmp.lt.s32.totalorder %v4992_v47, %v5079_v59 }
 0x299   :  { %1528 = vadd.xlane.f32.xlu1 %v1527_v12  ;;  %v608_v29 = vadd.f32 %v6932_v54, %v444_v27  ;;  %v1611_v12 = vsel %vm1526_vm1, %v3777_v15, 0.0  ;;  %vm1284_vm13 = vmand %vm1184_vm11, %vm1235_vm12  ;;  %vm1236_vm11 = vcmp.lt.s32.totalorder %v4975_v44, %v5079_v59 }
 0x29a   :  { %1612 = vadd.xlane.f32.xlu2 %v1611_v12  ;;  %v6942_v12 = vld [vmem:[#allocation20_spill] sm:$0xff]  ;;  %v3703_v3 = vsel %vm1284_vm13, 1.0, %v6954_v43  ;;  %vm1285_vm12 = vmand %vm1185_vm10, %vm1236_vm11 }
 0x29b   :  { %v772_v8 = vadd.f32 %v6935_v56, %v608_v29  ;;  %v939_v62 = vadd.f32 %v6942_v12, %v775_v22  ;;  %v3775_v22 = vsel %vm6810_vm15, 1.0, %v6807_v30 }
 0x29e   :  { %2655 = vmatmul.f32.gmra.mxu3 %v1015_v24  ;;  %v5085_v24 = vpop.f32.mrf.mxu3 }
 0x29f   :  { %6933 = vst [vmem:[#allocation11_spill] sm:$0xff] %v5085_v24 }
 0x2a4   :  { %v5087_v38 = vpop.xlane.xlu1 %1621 }
 0x2a5   :  { %6934 = vst [vmem:[#allocation13_spill] sm:$0xff] %v5087_v38 }
 0x2a6   :  { %2658 = vmatmul.f32.gmra.mxu3 %v1016_v0  ;;  %v6937_v0 = vld [vmem:[#allocation16_spill] sm:$0xff]  ;;  %v5115_v54 = vpop.f32.mrf.mxu3 }
 0x2a7   :  { %v936_v7 = vadd.f32 %v6937_v0, %v772_v8  ;;  %6940 = vst [vmem:[#allocation12_spill] sm:$0xff] %v5115_v54  ;;  %v6941_v8 = vld [vmem:[#allocation21_spill] sm:$0xff]  ;;  %v6943_v0 = vld [vmem:[#allocation22_spill] sm:$0xff] }
 0x2a8   :  { %v450_v15 = vadd.f32 %v4748_v33, %v6941_v8 }
 0x2a9   :  { %v1018_v27 = vmax.f32 %v936_v7, 0.0 }
 0x2aa   :  { %v614_v7 = vadd.f32 %v6943_v0, %v450_v15  ;;  %v6947_v15 = vld [vmem:[#allocation24_spill] sm:$0xff]  ;;  %v6948_v0 = vld [vmem:[#allocation26_spill] sm:$0xff] }
 0x2ac   :  { %v5109_v20 = vpop.xlane.xlu1 %1567 }
 0x2ae   :  { %2661 = vmatmul.f32.gmra.mxu3 %v1017_v58  ;;  %v3776_v58 = vsel %vm6809_vm14, 1.0, %v6807_v30  ;;  %v5150_v8 = vpop.f32.mrf.mxu3  ;;  %vm1237_vm14 = vcmp.lt.s32.totalorder %v4957_v34, %v5079_v59 }
 0x2af   :  { %v1608_v56 = vsel %vm1526_vm1, %v3776_v58, 0.0  ;;  %v6945_v58 = vld [vmem:[#allocation25_spill] sm:$0xff]  ;;  %6946 = vst [vmem:[#allocation14_spill] sm:$0xff] %v5150_v8  ;;  %vm1286_vm10 = vmand %vm1186_vm9, %vm1237_vm14  ;;  %vm1238_vm9 = vcmp.lt.s32.totalorder %v4941_v46, %v5079_v59  ;;  %v5419_v8 = vadd.s32 368, %v4846_v17 }
 0x2b0   :  { %1609 = vadd.xlane.f32.xlu2 %v1608_v56  ;;  %v453_v56 = vadd.f32 %v4748_v33, %v6945_v58  ;;  %vm1287_vm14 = vmand %vm1187_vm8, %vm1238_vm9  ;;  %vm1201_vm9 = vcmp.ge.s32.totalorder %v5271_v16, %v4854_v13 }
 0x2b1   :  { %6967 = vst [vmem:[#allocation24_spill] sm:$0xff] %v5419_v8 }
 0x2b4   :  { %v1125_v29 = vpop.f32.mrf.mxu1  ;;  %v5135_v63 = vpop.xlane.xlu1 %1561 }
 0x2b5   :  { %2206 = vmatpush.msrb.mxu2 %v1125_v29  ;;  %v1605_v29 = vsel %vm1526_vm1, %v3775_v22, 0.0  ;;  %v3702_v22 = vsel %vm1283_vm2, 1.0, %v6807_v30 }
 0x2b6   :  { %2664 = vmatmul.f32.gmra.mxu3 %v1018_v27  ;;  %3900 = vmatmul.msk.f32.vlgmr.msrb.gmra.mxu2 %vm1526_vm1, %v3700_v28  ;;  %v1019_v28 = vmax.f32 %v939_v62, 0.0  ;;  %v6944_v27 = vld [vmem:[#allocation23_spill] sm:$0xff]  ;;  %v5158_v62 = vadd.s32 200, %v4846_v17 }
 0x2b7   :  { %v778_v35 = vadd.f32 %v6944_v27, %v614_v7  ;;  %v617_v7 = vadd.f32 %v6948_v0, %v453_v56  ;;  %v6950_v56 = vld [vmem:[#allocation29_spill] sm:$0xff] }
 0x2b8   :  { %1606 = vadd.xlane.f32.xlu2 %v1605_v29  ;;  %vm6811_vm0 = vcmp.ge.s32.totalorder %v5158_v62, %v4854_v13 }
 0x2b9   :  { %v942_v12 = vadd.f32 %v6947_v15, %v778_v35  ;;  %v3774_v35 = vsel %vm6811_vm0, 1.0, %v6807_v30  ;;  %v456_v15 = vadd.f32 %v4748_v33, %v6950_v56  ;;  %v6953_v30 = vld [vmem:[#allocation30_spill] sm:$0xff]  ;;  %v6956_v56 = vld [vmem:[#allocation32_spill] sm:$0xff] }
 0x2ba   :  { %v1602_v58 = vsel %vm1526_vm1, %v3774_v35, 0.0 }
 0x2bb   :  { %v620_v35 = vadd.f32 %v6953_v30, %v456_v15 }
 0x2bc   :  { %v5161_v27 = vpop.xlane.xlu1 %1558 }
 0x2be   :  { %2667 = vmatmul.f32.gmra.mxu3 %v1019_v28  ;;  %3901 = vmatmul.msk.f32.gmra.mxu2 %vm1526_vm1, %v3701_v18  ;;  %v1020_v18 = vmax.f32 %v942_v12, 0.0  ;;  %v6949_v28 = vld [vmem:[#allocation27_spill] sm:$0xff]  ;;  %v6951_v12 = vld [vmem:[#allocation28_spill] sm:$0xff] }
 0x2bf   :  { %v781_v29 = vadd.f32 %v6949_v28, %v617_v7  ;;  %v5178_v7 = vpop.f32.mrf.mxu3  ;;  %v5184_v28 = vadd.s32 192, %v4846_v17 }
 0x2c0   :  { %1603 = vadd.xlane.f32.xlu2 %v1602_v58  ;;  %6952 = vst [vmem:[#allocation15_spill] sm:$0xff] %v5178_v7  ;;  %v5388_v7 = vadd.s32 280, %v4846_v17 }
 0x2c1   :  { %v945_v0 = vadd.f32 %v6951_v12, %v781_v29  ;;  %vm1205_vm2 = vcmp.ge.s32.totalorder %v5184_v28, %v4854_v13  ;;  %v5206_v12 = vadd.s32 184, %v4846_v17 }
 0x2c2   :  { %v3773_v58 = vsel %vm1205_vm2, 1.0, %v6954_v43 }
 0x2c3   :  { %v1599_v30 = vsel %vm1526_vm1, %v3773_v58, 0.0  ;;  %vm1204_vm13 = vcmp.ge.s32.totalorder %v5206_v12, %v4854_v13  ;;  %v5227_v58 = vadd.s32 176, %v4846_v17 }
 0x2c4   :  { %v5188_v33 = vpop.xlane.xlu1 %1555 }
 0x2c5   :  { %vm1203_vm11 = vcmp.ge.s32.totalorder %v5227_v58, %v4854_v13 }
 0x2c6   :  { %2670 = vmatmul.f32.gmra.mxu3 %v1020_v18  ;;  %3902 = vmatmul.msk.f32.gmra.mxu2 %vm1526_vm1, %v3702_v22  ;;  %v1021_v22 = vmax.f32 %v945_v0, 0.0  ;;  %v6955_v18 = vld [vmem:[#allocation31_spill] sm:$0xff] }
 0x2c7   :  { %v784_v29 = vadd.f32 %v6955_v18, %v620_v35  ;;  %v5208_v0 = vpop.f32.mrf.mxu3  ;;  %v3704_v35 = vsel %vm1285_vm12, 1.0, %v6954_v43 }
 0x2c8   :  { %1600 = vadd.xlane.f32.xlu2 %v1599_v30  ;;  %6957 = vst [vmem:[#allocation17_spill] sm:$0xff] %v5208_v0  ;;  %v3705_v30 = vsel %vm1286_vm10, 1.0, %v6954_v43  ;;  %vm1239_vm10 = vcmp.lt.s32.totalorder %v4928_v9, %v5079_v59  ;;  %v5324_v0 = vadd.s32 144, %v4846_v17 }
 0x2c9   :  { %v948_v15 = vadd.f32 %v6956_v56, %v784_v29  ;;  %v1023_v56 = vmax.f32 %v4752_v11, 0.0  ;;  %v5249_v11 = vadd.s32 168, %v4846_v17  ;;  %vm1288_vm8 = vmand %vm1188_vm7, %vm1239_vm10  ;;  %vm1240_vm7 = vcmp.lt.s32.totalorder %v4917_v57, %v5079_v59 }
 0x2ca   :  { %v3707_v45 = vsel %vm1288_vm8, 1.0, %v6954_v43  ;;  %vm1199_vm15 = vcmp.ge.s32.totalorder %v5324_v0, %v4854_v13 }
 0x2cb   :  { %vm1202_vm12 = vcmp.ge.s32.totalorder %v5249_v11, %v4854_v13 }
 0x2cc   :  { %v5219_v18 = vpop.xlane.xlu1 %1552 }
 0x2ce   :  { %2673 = vmatmul.f32.gmra.mxu3 %v1021_v22  ;;  %3903 = vmatmul.msk.f32.gmra.mxu2 %vm1526_vm1, %v3703_v3  ;;  %v1022_v22 = vmax.f32 %v948_v15, 0.0  ;;  %v3772_v3 = vsel %vm1204_vm13, 1.0, %v6954_v43 }
 0x2cf   :  { %v1596_v29 = vsel %vm1526_vm1, %v3772_v3, 0.0  ;;  %v5233_v15 = vpop.f32.mrf.mxu3 }
 0x2d0   :  { %1597 = vadd.xlane.f32.xlu2 %v1596_v29  ;;  %6958 = vst [vmem:[#allocation16_spill] sm:$0xff] %v5233_v15  ;;  %v3706_v29 = vsel %vm1287_vm14, 1.0, %v6954_v43  ;;  %vm1289_vm14 = vmand %vm1189_vm6, %vm1240_vm7  ;;  %vm1241_vm6 = vcmp.lt.s32.totalorder %v4904_v10, %v5079_v59  ;;  %v5356_v15 = vadd.s32 136, %v4846_v17 }
 0x2d1   :  { %v3708_v51 = vsel %vm1289_vm14, 1.0, %v6954_v43  ;;  %vm1290_vm7 = vmand %vm1190_vm5, %vm1241_vm6  ;;  %vm1242_vm5 = vcmp.lt.s32.totalorder %v4891_v39, %v5079_v59 }
 0x2d2   :  { %vm1291_vm6 = vmand %vm1191_vm4, %vm1242_vm5  ;;  %vm1198_vm0 = vcmp.ge.s32.totalorder %v5356_v15, %v4854_v13  ;;  %vm1243_vm4 = vcmp.lt.s32.totalorder %v4878_v40, %v5079_v59 }
 0x2d3   :  { %v3710_v24 = vsel %vm1291_vm6, 1.0, %v6954_v43  ;;  %vm1292_vm5 = vmand %vm1192_vm3, %vm1243_vm4  ;;  %vm1244_vm3 = vcmp.lt.s32.totalorder %v5064_v61, %v5079_v59  ;;  %vm6965_vm4 = vcmp.ge.s32.totalorder %v5064_v61, %v4854_v13 }
 0x2d4   :  { %v5243_v3 = vpop.xlane.xlu1 %1549 }
 0x2d6   :  { %2676 = vmatmul.f32.gmra.mxu3 %v1022_v22  ;;  %3904 = vmatmul.msk.f32.gmra.mxu2 %vm1526_vm1, %v3704_v35  ;;  %v3771_v35 = vsel %vm1203_vm11, 1.0, %v6954_v43 }
 0x2d7   :  { %v1593_v22 = vsel %vm1526_vm1, %v3771_v35, 0.0  ;;  %v1024_v35 = vmax.f32 %v4757_v4, 0.0 }
 0x2d8   :  { %1594 = vadd.xlane.f32.xlu2 %v1593_v22  ;;  %v5262_v22 = vpop.f32.mrf.mxu3 }
 0x2d9   :  { %6959 = vst [vmem:[#allocation18_spill] sm:$0xff] %v5262_v22  ;;  %v5294_v22 = vadd.s32 152, %v4846_v17 }
 0x2db   :  { %vm1200_vm8 = vcmp.ge.s32.totalorder %v5294_v22, %v4854_v13 }
 0x2dc   :  { %v5268_v4 = vpop.xlane.xlu1 %1546 }
 0x2de   :  { %2679 = vmatmul.f32.gmra.mxu3 %v1023_v56  ;;  %3905 = vmatmul.msk.f32.gmra.mxu2 %vm1526_vm1, %v3705_v30  ;;  %v3770_v30 = vsel %vm1202_vm12, 1.0, %v6954_v43 }
 0x2df   :  { %v1590_v56 = vsel %vm1526_vm1, %v3770_v30, 0.0  ;;  %v1025_v30 = vmax.f32 %v4761_v1, 0.0  ;;  %v5291_v1 = vadd.s32 120, %v4846_v17 }
 0x2e0   :  { %1591 = vadd.xlane.f32.xlu2 %v1590_v56  ;;  %v5288_v56 = vpop.f32.mrf.mxu3 }
 0x2e1   :  { %6960 = vst [vmem:[#allocation19_spill] sm:$0xff] %v5288_v56  ;;  %vm1196_vm10 = vcmp.ge.s32.totalorder %v5291_v1, %v4854_v13 }
 0x2e4   :  { %v5297_v38 = vpop.xlane.xlu1 %1543 }
 0x2e6   :  { %2682 = vmatmul.f32.gmra.mxu3 %v1024_v35  ;;  %3906 = vmatmul.msk.f32.gmra.mxu2 %vm1526_vm1, %v3706_v29  ;;  %v3769_v29 = vsel %vm1201_vm9, 1.0, %v6954_v43 }
 0x2e7   :  { %v1587_v35 = vsel %vm1526_vm1, %v3769_v29, 0.0  ;;  %v3768_v29 = vsel %vm1200_vm8, 1.0, %v6954_v43 }
 0x2e8   :  { %1588 = vadd.xlane.f32.xlu2 %v1587_v35  ;;  %v1584_v56 = vsel %vm1526_vm1, %v3768_v29, 0.0  ;;  %v5326_v54 = vpop.f32.mrf.mxu3 }
 0x2e9   :  { %6961 = vst [vmem:[#allocation21_spill] sm:$0xff] %v5326_v54 }
 0x2ec   :  { %v5344_v29 = vpop.xlane.xlu1 %1540 }
 0x2ee   :  { %2685 = vmatmul.f32.gmra.mxu3 %v1025_v30  ;;  %3907 = vmatmul.msk.f32.gmra.mxu2 %vm1526_vm1, %v3707_v45  ;;  %v1026_v45 = vmax.f32 %v4765_v48, 0.0  ;;  %v3764_v30 = vsel %vm1196_vm10, 1.0, %v6954_v43  ;;  %v5321_v48 = vadd.s32 112, %v4846_v17 }
 0x2ef   :  { %v1572_v35 = vsel %vm1526_vm1, %v3764_v30, 0.0  ;;  %v3709_v30 = vsel %vm1290_vm7, 1.0, %v6954_v43 }
 0x2f0   :  { %1573 = vadd.xlane.f32.xlu0 %v1572_v35  ;;  %1585 = vadd.xlane.f32.xlu2 %v1584_v56  ;;  %vm1195_vm14 = vcmp.ge.s32.totalorder %v5321_v48, %v4854_v13 }
 0x2f1   :  { %v3763_v56 = vsel %vm1195_vm14, 1.0, %v6954_v43 }
 0x2f2   :  { %v1569_v35 = vsel %vm1526_vm1, %v3763_v56, 0.0  ;;  %v3766_v56 = vsel %vm1198_vm0, 1.0, %v6954_v43 }
 0x2f6   :  { %2688 = vmatmul.f32.gmra.mxu3 %v1026_v45  ;;  %3908 = vmatmul.msk.f32.gmra.mxu2 %vm1526_vm1, %v3708_v51  ;;  %v1027_v51 = vmax.f32 %v4775_v5, 0.0  ;;  %v3767_v45 = vsel %vm1199_vm15, 1.0, %v6954_v43  ;;  %v5353_v5 = vadd.s32 232, %v4846_v17 }
 0x2f7   :  { %v1581_v54 = vsel %vm1526_vm1, %v3767_v45, 0.0 }
 0x2f8   :  { %1570 = vadd.xlane.f32.xlu0 %v1569_v35  ;;  %1582 = vadd.xlane.f32.xlu2 %v1581_v54  ;;  %vm6812_vm7 = vcmp.ge.s32.totalorder %v5353_v5, %v4854_v13  ;;  %v1028_v54 = vmax.f32 %v4791_v36, 0.0  ;;  %v1578_v35 = vsel %vm1526_vm1, %v3766_v56, 0.0  ;;  %v5379_v36 = vpop.xlane.xlu1 %1537 }
 0x2fe   :  { %2691 = vmatmul.f32.gmra.mxu3 %v1027_v51  ;;  %3909 = vmatmul.msk.f32.gmra.mxu2 %vm1526_vm1, %v3709_v30  ;;  %v5364_v30 = vpop.f32.mrf.mxu3  ;;  %v3778_v51 = vsel %vm6812_vm7, 1.0, %v6954_v43  ;;  %vm6816_vm7 = vcmp.ge.s32.totalorder %v5388_v7, %v4854_v13 }
 0x2ff   :  { %6962 = vst [vmem:[#allocation20_spill] sm:$0xff] %v5364_v30  ;;  %v1614_v45 = vsel %vm1526_vm1, %v3778_v51, 0.0  ;;  %v5385_v30 = vadd.s32 376, %v4846_v17  ;;  %v3711_v51 = vsel %vm1292_vm5, 1.0, %v6954_v43  ;;  %v3784_v56 = vsel %vm6816_vm7, 1.0, %v6954_v43  ;;  %vm1293_vm5 = vmand %vm6965_vm4, %vm1244_vm3 }
 0x300   :  { %1615 = vadd.xlane.f32.xlu0 %v1614_v45  ;;  %1579 = vadd.xlane.f32.xlu2 %v1578_v35  ;;  %v1632_v35 = vsel %vm1526_vm1, %v3784_v56, 0.0  ;;  %vm1245_vm3 = vcmp.lt.s32.totalorder %v4867_v42, %v5079_v59  ;;  %vm6968_vm4 = vcmp.ge.s32.totalorder %v4867_v42, %v4854_v13 }
 0x301   :  { %6963 = vst [vmem:[#allocation22_spill] sm:$0xff] %v5385_v30  ;;  %vm6815_vm6 = vcmp.ge.s32.totalorder %v5385_v30, %v4854_v13  ;;  %v5416_v30 = vpop.xlane.xlu2 %1618 }
 0x302   :  { %6966 = vst [vmem:[#allocation25_spill] sm:$0xff] %v5416_v30  ;;  %v5452_v30 = vadd.s32 360, %v4846_v17 }
 0x304   :  { %6970 = vst [vmem:[#allocation27_spill] sm:$0xff] %v5452_v30 }
 0x306   :  { %2694 = vmatmul.f32.gmra.mxu3 %v1028_v54  ;;  %3910 = vmatmul.msk.f32.gmra.mxu2 %vm1526_vm1, %v3710_v24  ;;  %v1029_v24 = vmax.f32 %v4807_v52, 0.0  ;;  %v3796_v54 = vsel %vm6815_vm6, 1.0, %v6954_v43  ;;  %v5408_v53 = vpop.f32.mrf.mxu3  ;;  %v5414_v52 = vpop.xlane.xlu1 %1534  ;;  %vm6819_vm6 = vcmp.ge.s32.totalorder %v5419_v8, %v4854_v13  ;;  %v5449_v8 = vadd.s32 128, %v4846_v17 }
 0x307   :  { %v1668_v45 = vsel %vm1526_vm1, %v3796_v54, 0.0  ;;  %6964 = vst [vmem:[#allocation23_spill] sm:$0xff] %v5408_v53  ;;  %v5422_v54 = vadd.s32 256, %v4846_v17  ;;  %v3795_v56 = vsel %vm6819_vm6, 1.0, %v6954_v43  ;;  %vm6822_vm6 = vcmp.ge.s32.totalorder %v5452_v30, %v4854_v13 }
 0x308   :  { %1669 = vadd.xlane.f32.xlu0 %v1668_v45  ;;  %1633 = vadd.xlane.f32.xlu2 %v1632_v35  ;;  %v1665_v35 = vsel %vm1526_vm1, %v3795_v56, 0.0  ;;  %v5479_v30 = vadd.s32 352, %v4846_v17 }
 0x309   :  { %vm1213_vm7 = vcmp.ge.s32.totalorder %v5422_v54, %v4854_v13  ;;  %v5454_v56 = vpop.xlane.xlu2 %1564 }
 0x30a   :  { %v3781_v45 = vsel %vm1213_vm7, 1.0, %v6954_v43  ;;  %6971 = vst [vmem:[#allocation29_spill] sm:$0xff] %v5479_v30 }
 0x30b   :  { %v1623_v53 = vsel %vm1526_vm1, %v3781_v45, 0.0 }
 0x30e   :  { %2697 = vmatmul.f32.gmra.mxu3 %v1029_v24  ;;  %3911 = vmatmul.msk.f32.gmra.mxu2 %vm1526_vm1, %v3711_v51  ;;  %v3712_v24 = vsel %vm1293_vm5, 1.0, %v6954_v43  ;;  %v1030_v51 = vmax.f32 %v4823_v37, 0.0  ;;  %vm1294_vm5 = vmand %vm6968_vm4, %vm1245_vm3  ;;  %v5446_v37 = vpop.f32.mrf.mxu3  ;;  %v1532_v45 = vpop.xlane.xlu1 %1531  ;;  %vm1197_vm3 = vcmp.ge.s32.totalorder %v5449_v8, %v4854_v13  ;;  %vm1246_vm4 = vcmp.lt.s32.totalorder %v5321_v48, %v5079_v59 }
 0x30f   :  { %6969 = vst [vmem:[#allocation26_spill] sm:$0xff] %v5446_v37  ;;  %v3765_v37 = vsel %vm1197_vm3, 1.0, %v6954_v43 }
 0x310   :  { %1666 = vadd.xlane.f32.xlu0 %v1665_v35  ;;  %1624 = vadd.xlane.f32.xlu2 %v1623_v53  ;;  %v1031_v53 = vmax.f32 %v4833_v31, 0.0  ;;  %v1575_v31 = vsel %vm1526_vm1, %v3765_v37, 0.0 }
 0x311   :  { %1576 = vadd.xlane.f32.xlu1 %v1575_v31 }
 0x316   :  { %2700 = vmatmul.f32.gmra.mxu3 %v1030_v51  ;;  %3912 = vmatmul.msk.f32.gmra.mxu2 %vm1526_vm1, %v3712_v24  ;;  %v3713_v51 = vsel %vm1294_vm5, 1.0, %v6954_v43  ;;  %v3794_v24 = vsel %vm6822_vm6, 1.0, %v6954_v43  ;;  %vm1295_vm5 = vmand %vm1195_vm14, %vm1246_vm4  ;;  %vm6827_vm6 = vcmp.ge.s32.totalorder %v5479_v30, %v4854_v13  ;;  %vm1247_vm14 = vcmp.lt.s32.totalorder %v5291_v1, %v5079_v59 }
 0x317   :  { %v1662_v35 = vsel %vm1526_vm1, %v3794_v24, 0.0  ;;  %v5481_v24 = vpop.f32.mrf.mxu3  ;;  %v3714_v21 = vsel %vm1295_vm5, 1.0, %v6954_v43  ;;  %v3793_v37 = vsel %vm6827_vm6, 1.0, %v6954_v43  ;;  %vm1296_vm4 = vmand %vm1196_vm10, %vm1247_vm14  ;;  %v1033_v30 = vmax.f32 %v4840_v32, 0.0 }
 0x318   :  { %1663 = vadd.xlane.f32.xlu0 %v1662_v35  ;;  %6972 = vst [vmem:[#allocation28_spill] sm:$0xff] %v5481_v24  ;;  %v1529_v35 = vpop.xlane.xlu1 %1528  ;;  %v1659_v31 = vsel %vm1526_vm1, %v3793_v37, 0.0  ;;  %v5501_v24 = vadd.s32 344, %v4846_v17  ;;  %vm1248_vm10 = vcmp.lt.s32.totalorder %v5449_v8, %v5079_v59 }
 0x319   :  { %vm1297_vm14 = vmand %vm1197_vm3, %vm1248_vm10  ;;  %vm1249_vm3 = vcmp.lt.s32.totalorder %v5356_v15, %v5079_v59 }
 0x31a   :  { %6974 = vst [vmem:[#allocation31_spill] sm:$0xff] %v5501_v24  ;;  %vm6830_vm5 = vcmp.ge.s32.totalorder %v5501_v24, %v4854_v13  ;;  %v5527_v24 = vcvt.s32.f32 %v4848_v26  ;;  %vm1298_vm10 = vmand %vm1198_vm0, %vm1249_vm3  ;;  %vm1250_vm0 = vcmp.lt.s32.totalorder %v5324_v0, %v5079_v59 }
 0x31e   :  { %2703 = vmatmul.f32.gmra.mxu3 %v1031_v53  ;;  %3913 = vmatmul.msk.f32.gmra.mxu2 %vm1526_vm1, %v3713_v51  ;;  %v1032_v51 = vmax.f32 %v4837_v60, 0.0  ;;  %v5487_v53 = vpop.xlane.xlu2 %1612  ;;  %v3798_v60 = vadd.f32 -1.0, %v1529_v35  ;;  %v3792_v35 = vsel %vm6830_vm5, 1.0, %v6954_v43 }
 0x31f   :  { %6973 = vst [vmem:[#allocation30_spill] sm:$0xff] %v5487_v53  ;;  %v3715_v53 = vsel %vm1296_vm4, 1.0, %v6954_v43  ;;  %v5507_v37 = vpop.f32.mrf.mxu3 }
 0x320   :  { %1660 = vadd.xlane.f32.xlu0 %v1659_v31  ;;  %6975 = vst [vmem:[#allocation32_spill] sm:$0xff] %v5507_v37  ;;  %v1656_v31 = vsel %vm1526_vm1, %v3792_v35, 0.0  ;;  %v3799_v37 = vadd.f32 -1.0, %v1532_v45  ;;  %v3716_v35 = vsel %vm1297_vm14, 1.0, %v6954_v43  ;;  %vm2404_vm14 = vcmask 400384  }
 0x326   :  { %2706 = vmatmul.f32.gmra.mxu3 %v1032_v51  ;;  %3914 = vmatmul.msk.f32.gmra.mxu2 %vm1526_vm1, %v3714_v21  ;;  %v1723_v21 = vcvt.s32.f32 %v4846_v17  ;;  %v1773_v51 = vmul.f32 49.0, %v3798_v60  ;;  %v5518_v2 = vpop.xlane.xlu2 %1609  ;;  %v5524_v60 = vadd.s32 336, %v4846_v17 }
 0x327   :  { %6976 = vst [vmem:[#allocation44_spill] sm:$0xff] %v5518_v2 }
 0x328   :  { %1657 = vadd.xlane.f32.xlu0 %v1656_v31  ;;  %v1822_v32 = vsub.f32 %v1723_v21, %v1773_v51  ;;  %vm6850_vm4 = vcmp.ge.s32.totalorder %v5524_v60, %v4854_v13  ;;  %v5541_v21 = vpop.f32.mrf.mxu3  ;;  %v1724_v51 = vcvt.s32.f32 %v5024_v14  ;;  %v1774_v31 = vmul.f32 49.0, %v3799_v37 }
 0x329   :  { %6977 = vst [vmem:[#allocation45_spill] sm:$0xff] %v5541_v21  ;;  %v3800_v14 = vadd.f32 -1.0, %v5414_v52 }
 0x32a   :  { %vm1871_vm6 = vcmp.eq.f32.partialorder %v5527_v24, %v1822_v32  ;;  %v1823_v37 = vsub.f32 %v1724_v51, %v1774_v31 }
 0x32b   :  { %v1775_v51 = vmul.f32 49.0, %v3800_v14 }
 0x32c   :  { %vm1872_vm3 = vcmp.eq.f32.partialorder %v5527_v24, %v1823_v37 }
 0x32d   :  { %v5576_v31 = vsel %vm1872_vm3, 1.0, %v6954_v43 }
 0x32e   :  { %2709 = vmatmul.f32.gmra.mxu3 %v1033_v30  ;;  %3915 = vmatmul.msk.f32.gmra.mxu2 %vm1526_vm1, %v3715_v53  ;;  %v1034_v30 = vmax.f32 %v4857_v6, 0.0  ;;  %v3791_v53 = vsel %vm6850_vm4, 1.0, %v6954_v43  ;;  %v5546_v6 = vsel %vm1871_vm6, 1.0, %v6954_v43  ;;  %v5551_v32 = vpop.xlane.xlu2 %1606  ;;  %6979 = vst [vmem:[#allocation47_spill] sm:$0xff] %v5576_v31  ;;  %vm1259_vm4 = vcmp.lt.s32.totalorder %v5106_v19, %v5079_v59 }
 0x32f   :  { %v1653_v45 = vsel %vm1526_vm1, %v3791_v53, 0.0  ;;  %6978 = vst [vmem:[#allocation46_spill] sm:$0xff] %v5546_v6  ;;  %v5554_v53 = vadd.s32 328, %v4846_v17 }
 0x330   :  { %1654 = vadd.xlane.f32.xlu0 %v1653_v45 }
 0x331   :  { %vm1222_vm6 = vcmp.ge.s32.totalorder %v5554_v53, %v4854_v13 }
 0x332   :  { %v3790_v21 = vsel %vm1222_vm6, 1.0, %v6954_v43 }
 0x333   :  { %v1650_v52 = vsel %vm1526_vm1, %v3790_v21, 0.0  ;;  %v3801_v21 = vadd.f32 -1.0, %v5379_v36 }
 0x336   :  { %2712 = vmatmul.f32.gmra.mxu3 %v1034_v30  ;;  %3916 = vmatmul.msk.f32.gmra.mxu2 %vm1526_vm1, %v3716_v35  ;;  %v3717_v30 = vsel %vm1298_vm10, 1.0, %v6954_v43  ;;  %vm1299_vm10 = vmand %vm1199_vm15, %vm1250_vm0  ;;  %vm1251_vm15 = vcmp.lt.s32.totalorder %v5294_v22, %v5079_v59 }
 0x337   :  { %v3718_v37 = vsel %vm1299_vm10, 1.0, %v6954_v43  ;;  %vm1300_vm3 = vmand %vm1200_vm8, %vm1251_vm15  ;;  %vm1252_vm8 = vcmp.lt.s32.totalorder %v5271_v16, %v5079_v59 }
 0x338   :  { %1651 = vadd.xlane.f32.xlu0 %v1650_v52 }
 0x339   :  { %v2208_v26 = vpop.f32.mrf.mxu2 }
 0x33a   :  { %v2355_v35 = vmul.f32 %v5546_v6, %v2208_v26  ;;  %v1725_v26 = vcvt.s32.f32 %v5007_v50 }
 0x33c   :  { %v2405_v45 = vsel %vm2404_vm14, %v2355_v35, 0.0  ;;  %v1824_v50 = vsub.f32 %v1725_v26, %v1775_v51  ;;  %v1726_v26 = vcvt.s32.f32 %v4992_v47  ;;  %v1776_v51 = vmul.f32 49.0, %v3801_v21 }
 0x33d   :  { %2406 = vadd.xlane.f32.xlu2 %v2405_v45  ;;  %v5579_v45 = vadd.s32 320, %v4846_v17 }
 0x33e   :  { %3917 = vmatmul.msk.f32.gmra.mxu2 %vm1526_vm1, %v3717_v30  ;;  %v5583_v30 = vpop.xlane.xlu2 %1603  ;;  %vm1873_vm0 = vcmp.eq.f32.partialorder %v5527_v24, %v1824_v50  ;;  %v1825_v47 = vsub.f32 %v1726_v26, %v1776_v51  ;;  %v1727_v26 = vcvt.s32.f32 %v4975_v44 }
 0x33f   :  { %vm1221_vm5 = vcmp.ge.s32.totalorder %v5579_v45, %v4854_v13 }
 0x340   :  { %v3789_v6 = vsel %vm1221_vm5, 1.0, %v6954_v43  ;;  %vm1874_vm15 = vcmp.eq.f32.partialorder %v5527_v24, %v1825_v47 }
 0x341   :  { %v2211_v35 = vpop.f32.mrf.mxu2  ;;  %v1647_v36 = vsel %vm1526_vm1, %v3789_v6, 0.0  ;;  %v3802_v6 = vadd.f32 -1.0, %v5344_v29 }
 0x342   :  { %v2356_v14 = vmul.f32 %v5576_v31, %v2211_v35  ;;  %1648 = vadd.xlane.f32.xlu0 %v1647_v36  ;;  %v5603_v35 = vsel %vm1873_vm0, 1.0, %v6954_v43  ;;  %vm1301_vm0 = vmand %vm1201_vm9, %vm1252_vm8  ;;  %vm1253_vm9 = vcmp.lt.s32.totalorder %v5249_v11, %v5079_v59 }
 0x343   :  { %6980 = vst [vmem:[#allocation48_spill] sm:$0xff] %v5603_v35  ;;  %v1777_v51 = vmul.f32 49.0, %v3802_v6 }
 0x344   :  { %v2408_v52 = vsel %vm2404_vm14, %v2356_v14, 0.0 }
 0x345   :  { %2409 = vadd.xlane.f32.xlu2 %v2408_v52  ;;  %v5606_v52 = vadd.s32 312, %v4846_v17  ;;  %v1826_v44 = vsub.f32 %v1727_v26, %v1777_v51  ;;  %v1728_v26 = vcvt.s32.f32 %v4957_v34  ;;  %v3804_v34 = vadd.f32 -1.0, %v5268_v4 }
 0x346   :  { %3918 = vmatmul.msk.f32.gmra.mxu2 %vm1526_vm1, %v3718_v37  ;;  %v3719_v37 = vsel %vm1300_vm3, 1.0, %v6954_v43  ;;  %v5614_v36 = vpop.xlane.xlu2 %1600 }
 0x347   :  { %vm1220_vm10 = vcmp.ge.s32.totalorder %v5606_v52, %v4854_v13  ;;  %vm1875_vm8 = vcmp.eq.f32.partialorder %v5527_v24, %v1826_v44 }
 0x348   :  { %v3788_v31 = vsel %vm1220_vm10, 1.0, %v6954_v43 }
 0x349   :  { %v2214_v14 = vpop.f32.mrf.mxu2  ;;  %v1644_v29 = vsel %vm1526_vm1, %v3788_v31, 0.0  ;;  %v3803_v31 = vadd.f32 -1.0, %v5297_v38 }
 0x34a   :  { %v2357_v21 = vmul.f32 %v5603_v35, %v2214_v14  ;;  %1645 = vadd.xlane.f32.xlu0 %v1644_v29  ;;  %v5630_v14 = vsel %vm1874_vm15, 1.0, %v6954_v43  ;;  %vm1302_vm15 = vmand %vm1202_vm12, %vm1253_vm9  ;;  %vm1254_vm12 = vcmp.lt.s32.totalorder %v5227_v58, %v5079_v59 }
 0x34b   :  { %6981 = vst [vmem:[#allocation49_spill] sm:$0xff] %v5630_v14  ;;  %v1778_v51 = vmul.f32 49.0, %v3803_v31  ;;  %v3721_v44 = vsel %vm1302_vm15, 1.0, %v6954_v43 }
 0x34c   :  { %v2411_v50 = vsel %vm2404_vm14, %v2357_v21, 0.0 }
 0x34d   :  { %2412 = vadd.xlane.f32.xlu2 %v2411_v50  ;;  %v5633_v50 = vadd.s32 304, %v4846_v17  ;;  %v1827_v31 = vsub.f32 %v1728_v26, %v1778_v51  ;;  %v1729_v26 = vcvt.s32.f32 %v4941_v46  ;;  %v1779_v51 = vmul.f32 49.0, %v3804_v34 }
 0x34e   :  { %3919 = vmatmul.msk.f32.gmra.mxu2 %vm1526_vm1, %v3719_v37  ;;  %v3720_v37 = vsel %vm1301_vm0, 1.0, %v6954_v43  ;;  %v3805_v46 = vadd.f32 -1.0, %v5243_v3 }
 0x34f   :  { %vm1219_vm3 = vcmp.ge.s32.totalorder %v5633_v50, %v4854_v13  ;;  %vm1876_vm9 = vcmp.eq.f32.partialorder %v5527_v24, %v1827_v31  ;;  %v1828_v34 = vsub.f32 %v1729_v26, %v1779_v51  ;;  %v1730_v26 = vcvt.s32.f32 %v4928_v9 }
 0x350   :  { %v3787_v29 = vsel %vm1219_vm3, 1.0, %v6954_v43  ;;  %v1780_v51 = vmul.f32 49.0, %v3805_v46 }
 0x351   :  { %v2217_v21 = vpop.f32.mrf.mxu2  ;;  %v1641_v38 = vsel %vm1526_vm1, %v3787_v29, 0.0  ;;  %v5660_v29 = vadd.s32 296, %v4846_v17 }
 0x352   :  { %v2358_v6 = vmul.f32 %v5630_v14, %v2217_v21  ;;  %v5651_v21 = vpop.xlane.xlu2 %1597  ;;  %1642 = vadd.xlane.f32.xlu0 %v1641_v38  ;;  %v1829_v9 = vsub.f32 %v1730_v26, %v1780_v51  ;;  %v1731_v26 = vcvt.s32.f32 %v4917_v57 }
 0x353   :  { %vm1218_vm0 = vcmp.ge.s32.totalorder %v5660_v29, %v4854_v13 }
 0x354   :  { %v2414_v47 = vsel %vm2404_vm14, %v2358_v6, 0.0  ;;  %v5657_v6 = vsel %vm1875_vm8, 1.0, %v6954_v43  ;;  %v3786_v35 = vsel %vm1218_vm0, 1.0, %v6954_v43  ;;  %vm1303_vm8 = vmand %vm1203_vm11, %vm1254_vm12  ;;  %vm1255_vm11 = vcmp.lt.s32.totalorder %v5206_v12, %v5079_v59 }
 0x355   :  { %2415 = vadd.xlane.f32.xlu2 %v2414_v47  ;;  %6982 = vst [vmem:[#allocation50_spill] sm:$0xff] %v5657_v6  ;;  %v1638_v4 = vsel %vm1526_vm1, %v3786_v35, 0.0  ;;  %v5687_v35 = vadd.s32 288, %v4846_v17  ;;  %v3722_v31 = vsel %vm1303_vm8, 1.0, %v6954_v43  ;;  %vm1877_vm12 = vcmp.eq.f32.partialorder %v5527_v24, %v1828_v34 }
 0x356   :  { %3920 = vmatmul.msk.f32.gmra.mxu2 %vm1526_vm1, %v3720_v37  ;;  %vm1256_vm8 = vcmp.lt.s32.totalorder %v5184_v28, %v5079_v59 }
 0x357   :  { %vm1217_vm15 = vcmp.ge.s32.totalorder %v5687_v35, %v4854_v13 }
 0x358   :  { %v3785_v14 = vsel %vm1217_vm15, 1.0, %v6954_v43 }
 0x359   :  { %v2220_v47 = vpop.f32.mrf.mxu2  ;;  %v1635_v3 = vsel %vm1526_vm1, %v3785_v14, 0.0  ;;  %v3806_v14 = vadd.f32 -1.0, %v5219_v18 }
 0x35a   :  { %v2359_v37 = vmul.f32 %v5657_v6, %v2220_v47  ;;  %1639 = vadd.xlane.f32.xlu0 %v1638_v4  ;;  %v5681_v47 = vpop.xlane.xlu2 %1594 }
 0x35b   :  { %v1781_v51 = vmul.f32 49.0, %v3806_v14 }
 0x35c   :  { %v2417_v38 = vsel %vm2404_vm14, %v2359_v37, 0.0  ;;  %v5684_v37 = vsel %vm1876_vm9, 1.0, %v6954_v43  ;;  %vm1304_vm9 = vmand %vm1204_vm13, %vm1255_vm11  ;;  %vm1878_vm11 = vcmp.eq.f32.partialorder %v5527_v24, %v1829_v9 }
 0x35d   :  { %2418 = vadd.xlane.f32.xlu2 %v2417_v38  ;;  %6983 = vst [vmem:[#allocation51_spill] sm:$0xff] %v5684_v37  ;;  %v1830_v57 = vsub.f32 %v1731_v26, %v1781_v51  ;;  %v1732_v26 = vcvt.s32.f32 %v4904_v10 }
 0x35e   :  { %3921 = vmatmul.msk.f32.gmra.mxu2 %vm1526_vm1, %v3721_v44 }
 0x361   :  { %v2223_v38 = vpop.f32.mrf.mxu2 }
 0x362   :  { %v2360_v44 = vmul.f32 %v5684_v37, %v2223_v38  ;;  %1636 = vadd.xlane.f32.xlu0 %v1635_v3  ;;  %v5709_v38 = vsel %vm1877_vm12, 1.0, %v6954_v43  ;;  %v3723_v3 = vsel %vm1304_vm9, 1.0, %v6954_v43  ;;  %vm1305_vm12 = vmand %vm1205_vm2, %vm1256_vm8  ;;  %vm1257_vm2 = vcmp.lt.s32.totalorder %v5158_v62, %v5079_v59 }
 0x363   :  { %6984 = vst [vmem:[#allocation52_spill] sm:$0xff] %v5709_v38  ;;  %v5718_v34 = vpop.xlane.xlu0 %1573  ;;  %v3724_v9 = vsel %vm1305_vm12, 1.0, %v6954_v43  ;;  %vm1879_vm8 = vcmp.eq.f32.partialorder %v5527_v24, %v1830_v57 }
 0x364   :  { %v2420_v4 = vsel %vm2404_vm14, %v2360_v44, 0.0 }
 0x365   :  { %2421 = vadd.xlane.f32.xlu2 %v2420_v4  ;;  %v5712_v4 = vadd.s32 272, %v4846_v17 }
 0x366   :  { %3922 = vmatmul.msk.f32.gmra.mxu2 %vm1526_vm1, %v3722_v31  ;;  %v5716_v31 = vpop.xlane.xlu2 %1591 }
 0x367   :  { %vm1215_vm13 = vcmp.ge.s32.totalorder %v5712_v4, %v4854_v13 }
 0x368   :  { %v3783_v37 = vsel %vm1215_vm13, 1.0, %v6954_v43 }
 0x369   :  { %v2226_v44 = vpop.f32.mrf.mxu2  ;;  %v1629_v18 = vsel %vm1526_vm1, %v3783_v37, 0.0  ;;  %v3807_v37 = vadd.f32 -1.0, %v5188_v33 }
 0x36a   :  { %v2361_v46 = vmul.f32 %v5709_v38, %v2226_v44  ;;  %1630 = vadd.xlane.f32.xlu0 %v1629_v18  ;;  %v5738_v44 = vsel %vm1878_vm11, 1.0, %v6954_v43  ;;  %vm6986_vm11 = vcmp.ge.s32.totalorder %v5158_v62, %v4854_v13 }
 0x36b   :  { %6985 = vst [vmem:[#allocation53_spill] sm:$0xff] %v5738_v44  ;;  %v1782_v51 = vmul.f32 49.0, %v3807_v37  ;;  %vm1306_vm12 = vmand %vm6986_vm11, %vm1257_vm2  ;;  %vm1258_vm2 = vcmp.lt.s32.totalorder %v5132_v55, %v5079_v59  ;;  %vm6988_vm11 = vcmp.ge.s32.totalorder %v5132_v55, %v4854_v13 }
 0x36c   :  { %v2423_v6 = vsel %vm2404_vm14, %v2361_v46, 0.0  ;;  %v3725_v57 = vsel %vm1306_vm12, 1.0, %v6954_v43  ;;  %vm1307_vm12 = vmand %vm6988_vm11, %vm1258_vm2 }
 0x36d   :  { %2424 = vadd.xlane.f32.xlu2 %v2423_v6  ;;  %v5741_v6 = vadd.s32 384, %v4846_v17  ;;  %v1831_v10 = vsub.f32 %v1732_v26, %v1782_v51  ;;  %v1733_v26 = vcvt.s32.f32 %v4891_v39 }
 0x36e   :  { %3923 = vmatmul.msk.f32.gmra.mxu2 %vm1526_vm1, %v3723_v3  ;;  %v5745_v3 = vpop.xlane.xlu0 %1570  ;;  %v5751_v38 = vpop.xlane.xlu2 %1588 }
 0x36f   :  { %vm6845_vm9 = vcmp.ge.s32.totalorder %v5741_v6, %v4854_v13 }
 0x370   :  { %v3797_v2 = vsel %vm6845_vm9, 1.0, %v6954_v43 }
 0x371   :  { %v2229_v46 = vpop.f32.mrf.mxu2  ;;  %v1671_v33 = vsel %vm1526_vm1, %v3797_v2, 0.0  ;;  %v3808_v2 = vadd.f32 -1.0, %v5161_v27 }
 0x372   :  { %v2362_v14 = vmul.f32 %v5738_v44, %v2229_v46  ;;  %1672 = vadd.xlane.f32.xlu0 %v1671_v33  ;;  %v5767_v46 = vsel %vm1879_vm8, 1.0, %v6954_v43  ;;  %vm1880_vm8 = vcmp.eq.f32.partialorder %v5527_v24, %v1831_v10 }
 0x373   :  { %6987 = vst [vmem:[#allocation54_spill] sm:$0xff] %v5767_v46  ;;  %v1783_v51 = vmul.f32 49.0, %v3808_v2  ;;  %v3726_v2 = vsel %vm1307_vm12, 1.0, %v6954_v43  ;;  %vm1260_vm12 = vcmp.lt.s32.totalorder %v5082_v41, %v5079_v59 }
 0x374   :  { %v2426_v18 = vsel %vm2404_vm14, %v2362_v14, 0.0 }
 0x375   :  { %2427 = vadd.xlane.f32.xlu2 %v2426_v18  ;;  %v5770_v18 = vadd.s32 264, %v4846_v17  ;;  %v1832_v44 = vsub.f32 %v1733_v26, %v1783_v51 }
 0x376   :  { %3924 = vmatmul.msk.f32.gmra.mxu2 %vm1526_vm1, %v3724_v9  ;;  %v5774_v9 = vpop.xlane.xlu0 %1615 }
 0x377   :  { %vm1214_vm9 = vcmp.ge.s32.totalorder %v5770_v18, %v4854_v13  ;;  %vm1881_vm2 = vcmp.eq.f32.partialorder %v5527_v24, %v1832_v44  ;;  %v1735_v44 = vcvt.s32.f32 %v5064_v61 }
 0x378   :  { %v3782_v17 = vsel %vm1214_vm9, 1.0, %v6954_v43  ;;  %v5815_v26 = vsel %vm1881_vm2, 1.0, %v6954_v43  ;;  %vm6994_vm2 = vcmp.ge.s32.totalorder %v5082_v41, %v4854_v13 }
 0x379   :  { %v2232_v14 = vpop.f32.mrf.mxu2  ;;  %v1626_v27 = vsel %vm1526_vm1, %v3782_v17, 0.0  ;;  %v3809_v17 = vadd.f32 -1.0, %v5135_v63  ;;  %6992 = vst [vmem:[#allocation57_spill] sm:$0xff] %v5815_v26 }
 0x37a   :  { %v2363_v37 = vmul.f32 %v5767_v46, %v2232_v14  ;;  %v5790_v14 = vpop.xlane.xlu2 %1585  ;;  %1627 = vadd.xlane.f32.xlu1 %v1626_v27  ;;  %v1734_v27 = vcvt.s32.f32 %v4878_v40 }
 0x37b   :  { %v1784_v46 = vmul.f32 49.0, %v3809_v17 }
 0x37c   :  { %v2429_v33 = vsel %vm2404_vm14, %v2363_v37, 0.0  ;;  %v5796_v37 = vsel %vm1880_vm8, 1.0, %v6954_v43  ;;  %vm6991_vm8 = vcmp.ge.s32.totalorder %v5106_v19, %v4854_v13 }
 0x37d   :  { %2430 = vadd.xlane.f32.xlu2 %v2429_v33  ;;  %6989 = vst [vmem:[#allocation55_spill] sm:$0xff] %v5796_v37  ;;  %vm1308_vm11 = vmand %vm6991_vm8, %vm1259_vm4 }
 0x37e   :  { %3925 = vmatmul.msk.f32.gmra.mxu2 %vm1526_vm1, %v3725_v57  ;;  %v5802_v57 = vpop.xlane.xlu0 %1669  ;;  %v3727_v17 = vsel %vm1308_vm11, 1.0, %v6954_v43  ;;  %vm1309_vm8 = vmand %vm6994_vm2, %vm1260_vm12  ;;  %vm1261_vm11 = vcmp.lt.s32.totalorder %v5353_v5, %v5079_v59 }
 0x37f   :  { %6990 = vst [vmem:[#allocation56_spill] sm:$0xff] %v5802_v57 }
 0x381   :  { %v2235_v33 = vpop.f32.mrf.mxu2 }
 0x382   :  { %v2364_v39 = vmul.f32 %v5796_v37, %v2235_v33  ;;  %v5812_v63 = vpop.xlane.xlu2 %1582  ;;  %v1833_v33 = vsub.f32 %v1734_v27, %v1784_v46 }
 0x384   :  { %v2432_v10 = vsel %vm2404_vm14, %v2364_v39, 0.0  ;;  %v3810_v39 = vadd.f32 -1.0, %v5454_v56  ;;  %vm1882_vm4 = vcmp.eq.f32.partialorder %v5527_v24, %v1833_v33 }
 0x385   :  { %2433 = vadd.xlane.f32.xlu2 %v2432_v10  ;;  %v5832_v56 = vsel %vm1882_vm4, 1.0, %v6954_v43  ;;  %vm6996_vm4 = vcmp.ge.s32.totalorder %v5353_v5, %v4854_v13 }
 0x386   :  { %3926 = vmatmul.msk.f32.gmra.mxu2 %vm1526_vm1, %v3726_v2  ;;  %v1785_v10 = vmul.f32 49.0, %v3810_v39  ;;  %v5826_v46 = vpop.xlane.xlu0 %1666  ;;  %6995 = vst [vmem:[#allocation59_spill] sm:$0xff] %v5832_v56  ;;  %vm1310_vm2 = vmand %vm6996_vm4, %vm1261_vm11 }
 0x387   :  { %6993 = vst [vmem:[#allocation58_spill] sm:$0xff] %v5826_v46 }
 0x389   :  { %v2238_v51 = vpop.f32.mrf.mxu2 }
 0x38a   :  { %v2365_v40 = vmul.f32 %v5815_v26, %v2238_v51  ;;  %v3811_v51 = vadd.f32 -1.0, %v5109_v20  ;;  %v1580_v39 = vpop.xlane.xlu2 %1579  ;;  %v3812_v20 = vadd.f32 -1.0, %v5745_v3  ;;  %v3813_v3 = vadd.f32 -1.0, %v5718_v34  ;;  %v1577_v34 = vpop.xlane.xlu1 %1576 }
 0x38c   :  { %v2435_v2 = vsel %vm2404_vm14, %v2365_v40, 0.0  ;;  %v1834_v40 = vsub.f32 %v1735_v44, %v1785_v10  ;;  %v1786_v37 = vmul.f32 49.0, %v3811_v51  ;;  %v3729_v51 = vsel %vm1310_vm2, 1.0, %v6954_v43 }
 0x38d   :  { %2436 = vadd.xlane.f32.xlu2 %v2435_v2  ;;  %v1736_v2 = vcvt.s32.f32 %v4867_v42 }
 0x38e   :  { %3927 = vmatmul.msk.f32.gmra.mxu2 %vm1526_vm1, %v3727_v17  ;;  %v3728_v17 = vsel %vm1309_vm8, 1.0, %v6954_v43  ;;  %vm1883_vm12 = vcmp.eq.f32.partialorder %v5527_v24, %v1834_v40  ;;  %v5847_v44 = vpop.xlane.xlu0 %1663  ;;  %v1787_v40 = vmul.f32 49.0, %v3812_v20  ;;  %vm1262_vm8 = vcmp.lt.s32.totalorder %v5040_v49, %v5079_v59 }
 0x38f   :  { %v5850_v10 = vsel %vm1883_vm12, 1.0, %v6954_v43  ;;  %vm6998_vm12 = vcmp.ge.s32.totalorder %v5040_v49, %v4854_v13 }
 0x390   :  { %6997 = vst [vmem:[#allocation60_spill] sm:$0xff] %v5850_v10  ;;  %vm1311_vm4 = vmand %vm6998_vm12, %vm1262_vm8  ;;  %vm1263_vm8 = vcmp.lt.s32.totalorder %v4851_v25, %v5079_v59 }
 0x391   :  { %v2241_v27 = vpop.f32.mrf.mxu2 }
 0x392   :  { %v2366_v61 = vmul.f32 %v5832_v56, %v2241_v27  ;;  %v5856_v26 = vpop.xlane.xlu2 %1633 }
 0x394   :  { %v2438_v33 = vsel %vm2404_vm14, %v2366_v61, 0.0  ;;  %v1835_v61 = vsub.f32 %v1736_v2, %v1786_v37 }
 0x395   :  { %2439 = vadd.xlane.f32.xlu2 %v2438_v33 }
 0x396   :  { %3928 = vmatmul.msk.f32.gmra.mxu2 %vm1526_vm1, %v3728_v17  ;;  %v1737_v17 = vcvt.s32.f32 %v5321_v48  ;;  %vm1884_vm11 = vcmp.eq.f32.partialorder %v5527_v24, %v1835_v61  ;;  %v1788_v61 = vmul.f32 49.0, %v3813_v3  ;;  %v3814_v3 = vadd.f32 -1.0, %v1577_v34 }
 0x397   :  { %v5867_v37 = vsel %vm1884_vm11, 1.0, %v6954_v43  ;;  %vm7001_vm11 = vcmp.ge.s32.totalorder %v4851_v25, %v4854_v13 }
 0x398   :  { %v1836_v48 = vsub.f32 %v1737_v17, %v1787_v40  ;;  %6999 = vst [vmem:[#allocation61_spill] sm:$0xff] %v5867_v37  ;;  %vm1312_vm12 = vmand %vm7001_vm11, %vm1263_vm8  ;;  %v1789_v57 = vmul.f32 49.0, %v3814_v3 }
 0x399   :  { %v2244_v27 = vpop.f32.mrf.mxu2 }
 0x39a   :  { %v2367_v42 = vmul.f32 %v5850_v10, %v2244_v27  ;;  %v5870_v27 = vpop.xlane.xlu0 %1660  ;;  %vm1885_vm2 = vcmp.eq.f32.partialorder %v5527_v24, %v1836_v48  ;;  %v5879_v17 = vpop.xlane.xlu2 %1624 }
 0x39b   :  { %v5882_v40 = vsel %vm1885_vm2, 1.0, %v6954_v43  ;;  %vm1264_vm2 = vcmp.lt.s32.totalorder %v5422_v54, %v5079_v59 }
 0x39c   :  { %v2441_v33 = vsel %vm2404_vm14, %v2367_v42, 0.0  ;;  %v3730_v42 = vsel %vm1311_vm4, 1.0, %v6954_v43  ;;  %7000 = vst [vmem:[#allocation62_spill] sm:$0xff] %v5882_v40  ;;  %vm1313_vm8 = vmand %vm1213_vm7, %vm1264_vm2 }
 0x39d   :  { %2442 = vadd.xlane.f32.xlu0 %v2441_v33 }
 0x39e   :  { %3929 = vmatmul.msk.f32.gmra.mxu2 %vm1526_vm1, %v3729_v51  ;;  %v1738_v51 = vcvt.s32.f32 %v5291_v1 }
 0x3a0   :  { %v1837_v1 = vsub.f32 %v1738_v51, %v1788_v61 }
 0x3a1   :  { %v2247_v2 = vpop.f32.mrf.mxu2 }
 0x3a2   :  { %v2368_v20 = vmul.f32 %v5867_v37, %v2247_v2  ;;  %vm1886_vm4 = vcmp.eq.f32.partialorder %v5527_v24, %v1837_v1  ;;  %v5892_v56 = vpop.xlane.xlu0 %1657  ;;  %v3815_v1 = vadd.f32 -1.0, %v1580_v39 }
 0x3a3   :  { %v5898_v51 = vsel %vm1886_vm4, 1.0, %v6954_v43  ;;  %vm1266_vm4 = vcmp.lt.s32.totalorder %v5712_v4, %v5079_v59 }
 0x3a4   :  { %v2444_v33 = vsel %vm2404_vm14, %v2368_v20, 0.0  ;;  %v3731_v20 = vsel %vm1312_vm12, 1.0, %v6954_v43  ;;  %vm1265_vm12 = vcmp.lt.s32.totalorder %v5770_v18, %v5079_v59  ;;  %vm1315_vm2 = vmand %vm1215_vm13, %vm1266_vm4  ;;  %vm1267_vm13 = vcmp.lt.s32.totalorder %v5388_v7, %v5079_v59 }
 0x3a5   :  { %2445 = vadd.xlane.f32.xlu1 %v2444_v33  ;;  %vm1314_vm7 = vmand %vm1214_vm9, %vm1265_vm12 }
 0x3a6   :  { %3930 = vmatmul.msk.f32.gmra.mxu2 %vm1526_vm1, %v3730_v42  ;;  %v1739_v42 = vcvt.s32.f32 %v5449_v8 }
 0x3a8   :  { %v1838_v8 = vsub.f32 %v1739_v42, %v1789_v57 }
 0x3a9   :  { %v2250_v2 = vpop.f32.mrf.mxu2 }
 0x3aa   :  { %v2369_v48 = vmul.f32 %v5882_v40, %v2250_v2  ;;  %v3732_v2 = vsel %vm1313_vm8, 1.0, %v6954_v43  ;;  %vm1887_vm11 = vcmp.eq.f32.partialorder %v5527_v24, %v1838_v8  ;;  %v5913_v57 = vpop.xlane.xlu0 %1654  ;;  %v7022_v40 = vld [vmem:[#allocation43_spill] sm:$0xff] }
 0x3ab   :  { %v5916_v39 = vsel %vm1887_vm11, 1.0, %v6954_v43  ;;  %vm7005_vm11 = vcmp.ge.s32.totalorder %v5388_v7, %v4854_v13 }
 0x3ac   :  { %v2447_v33 = vsel %vm2404_vm14, %v2369_v48, 0.0  ;;  %7003 = vst [vmem:[#allocation64_spill] sm:$0xff] %v5916_v39  ;;  %vm1316_vm12 = vmand %vm7005_vm11, %vm1267_vm13 }
 0x3ad   :  { %2448 = vadd.xlane.f32.xlu2 %v2447_v33  ;;  %v1790_v33 = vmul.f32 49.0, %v3815_v1  ;;  %v3733_v1 = vsel %vm1314_vm7, 1.0, %v6954_v43  ;;  %vm1268_vm7 = vcmp.lt.s32.totalorder %v5687_v35, %v5079_v59 }
 0x3ae   :  { %3931 = vmatmul.msk.f32.gmra.mxu2 %vm1526_vm1, %v3731_v20  ;;  %v1740_v20 = vcvt.s32.f32 %v5356_v15 }
 0x3b0   :  { %v5903_v61 = vpop.xlane.xlu2 %2406 }
 0x3b1   :  { %7002 = vst [vmem:[#allocation63_spill] sm:$0xff] %v5903_v61  ;;  %v2253_v34 = vpop.f32.mrf.mxu2  ;;  %v3827_v61 = vadd.f32 -1.0, %v5774_v9 }
 0x3b2   :  { %v2370_v3 = vmul.f32 %v5898_v51, %v2253_v34  ;;  %v3816_v34 = vadd.f32 -1.0, %v5812_v63 }
 0x3b4   :  { %v2450_v48 = vsel %vm2404_vm14, %v2370_v3, 0.0  ;;  %v1839_v3 = vsub.f32 %v1740_v20, %v1790_v33  ;;  %v1791_v10 = vmul.f32 49.0, %v3816_v34  ;;  %v5937_v20 = vpop.xlane.xlu0 %1651 }
 0x3b5   :  { %2451 = vadd.xlane.f32.xlu1 %v2450_v48  ;;  %v1741_v48 = vcvt.s32.f32 %v5324_v0 }
 0x3b6   :  { %3932 = vmatmul.msk.f32.gmra.mxu2 %vm1526_vm1, %v3732_v2  ;;  %vm1888_vm9 = vcmp.eq.f32.partialorder %v5527_v24, %v1839_v3 }
 0x3b7   :  { %v5940_v33 = vsel %vm1888_vm9, 1.0, %v6954_v43  ;;  %v1840_v0 = vsub.f32 %v1741_v48, %v1791_v10  ;;  %vm1317_vm9 = vmand %vm1217_vm15, %vm1268_vm7  ;;  %vm1269_vm15 = vcmp.lt.s32.totalorder %v5660_v29, %v5079_v59 }
 0x3b8   :  { %v5921_v42 = vpop.xlane.xlu2 %2409  ;;  %7004 = vst [vmem:[#allocation65_spill] sm:$0xff] %v5940_v33  ;;  %vm1318_vm13 = vmand %vm1218_vm0, %vm1269_vm15  ;;  %vm1273_vm15 = vcmp.lt.s32.totalorder %v5554_v53, %v5079_v59 }
 0x3b9   :  { %v2256_v8 = vpop.f32.mrf.mxu2  ;;  %vm1889_vm8 = vcmp.eq.f32.partialorder %v5527_v24, %v1840_v0 }
 0x3ba   :  { %v2371_v15 = vmul.f32 %v5916_v39, %v2256_v8  ;;  %v5957_v10 = vsel %vm1889_vm8, 1.0, %v6954_v43  ;;  %vm1270_vm8 = vcmp.lt.s32.totalorder %v5633_v50, %v5079_v59 }
 0x3bb   :  { %7006 = vst [vmem:[#allocation66_spill] sm:$0xff] %v5957_v10  ;;  %vm1319_vm11 = vmand %vm1219_vm3, %vm1270_vm8 }
 0x3bc   :  { %v2453_v2 = vsel %vm2404_vm14, %v2371_v15, 0.0  ;;  %v3817_v15 = vadd.f32 -1.0, %v5790_v14 }
 0x3bd   :  { %2454 = vadd.xlane.f32.xlu2 %v2453_v2  ;;  %v1742_v2 = vcvt.s32.f32 %v5294_v22 }
 0x3be   :  { %3933 = vmatmul.msk.f32.gmra.mxu2 %vm1526_vm1, %v3733_v1  ;;  %v3734_v1 = vsel %vm1315_vm2, 1.0, %v6954_v43  ;;  %v1792_v39 = vmul.f32 49.0, %v3817_v15  ;;  %v5961_v15 = vpop.xlane.xlu0 %1648 }
 0x3c0   :  { %v5935_v63 = vpop.xlane.xlu2 %2412 }
 0x3c1   :  { %v2259_v8 = vpop.f32.mrf.mxu2 }
 0x3c2   :  { %v2372_v34 = vmul.f32 %v5940_v33, %v2259_v8  ;;  %v3818_v8 = vadd.f32 -1.0, %v5751_v38 }
 0x3c4   :  { %v2456_v3 = vsel %vm2404_vm14, %v2372_v34, 0.0  ;;  %v1841_v34 = vsub.f32 %v1742_v2, %v1792_v39  ;;  %v1793_v33 = vmul.f32 49.0, %v3818_v8  ;;  %v3736_v8 = vsel %vm1317_vm9, 1.0, %v6954_v43 }
 0x3c5   :  { %2457 = vadd.xlane.f32.xlu0 %v2456_v3  ;;  %v1743_v3 = vcvt.s32.f32 %v5271_v16 }
 0x3c6   :  { %3934 = vmatmul.msk.f32.gmra.mxu2 %vm1526_vm1, %v3734_v1  ;;  %v3735_v1 = vsel %vm1316_vm12, 1.0, %v6954_v43  ;;  %vm1890_vm4 = vcmp.eq.f32.partialorder %v5527_v24, %v1841_v34  ;;  %v5982_v34 = vpop.xlane.xlu0 %1645  ;;  %vm1271_vm12 = vcmp.lt.s32.totalorder %v5606_v52, %v5079_v59 }
 0x3c7   :  { %v5976_v39 = vsel %vm1890_vm4, 1.0, %v6954_v43  ;;  %vm1320_vm7 = vmand %vm1220_vm10, %vm1271_vm12  ;;  %vm1272_vm4 = vcmp.lt.s32.totalorder %v5579_v45, %v5079_v59 }
 0x3c8   :  { %v5954_v14 = vpop.xlane.xlu2 %2415  ;;  %7007 = vst [vmem:[#allocation67_spill] sm:$0xff] %v5976_v39  ;;  %vm1321_vm10 = vmand %vm1221_vm5, %vm1272_vm4 }
 0x3c9   :  { %v2262_v48 = vpop.f32.mrf.mxu2  ;;  %vm1322_vm5 = vmand %vm1222_vm6, %vm1273_vm15  ;;  %vm7013_vm6 = vcmp.ge.s32.totalorder %v5524_v60, %v4854_v13 }
 0x3ca   :  { %v2373_v22 = vmul.f32 %v5957_v10, %v2262_v48  ;;  %v3819_v48 = vadd.f32 -1.0, %v5716_v31 }
 0x3cc   :  { %v2459_v0 = vsel %vm2404_vm14, %v2373_v22, 0.0  ;;  %v1842_v22 = vsub.f32 %v1743_v3, %v1793_v33  ;;  %v1794_v10 = vmul.f32 49.0, %v3819_v48  ;;  %v3737_v48 = vsel %vm1318_vm13, 1.0, %v6954_v43 }
 0x3cd   :  { %2460 = vadd.xlane.f32.xlu0 %v2459_v0  ;;  %v1744_v0 = vcvt.s32.f32 %v5249_v11 }
 0x3ce   :  { %3935 = vmatmul.msk.f32.gmra.mxu2 %vm1526_vm1, %v3735_v1  ;;  %vm1891_vm2 = vcmp.eq.f32.partialorder %v5527_v24, %v1842_v22  ;;  %v1745_v22 = vcvt.s32.f32 %v5227_v58 }
 0x3cf   :  { %v5995_v33 = vsel %vm1891_vm2, 1.0, %v6954_v43  ;;  %vm1274_vm2 = vcmp.lt.s32.totalorder %v5524_v60, %v5079_v59 }
 0x3d0   :  { %v5973_v38 = vpop.xlane.xlu2 %2418  ;;  %7008 = vst [vmem:[#allocation68_spill] sm:$0xff] %v5995_v33  ;;  %vm1323_vm13 = vmand %vm7013_vm6, %vm1274_vm2 }
 0x3d1   :  { %v2265_v2 = vpop.f32.mrf.mxu2 }
 0x3d2   :  { %v2374_v16 = vmul.f32 %v5976_v39, %v2265_v2  ;;  %v3820_v2 = vadd.f32 -1.0, %v5681_v47  ;;  %v6006_v39 = vpop.xlane.xlu0 %1642 }
 0x3d4   :  { %v2462_v1 = vsel %vm2404_vm14, %v2374_v16, 0.0  ;;  %v1843_v16 = vsub.f32 %v1744_v0, %v1794_v10 }
 0x3d5   :  { %2463 = vadd.xlane.f32.xlu0 %v2462_v1  ;;  %v1795_v1 = vmul.f32 49.0, %v3820_v2  ;;  %v3738_v2 = vsel %vm1319_vm11, 1.0, %v6954_v43 }
 0x3d6   :  { %3936 = vmatmul.msk.f32.gmra.mxu2 %vm1526_vm1, %v3736_v8  ;;  %vm1892_vm0 = vcmp.eq.f32.partialorder %v5527_v24, %v1843_v16 }
 0x3d7   :  { %v6012_v10 = vsel %vm1892_vm0, 1.0, %v6954_v43 }
 0x3d8   :  { %v5992_v31 = vpop.xlane.xlu2 %2421  ;;  %7009 = vst [vmem:[#allocation69_spill] sm:$0xff] %v6012_v10 }
 0x3d9   :  { %v2268_v3 = vpop.f32.mrf.mxu2 }
 0x3da   :  { %v2375_v11 = vmul.f32 %v5995_v33, %v2268_v3  ;;  %v1844_v3 = vsub.f32 %v1745_v22, %v1795_v1 }
 0x3dc   :  { %v2465_v8 = vsel %vm2404_vm14, %v2375_v11, 0.0  ;;  %vm1893_vm3 = vcmp.eq.f32.partialorder %v5527_v24, %v1844_v3 }
 0x3dd   :  { %2466 = vadd.xlane.f32.xlu0 %v2465_v8  ;;  %v6029_v8 = vsel %vm1893_vm3, 1.0, %v6954_v43 }
 0x3de   :  { %3937 = vmatmul.msk.f32.gmra.mxu2 %vm1526_vm1, %v3737_v48  ;;  %v3821_v48 = vadd.f32 -1.0, %v5651_v21  ;;  %7010 = vst [vmem:[#allocation70_spill] sm:$0xff] %v6029_v8 }
 0x3e0   :  { %v2425_v47 = vpop.xlane.xlu2 %2424  ;;  %v1796_v3 = vmul.f32 49.0, %v3821_v48 }
 0x3e1   :  { %v2271_v0 = vpop.f32.mrf.mxu2  ;;  %v2588_v58 = vadd.f32 %v4989_v23, %v2425_v47  ;;  %v6026_v23 = vpop.xlane.xlu0 %1639  ;;  %v3739_v47 = vsel %vm1320_vm7, 1.0, %v6954_v43 }
 0x3e2   :  { %v2376_v11 = vmul.f32 %v6012_v10, %v2271_v0  ;;  %v1746_v0 = vcvt.s32.f32 %v5206_v12  ;;  %v7014_v10 = vld [vmem:[#allocation42_spill] sm:$0xff] }
 0x3e3   :  { %4022 = vtanh.f32 %v2588_v58  ;;  %v6041_v58 = vld [vmem:[%s6800_s8] ss:$0 sm:$0xff] }
 0x3e4   :  { %v2468_v16 = vsel %vm2404_vm14, %v2376_v11, 0.0  ;;  %v1845_v12 = vsub.f32 %v1746_v0, %v1796_v3  ;;  %v3822_v3 = vadd.f32 -1.0, %v5614_v36 }
 0x3e5   :  { %2469 = vadd.xlane.f32.xlu0 %v2468_v16 }
 0x3e6   :  { %3938 = vmatmul.msk.f32.gmra.mxu2 %vm1526_vm1, %v3738_v2  ;;  %vm1894_vm9 = vcmp.eq.f32.partialorder %v5527_v24, %v1845_v12 }
 0x3e7   :  { %v6057_v0 = vsel %vm1894_vm9, 1.0, %v6954_v43 }
 0x3e8   :  { %v2428_v2 = vpop.xlane.xlu2 %2427 }
 0x3e9   :  { %v2274_v22 = vpop.f32.mrf.mxu2  ;;  %v4023_v21 = vpop.eup %4022 }
 0x3ea   :  { %v2377_v1 = vmul.f32 %v6029_v8, %v2274_v22  ;;  %v2775_v16 = vmul.f32 %v4023_v21, %v6041_v58  ;;  %v6047_v22 = vpop.xlane.xlu0 %1636  ;;  %v3742_v8 = vsel %vm1323_vm13, 1.0, %v6954_v43 }
 0x3ec   :  { %v2471_v11 = vsel %vm2404_vm14, %v2377_v1, 0.0  ;;  %v7011_v1 = vld [vmem:[#allocation41_spill] sm:$0xff]  ;;  %v2836_v33 = vsel %vm2404_vm14, %v2775_v16, 0.0  ;;  %v1747_v16 = vcvt.s32.f32 %v5184_v28 }
 0x3ed   :  { %2472 = vadd.xlane.f32.xlu0 %v2471_v11  ;;  %v2591_v11 = vadd.f32 %v7011_v1, %v2428_v2  ;;  %7012 = vst [vmem:[#allocation41_spill] sm:$0xff] %v6057_v0  ;;  %v3741_v2 = vsel %vm1322_vm5, 1.0, %v6954_v43 }
 0x3ee   :  { %3939 = vmatmul.msk.f32.gmra.mxu2 %vm1526_vm1, %v3739_v47  ;;  %v3740_v47 = vsel %vm1321_vm10, 1.0, %v6954_v43 }
 0x3ef   :  { %4024 = vtanh.f32 %v2591_v11 }
 0x3f1   :  { %v2277_v48 = vpop.f32.mrf.mxu2 }
 0x3f2   :  { %v2378_v21 = vmul.f32 %v6057_v0, %v2277_v48  ;;  %v6067_v11 = vpop.xlane.xlu0 %1630  ;;  %v2431_v48 = vpop.xlane.xlu2 %2430 }
 0x3f4   :  { %v2474_v1 = vsel %vm2404_vm14, %v2378_v21, 0.0  ;;  %v2594_v21 = vadd.f32 %v7014_v10, %v2431_v48  ;;  %v3823_v10 = vadd.f32 -1.0, %v5583_v30 }
 0x3f5   :  { %2837 = vadd.xlane.f32.xlu0 %v2836_v33  ;;  %v1797_v33 = vmul.f32 49.0, %v3822_v3 }
 0x3f6   :  { %3940 = vmatmul.msk.f32.gmra.mxu2 %vm1526_vm1, %v3740_v47  ;;  %v4025_v47 = vpop.eup %4024  ;;  %4026 = vtanh.f32 %v2594_v21  ;;  %v1798_v48 = vmul.f32 49.0, %v3823_v10  ;;  %v7019_v21 = vld [vmem:[#allocation29_spill] sm:$0xff] }
 0x3f7   :  { %v1846_v36 = vsub.f32 %v1747_v16, %v1797_v33  ;;  %v2776_v28 = vmul.f32 %v4025_v47, %v6041_v58  ;;  %vm1276_vm3 = vcmp.lt.s32.totalorder %v7019_v21, %v5079_v59  ;;  %vm7020_vm7 = vcmp.ge.s32.totalorder %v7019_v21, %v4854_v13 }
 0x3f8   :  { %vm1325_vm4 = vmand %vm7020_vm7, %vm1276_vm3 }
 0x3f9   :  { %v2280_v12 = vpop.f32.mrf.mxu2  ;;  %vm1895_vm8 = vcmp.eq.f32.partialorder %v5527_v24, %v1846_v36  ;;  %v2839_v0 = vsel %vm2404_vm14, %v2776_v28, 0.0  ;;  %v1748_v36 = vcvt.s32.f32 %v5158_v62 }
 0x3fa   :  { %v6086_v16 = vsel %vm1895_vm8, 1.0, %v6954_v43  ;;  %v2434_v10 = vpop.xlane.xlu2 %2433 }
 0x3fb   :  { %v2379_v33 = vmul.f32 %v6086_v16, %v2280_v12  ;;  %v1847_v30 = vsub.f32 %v1748_v36, %v1798_v48  ;;  %v7023_v36 = vld [vmem:[#allocation27_spill] sm:$0xff]  ;;  %v1752_v48 = vcvt.s32.f32 %v5353_v5 }
 0x3fc   :  { %v4027_v28 = vpop.eup %4026  ;;  %vm1277_vm9 = vcmp.lt.s32.totalorder %v7023_v36, %v5079_v59  ;;  %vm7025_vm15 = vcmp.ge.s32.totalorder %v7023_v36, %v4854_v13 }
 0x3fd   :  { %2475 = vadd.xlane.f32.xlu0 %v2474_v1  ;;  %v7015_v1 = vld [vmem:[#allocation31_spill] sm:$0xff]  ;;  %v2777_v62 = vmul.f32 %v4027_v28, %v6041_v58  ;;  %vm1896_vm10 = vcmp.eq.f32.partialorder %v5527_v24, %v1847_v30  ;;  %vm1326_vm5 = vmand %vm7025_vm15, %vm1277_vm9 }
 0x3fe   :  { %3941 = vmatmul.msk.f32.gmra.mxu2 %vm1526_vm1, %v3741_v2  ;;  %vm1275_vm0 = vcmp.lt.s32.totalorder %v7015_v1, %v5079_v59  ;;  %v6082_v2 = vpop.xlane.xlu0 %1672  ;;  %7017 = vst [vmem:[#allocation31_spill] sm:$0xff] %v6086_v16  ;;  %vm7018_vm11 = vcmp.ge.s32.totalorder %v7015_v1, %v4854_v13  ;;  %v7021_v16 = vld [vmem:[#allocation14_spill] sm:$0xff]  ;;  %v6120_v9 = vsel %vm1896_vm10, 1.0, %v6954_v43  ;;  %v3745_v36 = vsel %vm1326_vm5, 1.0, %v6954_v43 }
 0x3ff   :  { %7016 = vst [vmem:[#allocation42_spill] sm:$0xff] %v6082_v2  ;;  %vm1324_vm12 = vmand %vm7018_vm11, %vm1275_vm0  ;;  %v6100_v2 = vpop.xlane.xlu1 %1627  ;;  %v2842_v46 = vsel %vm2404_vm14, %v2777_v62, 0.0  ;;  %vm7035_vm10 = vcmp.ge.s32.totalorder %v5741_v6, %v4854_v13 }
 0x400   :  { %7024 = vst [vmem:[#allocation29_spill] sm:$0xff] %v6120_v9 }
 0x401   :  { %v2283_v3 = vpop.f32.mrf.mxu2 }
 0x405   :  { %2840 = vadd.xlane.f32.xlu0 %v2839_v0  ;;  %v3743_v0 = vsel %vm1324_vm12, 1.0, %v6954_v43 }
 0x406   :  { %3942 = vmatmul.msk.f32.gmra.mxu2 %vm1526_vm1, %v3742_v8  ;;  %v2477_v8 = vsel %vm2404_vm14, %v2379_v33, 0.0 }
 0x409   :  { %v6093_v47 = vpop.f32.mrf.mxu2 }
 0x40d   :  { %2478 = vadd.xlane.f32.xlu0 %v2477_v8  ;;  %v3744_v8 = vsel %vm1325_vm4, 1.0, %v6954_v43  ;;  %vm1280_vm4 = vcmp.lt.s32.totalorder %v5741_v6, %v5079_v59 }
 0x40e   :  { %3943 = vmatmul.msk.f32.gmra.mxu2 %vm1526_vm1, %v3743_v0  ;;  %v2597_v0 = vadd.f32 %v7022_v40, %v2434_v10  ;;  %v2380_v40 = vmul.f32 %v6120_v9, %v2283_v3  ;;  %v7028_v9 = vld [vmem:[#allocation24_spill] sm:$0xff]  ;;  %vm1329_vm9 = vmand %vm7035_vm10, %vm1280_vm4 }
 0x40f   :  { %vm1278_vm2 = vcmp.lt.s32.totalorder %v7028_v9, %v5079_v59  ;;  %vm7029_vm13 = vcmp.ge.s32.totalorder %v7028_v9, %v4854_v13 }
 0x410   :  { %v2443_v12 = vpop.xlane.xlu0 %2442  ;;  %v2480_v3 = vsel %vm2404_vm14, %v2380_v40, 0.0  ;;  %vm1327_vm8 = vmand %vm7029_vm13, %vm1278_vm2 }
 0x411   :  { %v2606_v33 = vadd.f32 %v7021_v16, %v2443_v12  ;;  %v6108_v37 = vpop.f32.mrf.mxu2  ;;  %v1802_v16 = vmul.f32 49.0, %v3827_v61  ;;  %v3824_v12 = vadd.f32 -1.0, %v5551_v32  ;;  %v7027_v61 = vld [vmem:[#allocation25_spill] sm:$0xff]  ;;  %v1749_v32 = vcvt.s32.f32 %v5132_v55 }
 0x412   :  { %v3828_v10 = vadd.f32 -1.0, %v7027_v61 }
 0x413   :  { %4028 = vtanh.f32 %v2606_v33  ;;  %v1851_v33 = vsub.f32 %v1752_v48, %v1802_v16  ;;  %v1753_v48 = vcvt.s32.f32 %v5040_v49 }
 0x414   :  { %4030 = vtanh.f32 %v2597_v0  ;;  %v1803_v16 = vmul.f32 49.0, %v3828_v10 }
 0x415   :  { %2843 = vadd.xlane.f32.xlu0 %v2842_v46  ;;  %v7026_v46 = vld [vmem:[#allocation15_spill] sm:$0xff]  ;;  %vm1900_vm6 = vcmp.eq.f32.partialorder %v5527_v24, %v1851_v33 }
 0x416   :  { %3944 = vmatmul.msk.f32.gmra.mxu2 %vm1526_vm1, %v3744_v8  ;;  %v6145_v55 = vsel %vm1900_vm6, 1.0, %v6954_v43  ;;  %v7030_v33 = vld [vmem:[#allocation11_spill] sm:$0xff] }
 0x418   :  { %v2446_v28 = vpop.xlane.xlu1 %2445 }
 0x419   :  { %v4029_v30 = vpop.eup %4028  ;;  %v2609_v62 = vadd.f32 %v7026_v46, %v2446_v28  ;;  %v6128_v5 = vpop.f32.mrf.mxu2  ;;  %v1799_v28 = vmul.f32 49.0, %v3824_v12 }
 0x41a   :  { %v2781_v8 = vmul.f32 %v4029_v30, %v6041_v58  ;;  %v4031_v46 = vpop.eup %4030 }
 0x41b   :  { %4032 = vtanh.f32 %v2609_v62  ;;  %v1848_v30 = vsub.f32 %v1749_v32, %v1799_v28  ;;  %v2437_v62 = vpop.xlane.xlu2 %2436  ;;  %v2778_v61 = vmul.f32 %v4031_v46, %v6041_v58  ;;  %v7031_v28 = vld [vmem:[#allocation22_spill] sm:$0xff] }
 0x41c   :  { %v2854_v0 = vsel %vm2404_vm14, %v2781_v8, 0.0  ;;  %v1852_v8 = vsub.f32 %v1753_v48, %v1803_v16  ;;  %vm1279_vm0 = vcmp.lt.s32.totalorder %v7031_v28, %v5079_v59  ;;  %vm7032_vm3 = vcmp.ge.s32.totalorder %v7031_v28, %v4854_v13 }
 0x41d   :  { %2855 = vadd.xlane.f32.xlu1 %v2854_v0  ;;  %2481 = vadd.xlane.f32.xlu0 %v2480_v3  ;;  %v2600_v0 = vadd.f32 %v7030_v33, %v2437_v62  ;;  %vm1897_vm11 = vcmp.eq.f32.partialorder %v5527_v24, %v1848_v30  ;;  %v2845_v46 = vsel %vm2404_vm14, %v2778_v61, 0.0  ;;  %vm1328_vm7 = vmand %vm7032_vm3, %vm1279_vm0 }
 0x41e   :  { %3945 = vmatmul.msk.f32.gmra.mxu2 %vm1526_vm1, %v3745_v36  ;;  %v3746_v36 = vsel %vm1327_vm8, 1.0, %v6954_v43  ;;  %vm1901_vm12 = vcmp.eq.f32.partialorder %v5527_v24, %v1852_v8  ;;  %v6164_v48 = vsel %vm1897_vm11, 1.0, %v6954_v43 }
 0x41f   :  { %4034 = vtanh.f32 %v2600_v0  ;;  %v2381_v62 = vmul.f32 %v6164_v48, %v6093_v47  ;;  %v6171_v8 = vsel %vm1901_vm12, 1.0, %v6954_v43  ;;  %v1750_v0 = vcvt.s32.f32 %v5106_v19 }
 0x421   :  { %v4033_v40 = vpop.eup %4032  ;;  %v2295_v12 = vpop.f32.mrf.mxu2  ;;  %v2483_v47 = vsel %vm2404_vm14, %v2381_v62, 0.0  ;;  %v3748_v62 = vsel %vm1329_vm9, 1.0, %v6954_v43 }
 0x422   :  { %v2384_v49 = vmul.f32 %v6145_v55, %v2295_v12  ;;  %v2782_v10 = vmul.f32 %v4033_v40, %v6041_v58  ;;  %v7033_v40 = vld [vmem:[#allocation44_spill] sm:$0xff] }
 0x423   :  { %v3825_v30 = vadd.f32 -1.0, %v7033_v40  ;;  %v7034_v12 = vld [vmem:[#allocation16_spill] sm:$0xff]  ;;  %v2440_v19 = vpop.xlane.xlu2 %2439 }
 0x424   :  { %v2857_v3 = vsel %vm2404_vm14, %v2782_v10, 0.0  ;;  %v2492_v32 = vsel %vm2404_vm14, %v2384_v49, 0.0 }
 0x425   :  { %2858 = vadd.xlane.f32.xlu2 %v2857_v3  ;;  %2493 = vadd.xlane.f32.xlu1 %v2492_v32  ;;  %v1800_v3 = vmul.f32 49.0, %v3825_v30  ;;  %v4035_v32 = vpop.eup %4034 }
 0x426   :  { %2846 = vadd.xlane.f32.xlu0 %v2845_v46  ;;  %3946 = vmatmul.msk.f32.gmra.mxu2 %vm1526_vm1, %v3746_v36  ;;  %v3747_v36 = vsel %vm1328_vm7, 1.0, %v6954_v43  ;;  %v3831_v46 = vadd.f32 -1.0, %v6100_v2  ;;  %v2779_v59 = vmul.f32 %v4035_v32, %v6041_v58 }
 0x427   :  { %v1849_v40 = vsub.f32 %v1750_v0, %v1800_v3 }
 0x428   :  { %v2452_v16 = vpop.xlane.xlu1 %2451  ;;  %v2848_v2 = vsel %vm2404_vm14, %v2779_v59, 0.0 }
 0x429   :  { %v2615_v61 = vadd.f32 %v7034_v12, %v2452_v16  ;;  %v2298_v49 = vpop.f32.mrf.mxu2  ;;  %vm1898_vm15 = vcmp.eq.f32.partialorder %v5527_v24, %v1849_v40  ;;  %v1751_v40 = vcvt.s32.f32 %v5082_v41 }
 0x42a   :  { %v2385_v10 = vmul.f32 %v6171_v8, %v2298_v49  ;;  %v6197_v0 = vsel %vm1898_vm15, 1.0, %v6954_v43 }
 0x42b   :  { %4036 = vtanh.f32 %v2615_v61  ;;  %v7036_v61 = vld [vmem:[#allocation12_spill] sm:$0xff]  ;;  %v2382_v32 = vmul.f32 %v6197_v0, %v6108_v37 }
 0x42c   :  { %v2495_v33 = vsel %vm2404_vm14, %v2385_v10, 0.0  ;;  %v2603_v49 = vadd.f32 %v7036_v61, %v2440_v19  ;;  %v1756_v10 = vcvt.s32.f32 %v5770_v18 }
 0x42d   :  { %2496 = vadd.xlane.f32.xlu2 %v2495_v33  ;;  %v2486_v59 = vsel %vm2404_vm14, %v2382_v32, 0.0 }
 0x42e   :  { %2484 = vadd.xlane.f32.xlu0 %v2483_v47  ;;  %3947 = vmatmul.msk.f32.gmra.mxu2 %vm1526_vm1, %v3747_v36  ;;  %v1806_v36 = vmul.f32 49.0, %v3831_v46  ;;  %4038 = vtanh.f32 %v2603_v49  ;;  %v7037_v47 = vld [vmem:[#allocation30_spill] sm:$0xff] }
 0x42f   :  { %v3826_v18 = vadd.f32 -1.0, %v7037_v47 }
 0x430   :  { %v1855_v33 = vsub.f32 %v1756_v10, %v1806_v36  ;;  %v2449_v36 = vpop.xlane.xlu2 %2448 }
 0x431   :  { %v4037_v16 = vpop.eup %4036  ;;  %v6185_v30 = vpop.f32.mrf.mxu2  ;;  %v1801_v19 = vmul.f32 49.0, %v3826_v18 }
 0x432   :  { %v2784_v12 = vmul.f32 %v4037_v16, %v6041_v58  ;;  %v3832_v16 = vadd.f32 -1.0, %v6067_v11  ;;  %vm1904_vm5 = vcmp.eq.f32.partialorder %v5527_v24, %v1855_v33  ;;  %v7039_v33 = vld [vmem:[#allocation17_spill] sm:$0xff] }
 0x433   :  { %v6212_v49 = vsel %vm1904_vm5, 1.0, %v6954_v43  ;;  %v1850_v10 = vsub.f32 %v1751_v40, %v1801_v19  ;;  %v2612_v47 = vadd.f32 %v7039_v33, %v2449_v36  ;;  %v7040_v40 = vld [vmem:[#allocation13_spill] sm:$0xff]  ;;  %v1759_v33 = vcvt.s32.f32 %v5687_v35 }
 0x434   :  { %v2863_v13 = vsel %vm2404_vm14, %v2784_v12, 0.0  ;;  %v4039_v12 = vpop.eup %4038  ;;  %v1807_v61 = vmul.f32 49.0, %v3832_v16  ;;  %7038 = vst [vmem:[#allocation14_spill] sm:$0xff] %v6212_v49  ;;  %v3829_v19 = vadd.f32 -1.0, %v7040_v40 }
 0x435   :  { %2864 = vadd.xlane.f32.xlu2 %v2863_v13  ;;  %v2780_v13 = vmul.f32 %v4039_v12, %v6041_v58  ;;  %vm1899_vm2 = vcmp.eq.f32.partialorder %v5527_v24, %v1850_v10  ;;  %4040 = vtanh.f32 %v2612_v47 }
 0x436   :  { %2849 = vadd.xlane.f32.xlu0 %v2848_v2  ;;  %3948 = vmatmul.msk.f32.gmra.mxu2 %vm1526_vm1, %v3748_v62  ;;  %v1757_v62 = vcvt.s32.f32 %v5712_v4  ;;  %v6224_v32 = vsel %vm1899_vm2, 1.0, %v6954_v43 }
 0x437   :  { %v2851_v4 = vsel %vm2404_vm14, %v2780_v13, 0.0  ;;  %v1804_v13 = vmul.f32 49.0, %v3829_v19  ;;  %v1755_v19 = vcvt.s32.f32 %v5422_v54 }
 0x438   :  { %v6199_v3 = vpop.xlane.xlu0 %2457  ;;  %v1856_v2 = vsub.f32 %v1757_v62, %v1807_v61  ;;  %v3834_v61 = vadd.f32 -1.0, %v6047_v22  ;;  %v3830_v22 = vadd.f32 -1.0, %v5879_v17 }
 0x439   :  { %v6204_v46 = vpop.f32.mrf.mxu2 }
 0x43a   :  { %vm1905_vm6 = vcmp.eq.f32.partialorder %v5527_v24, %v1856_v2 }
 0x43b   :  { %v6232_v12 = vsel %vm1905_vm6, 1.0, %v6954_v43 }
 0x43c   :  { %7041 = vst [vmem:[#allocation43_spill] sm:$0xff] %v6232_v12 }
 0x43e   :  { %2487 = vadd.xlane.f32.xlu0 %v2486_v59  ;;  %v2383_v59 = vmul.f32 %v6224_v32, %v6128_v5  ;;  %v1809_v5 = vmul.f32 49.0, %v3834_v61 }
 0x440   :  { %v6214_v37 = vpop.xlane.xlu0 %2460  ;;  %v2489_v2 = vsel %vm2404_vm14, %v2383_v59, 0.0  ;;  %v1760_v59 = vcvt.s32.f32 %v5660_v29  ;;  %v6261_v29 = vpop.f32.mrf.mxu3 }
 0x441   :  { %v2307_v11 = vpop.f32.mrf.mxu2 }
 0x442   :  { %v2388_v41 = vmul.f32 %v6212_v49, %v2307_v11  ;;  %v1754_v11 = vcvt.s32.f32 %v4851_v25  ;;  %v1858_v25 = vsub.f32 %v1759_v33, %v1809_v5 }
 0x444   :  { %v2504_v18 = vsel %vm2404_vm14, %v2388_v41, 0.0  ;;  %v4041_v41 = vpop.eup %4040  ;;  %vm1907_vm8 = vcmp.eq.f32.partialorder %v5527_v24, %v1858_v25 }
 0x445   :  { %2505 = vadd.xlane.f32.xlu2 %v2504_v18  ;;  %v1853_v18 = vsub.f32 %v1754_v11, %v1804_v13  ;;  %v2783_v40 = vmul.f32 %v4041_v41, %v6041_v58  ;;  %v6259_v13 = vsel %vm1907_vm8, 1.0, %v6954_v43  ;;  %v3836_v41 = vadd.f32 -1.0, %v6006_v39 }
 0x446   :  { %2852 = vadd.xlane.f32.xlu0 %v2851_v4 }
 0x447   :  { %vm1902_vm13 = vcmp.eq.f32.partialorder %v5527_v24, %v1853_v18  ;;  %v2860_v35 = vsel %vm2404_vm14, %v2783_v40, 0.0  ;;  %v1761_v40 = vcvt.s32.f32 %v5633_v50 }
 0x448   :  { %v6226_v16 = vpop.xlane.xlu0 %2463  ;;  %v6251_v17 = vsel %vm1902_vm13, 1.0, %v6954_v43 }
 0x449   :  { %v2310_v62 = vpop.f32.mrf.mxu2  ;;  %v2386_v54 = vmul.f32 %v6251_v17, %v6185_v30 }
 0x44a   :  { %v2389_v10 = vmul.f32 %v6232_v12, %v2310_v62  ;;  %v3835_v62 = vadd.f32 -1.0, %v6026_v23  ;;  %v3833_v23 = vadd.f32 -1.0, %v5856_v26 }
 0x44b   :  { %v2498_v30 = vsel %vm2404_vm14, %v2386_v54, 0.0 }
 0x44c   :  { %v2507_v36 = vsel %vm2404_vm14, %v2389_v10, 0.0  ;;  %v1805_v10 = vmul.f32 49.0, %v3830_v22  ;;  %v1810_v61 = vmul.f32 49.0, %v3835_v62  ;;  %v1758_v22 = vcvt.s32.f32 %v5388_v7 }
 0x44d   :  { %2508 = vadd.xlane.f32.xlu1 %v2507_v36  ;;  %v1808_v26 = vmul.f32 49.0, %v3833_v23  ;;  %v1811_v62 = vmul.f32 49.0, %v3836_v41  ;;  %v6283_v23 = vpop.f32.mrf.mxu3 }
 0x44e   :  { %2490 = vadd.xlane.f32.xlu0 %v2489_v2  ;;  %v1854_v11 = vsub.f32 %v1755_v19, %v1805_v10  ;;  %v1859_v33 = vsub.f32 %v1760_v59, %v1810_v61  ;;  %v3837_v59 = vadd.f32 -1.0, %v5982_v34 }
 0x44f   :  { %v1857_v19 = vsub.f32 %v1758_v22, %v1808_v26  ;;  %v1860_v50 = vsub.f32 %v1761_v40, %v1811_v62  ;;  %v3838_v22 = vadd.f32 -1.0, %v5961_v15 }
 0x450   :  { %v6240_v47 = vpop.xlane.xlu0 %2466  ;;  %vm1903_vm0 = vcmp.eq.f32.partialorder %v5527_v24, %v1854_v11  ;;  %vm1908_vm11 = vcmp.eq.f32.partialorder %v5527_v24, %v1859_v33 }
 0x451   :  { %v2313_v4 = vpop.f32.mrf.mxu2  ;;  %v6272_v39 = vsel %vm1903_vm0, 1.0, %v6954_v43  ;;  %v6279_v10 = vsel %vm1908_vm11, 1.0, %v6954_v43  ;;  %vm1906_vm12 = vcmp.eq.f32.partialorder %v5527_v24, %v1857_v19  ;;  %vm1909_vm3 = vcmp.eq.f32.partialorder %v5527_v24, %v1860_v50 }
 0x452   :  { %7042 = vst [vmem:[#allocation15_spill] sm:$0xff] %v6272_v39  ;;  %v2387_v7 = vmul.f32 %v6272_v39, %v6204_v46  ;;  %v1762_v46 = vcvt.s32.f32 %v5606_v52  ;;  %v6291_v34 = vsel %vm1906_vm12, 1.0, %v6954_v43  ;;  %v1763_v19 = vcvt.s32.f32 %v5579_v45 }
 0x453   :  { %7043 = vst [vmem:[#allocation25_spill] sm:$0xff] %v6291_v34  ;;  %v2390_v33 = vmul.f32 %v6291_v34, %v2313_v4 }
 0x454   :  { %v2501_v54 = vsel %vm2404_vm14, %v2387_v7, 0.0  ;;  %v1813_v7 = vmul.f32 49.0, %v3838_v22 }
 0x455   :  { %v2510_v40 = vsel %vm2404_vm14, %v2390_v33, 0.0  ;;  %v6303_v62 = vpop.f32.mrf.mxu3 }
 0x456   :  { %2861 = vadd.xlane.f32.xlu0 %v2860_v35 }
 0x458   :  { %v6253_v36 = vpop.xlane.xlu0 %2469 }
 0x459   :  { %v2316_v2 = vpop.f32.mrf.mxu2 }
 0x45a   :  { %v2391_v5 = vmul.f32 %v6259_v13, %v2316_v2  ;;  %v1812_v2 = vmul.f32 49.0, %v3837_v59  ;;  %v1862_v59 = vsub.f32 %v1763_v19, %v1813_v7 }
 0x45c   :  { %v2513_v18 = vsel %vm2404_vm14, %v2391_v5, 0.0  ;;  %v6297_v5 = vsel %vm1909_vm3, 1.0, %v6954_v43  ;;  %v1861_v26 = vsub.f32 %v1762_v46, %v1812_v2  ;;  %vm1911_vm4 = vcmp.eq.f32.partialorder %v5527_v24, %v1862_v59 }
 0x45d   :  { %2514 = vadd.xlane.f32.xlu1 %v2513_v18 }
 0x45e   :  { %2499 = vadd.xlane.f32.xlu0 %v2498_v30  ;;  %vm1910_vm7 = vcmp.eq.f32.partialorder %v5527_v24, %v1861_v26  ;;  %v7044_v26 = vld [vmem:[#allocation45_spill] sm:$0xff] }
 0x45f   :  { %v6310_v15 = vsel %vm1910_vm7, 1.0, %v6954_v43 }
 0x460   :  { %v6274_v25 = vpop.xlane.xlu0 %2472 }
 0x461   :  { %v2319_v35 = vpop.f32.mrf.mxu2 }
 0x462   :  { %v2392_v61 = vmul.f32 %v6279_v10, %v2319_v35 }
 0x464   :  { %v2516_v11 = vsel %vm2404_vm14, %v2392_v61, 0.0 }
 0x465   :  { %2517 = vadd.xlane.f32.xlu1 %v2516_v11  ;;  %v6315_v11 = vpop.f32.mrf.mxu3 }
 0x466   :  { %2502 = vadd.xlane.f32.xlu0 %v2501_v54  ;;  %v6320_v54 = vsel %vm1911_vm4, 1.0, %v6954_v43 }
 0x468   :  { %v6293_v41 = vpop.xlane.xlu0 %2837 }
 0x469   :  { %v2322_v18 = vpop.f32.mrf.mxu2 }
 0x46a   :  { %v2393_v52 = vmul.f32 %v6297_v5, %v2322_v18  ;;  %v3839_v18 = vadd.f32 -1.0, %v5937_v20 }
 0x46c   :  { %v2519_v30 = vsel %vm2404_vm14, %v2393_v52, 0.0  ;;  %v1814_v19 = vmul.f32 49.0, %v3839_v18 }
 0x46d   :  { %2520 = vadd.xlane.f32.xlu1 %v2519_v30  ;;  %v2656_v30 = vpop.f32.mrf.mxu3 }
 0x46e   :  { %2511 = vadd.xlane.f32.xlu0 %v2510_v40  ;;  %v1764_v40 = vcvt.s32.f32 %v5554_v53  ;;  %v3840_v53 = vadd.f32 -1.0, %v5913_v57 }
 0x470   :  { %v6307_v4 = vpop.xlane.xlu0 %2475  ;;  %v1863_v7 = vsub.f32 %v1764_v40, %v1814_v19  ;;  %v1765_v40 = vcvt.s32.f32 %v5524_v60  ;;  %v1815_v19 = vmul.f32 49.0, %v3840_v53 }
 0x471   :  { %v2325_v35 = vpop.f32.mrf.mxu2 }
 0x472   :  { %v2394_v50 = vmul.f32 %v6310_v15, %v2325_v35  ;;  %vm1912_vm10 = vcmp.eq.f32.partialorder %v5527_v24, %v1863_v7 }
 0x474   :  { %v2522_v61 = vsel %vm2404_vm14, %v2394_v50, 0.0 }
 0x475   :  { %2523 = vadd.xlane.f32.xlu1 %v2522_v61  ;;  %v2659_v61 = vpop.f32.mrf.mxu3 }
 0x478   :  { %v6317_v45 = vpop.xlane.xlu0 %2840 }
 0x479   :  { %v2328_v46 = vpop.f32.mrf.mxu2 }
 0x47a   :  { %v2395_v2 = vmul.f32 %v6320_v54, %v2328_v46 }
 0x47c   :  { %v2525_v33 = vsel %vm2404_vm14, %v2395_v2, 0.0  ;;  %v6332_v2 = vpop.xlane.xlu2 %2454 }
 0x47d   :  { %2526 = vadd.xlane.f32.xlu1 %v2525_v33  ;;  %v6335_v33 = vsel %vm1912_vm10, 1.0, %v6954_v43 }
 0x480   :  { %v2479_v22 = vpop.xlane.xlu0 %2478 }
 0x481   :  { %v2642_v52 = vadd.f32 %v7044_v26, %v2479_v22  ;;  %v2331_v20 = vpop.f32.mrf.mxu2 }
 0x482   :  { %v2396_v26 = vmul.f32 %v6335_v33, %v2331_v20 }
 0x483   :  { %4042 = vtanh.f32 %v2642_v52 }
 0x484   :  { %v2528_v7 = vsel %vm2404_vm14, %v2396_v26, 0.0 }
 0x488   :  { %v6327_v35 = vpop.xlane.xlu0 %2843 }
 0x489   :  { %v4043_v59 = vpop.eup %4042  ;;  %v2334_v60 = vpop.f32.mrf.mxu2 }
 0x48a   :  { %v2793_v50 = vmul.f32 %v4043_v59, %v6041_v58  ;;  %v6344_v59 = vpop.f32.mrf.mxu3 }
 0x48c   :  { %v2890_v46 = vsel %vm2404_vm14, %v2793_v50, 0.0  ;;  %v1864_v50 = vsub.f32 %v1765_v40, %v1815_v19  ;;  %v3841_v40 = vadd.f32 -1.0, %v5892_v56 }
 0x48d   :  { %2891 = vadd.xlane.f32.xlu1 %v2890_v46 }
 0x48e   :  { %vm1913_vm9 = vcmp.eq.f32.partialorder %v5527_v24, %v1864_v50  ;;  %v7045_v50 = vld [vmem:[#allocation40_spill] sm:$0xff]  ;;  %v1816_v34 = vmul.f32 49.0, %v3841_v40 }
 0x48f   :  { %v6354_v53 = vsel %vm1913_vm9, 1.0, %v6954_v43 }
 0x490   :  { %v6338_v18 = vpop.xlane.xlu1 %2855  ;;  %v2482_v22 = vpop.xlane.xlu0 %2481 }
 0x491   :  { %v2645_v52 = vadd.f32 %v6261_v29, %v2482_v22 }
 0x492   :  { %v6356_v22 = vpop.f32.mrf.mxu3 }
 0x493   :  { %4044 = vtanh.f32 %v2645_v52  ;;  %v2397_v52 = vmul.f32 %v6354_v53, %v2334_v60  ;;  %v1766_v60 = vcvt.s32.f32 %v7015_v1 }
 0x495   :  { %2529 = vadd.xlane.f32.xlu1 %v2528_v7 }
 0x498   :  { %v6346_v46 = vpop.xlane.xlu2 %2858  ;;  %v2494_v57 = vpop.xlane.xlu1 %2493 }
 0x499   :  { %v4045_v39 = vpop.eup %4044  ;;  %v2657_v49 = vadd.f32 %v2656_v30, %v2494_v57  ;;  %v6348_v12 = vpop.xlane.xlu0 %2846  ;;  %v2585_v57 = vadd.f32 %v7045_v50, %v5992_v31 }
 0x49a   :  { %v2794_v20 = vmul.f32 %v4045_v39, %v6041_v58  ;;  %v2337_v50 = vpop.f32.mrf.mxu2 }
 0x49b   :  { %4046 = vtanh.f32 %v2657_v49 }
 0x49c   :  { %v2893_v29 = vsel %vm2404_vm14, %v2794_v20, 0.0 }
 0x49d   :  { %2894 = vadd.xlane.f32.xlu1 %v2893_v29  ;;  %v2531_v29 = vsel %vm2404_vm14, %v2397_v52, 0.0  ;;  %v7046_v52 = vld [vmem:[#allocation39_spill] sm:$0xff] }
 0x4a0   :  { %v2497_v26 = vpop.xlane.xlu2 %2496 }
 0x4a1   :  { %v4047_v30 = vpop.eup %4046  ;;  %v2660_v19 = vadd.f32 %v2659_v61, %v2497_v26  ;;  %v2485_v39 = vpop.xlane.xlu0 %2484 }
 0x4a2   :  { %v2648_v49 = vadd.f32 %v6283_v23, %v2485_v39  ;;  %v2798_v7 = vmul.f32 %v4047_v30, %v6041_v58  ;;  %v1865_v23 = vsub.f32 %v1766_v60, %v1816_v34 }
 0x4a3   :  { %4048 = vtanh.f32 %v2660_v19  ;;  %v6370_v19 = vpop.f32.mrf.mxu3 }
 0x4a4   :  { %4050 = vtanh.f32 %v2648_v49  ;;  %v2905_v20 = vsel %vm2404_vm14, %v2798_v7, 0.0  ;;  %v2582_v49 = vadd.f32 %v7046_v52, %v5973_v38  ;;  %vm1914_vm15 = vcmp.eq.f32.partialorder %v5527_v24, %v1865_v23 }
 0x4a5   :  { %2906 = vadd.xlane.f32.xlu2 %v2905_v20  ;;  %2532 = vadd.xlane.f32.xlu1 %v2531_v29  ;;  %4052 = vtanh.f32 %v2585_v57  ;;  %v6380_v57 = vsel %vm1914_vm15, 1.0, %v6954_v43  ;;  %v3842_v38 = vadd.f32 -1.0, %v5870_v27  ;;  %v1767_v52 = vcvt.s32.f32 %v7019_v21 }
 0x4a6   :  { %4054 = vtanh.f32 %v2582_v49  ;;  %v2398_v60 = vmul.f32 %v6380_v57, %v2337_v50 }
 0x4a7   :  { %v1817_v49 = vmul.f32 49.0, %v3842_v38 }
 0x4a8   :  { %v2865_v56 = vpop.xlane.xlu2 %2864 }
 0x4a9   :  { %v4049_v61 = vpop.eup %4048  ;;  %v2980_v26 = vmul.f32 %v5898_v51, %v2865_v56  ;;  %v6368_v30 = vpop.xlane.xlu0 %2849 }
 0x4aa   :  { %v4051_v31 = vpop.eup %4050  ;;  %v2799_v39 = vmul.f32 %v4049_v61, %v6041_v58  ;;  %v7047_v61 = vld [vmem:[#allocation38_spill] sm:$0xff] }
 0x4ab   :  { %3017 = vmatpush.msra.mxu0 %v2980_v26  ;;  %v2795_v1 = vmul.f32 %v4051_v31, %v6041_v58  ;;  %v4053_v7 = vpop.eup %4052  ;;  %v2579_v26 = vadd.f32 %v7047_v61, %v5954_v14  ;;  %v6388_v31 = vpop.f32.mrf.mxu3  ;;  %v7048_v14 = vld [vmem:[#allocation37_spill] sm:$0xff]  ;;  %v3843_v61 = vadd.f32 -1.0, %v5847_v44 }
 0x4ac   :  { %v2908_v40 = vsel %vm2404_vm14, %v2799_v39, 0.0  ;;  %v2774_v20 = vmul.f32 %v4053_v7, %v6041_v58  ;;  %v4055_v39 = vpop.eup %4054 }
 0x4ad   :  { %2909 = vadd.xlane.f32.xlu0 %v2908_v40  ;;  %v2896_v34 = vsel %vm2404_vm14, %v2795_v1, 0.0  ;;  %v2534_v1 = vsel %vm2404_vm14, %v2398_v60, 0.0  ;;  %v2773_v27 = vmul.f32 %v4055_v39, %v6041_v58  ;;  %v2340_v60 = vpop.f32.mrf.mxu2 }
 0x4ae   :  { %2897 = vadd.xlane.f32.xlu1 %v2896_v34  ;;  %v2833_v23 = vsel %vm2404_vm14, %v2774_v20, 0.0  ;;  %v2576_v34 = vadd.f32 %v7048_v14, %v5935_v63  ;;  %v1818_v14 = vmul.f32 49.0, %v3843_v61  ;;  %v7053_v61 = vld [vmem:[#allocation63_spill] sm:$0xff] }
 0x4af   :  { %v2830_v20 = vsel %vm2404_vm14, %v2773_v27, 0.0 }
 0x4b1   :  { %v2488_v29 = vpop.xlane.xlu0 %2487 }
 0x4b2   :  { %v2651_v56 = vadd.f32 %v6303_v62, %v2488_v29  ;;  %v1866_v62 = vsub.f32 %v1767_v52, %v1817_v49  ;;  %v7049_v52 = vld [vmem:[#allocation36_spill] sm:$0xff] }
 0x4b3   :  { %v6400_v38 = vpop.f32.mrf.mxu3  ;;  %v2573_v49 = vadd.f32 %v7049_v52, %v5921_v42  ;;  %v7054_v52 = vld [vmem:[#allocation35_spill] sm:$0xff] }
 0x4b4   :  { %4056 = vtanh.f32 %v2651_v56  ;;  %vm1915_vm5 = vcmp.eq.f32.partialorder %v5527_v24, %v1866_v62  ;;  %v7050_v62 = vld [vmem:[#allocation27_spill] sm:$0xff] }
 0x4b5   :  { %2834 = vadd.xlane.f32.xlu0 %v2833_v23  ;;  %4058 = vtanh.f32 %v2579_v26  ;;  %v6403_v56 = vsel %vm1915_vm5, 1.0, %v6954_v43 }
 0x4b6   :  { %2535 = vadd.xlane.f32.xlu1 %v2534_v1  ;;  %4060 = vtanh.f32 %v2576_v34  ;;  %v2399_v23 = vmul.f32 %v6403_v56, %v2340_v60 }
 0x4b8   :  { %v2537_v34 = vsel %vm2404_vm14, %v2399_v23, 0.0  ;;  %v2570_v23 = vadd.f32 %v7054_v52, %v7053_v61 }
 0x4b9   :  { %v2853_v40 = vpop.xlane.xlu0 %2852 }
 0x4ba   :  { %v4057_v7 = vpop.eup %4056 }
 0x4bb   :  { %v2796_v50 = vmul.f32 %v4057_v7, %v6041_v58  ;;  %v4059_v29 = vpop.eup %4058  ;;  %v1768_v7 = vcvt.s32.f32 %v7050_v62  ;;  %v6414_v44 = vpop.f32.mrf.mxu3 }
 0x4bc   :  { %v2772_v63 = vmul.f32 %v4059_v29, %v6041_v58  ;;  %v4061_v27 = vpop.eup %4060 }
 0x4bd   :  { %v2899_v21 = vsel %vm2404_vm14, %v2796_v50, 0.0  ;;  %2831 = vadd.xlane.f32.xlu0 %v2830_v20  ;;  %v7051_v20 = vld [vmem:[#allocation58_spill] sm:$0xff]  ;;  %v1867_v29 = vsub.f32 %v1768_v7, %v1818_v14 }
 0x4be   :  { %2900 = vadd.xlane.f32.xlu1 %v2899_v21  ;;  %v2827_v1 = vsel %vm2404_vm14, %v2772_v63, 0.0  ;;  %v3844_v42 = vadd.f32 -1.0, %v7051_v20  ;;  %v7052_v63 = vld [vmem:[#allocation62_spill] sm:$0xff]  ;;  %v1769_v20 = vcvt.s32.f32 %v7028_v9 }
 0x4bf   :  { %vm1916_vm2 = vcmp.eq.f32.partialorder %v5527_v24, %v1867_v29 }
 0x4c0   :  { %v6416_v50 = vpop.xlane.xlu1 %2508  ;;  %v1819_v7 = vmul.f32 49.0, %v3844_v42  ;;  %v7058_v42 = vld [vmem:[#allocation56_spill] sm:$0xff] }
 0x4c1   :  { %v2491_v26 = vpop.xlane.xlu0 %2490  ;;  %v3845_v52 = vadd.f32 -1.0, %v7058_v42 }
 0x4c2   :  { %v2654_v39 = vadd.f32 %v6315_v11, %v2491_v26  ;;  %v2771_v11 = vmul.f32 %v4061_v27, %v6041_v58 }
 0x4c4   :  { %4062 = vtanh.f32 %v2654_v39  ;;  %v2343_v39 = vpop.f32.mrf.mxu2 }
 0x4c5   :  { %2828 = vadd.xlane.f32.xlu0 %v2827_v1  ;;  %4064 = vtanh.f32 %v2573_v49  ;;  %v7055_v49 = vld [vmem:[#allocation61_spill] sm:$0xff] }
 0x4c6   :  { %2538 = vadd.xlane.f32.xlu1 %v2537_v34  ;;  %v2978_v62 = vmul.f32 %v7055_v49, %v6346_v46  ;;  %v2824_v34 = vsel %vm2404_vm14, %v2771_v11, 0.0  ;;  %4066 = vtanh.f32 %v2570_v23  ;;  %v6436_v11 = vsel %vm1916_vm2, 1.0, %v6954_v43 }
 0x4c7   :  { %v2400_v29 = vmul.f32 %v6436_v11, %v2343_v39  ;;  %v1820_v39 = vmul.f32 49.0, %v3845_v52 }
 0x4c9   :  { %v2862_v21 = vpop.xlane.xlu0 %2861 }
 0x4ca   :  { %v4063_v60 = vpop.eup %4062  ;;  %v2979_v26 = vmul.f32 %v7052_v63, %v2862_v21  ;;  %v7056_v21 = vld [vmem:[#allocation60_spill] sm:$0xff] }
 0x4cb   :  { %v2797_v1 = vmul.f32 %v4063_v60, %v6041_v58  ;;  %v4065_v27 = vpop.eup %4064  ;;  %v2977_v61 = vmul.f32 %v7056_v21, %v6338_v18  ;;  %v7057_v60 = vld [vmem:[#allocation59_spill] sm:$0xff]  ;;  %v7059_v18 = vld [vmem:[#allocation57_spill] sm:$0xff] }
 0x4cc   :  { %3018 = vmatpush.msra.mxu0 %v2979_v26  ;;  %v2976_v46 = vmul.f32 %v7057_v60, %v2853_v40  ;;  %v2770_v9 = vmul.f32 %v4065_v27, %v6041_v58  ;;  %v2975_v23 = vmul.f32 %v7059_v18, %v6368_v30  ;;  %v7060_v40 = vld [vmem:[#allocation18_spill] sm:$0xff]  ;;  %v2346_v60 = vpop.f32.mrf.mxu2  ;;  %v4067_v42 = vpop.eup %4066 }
 0x4cd   :  { %v2902_v14 = vsel %vm2404_vm14, %v2797_v1, 0.0  ;;  %2825 = vadd.xlane.f32.xlu0 %v2824_v34  ;;  %v1868_v1 = vsub.f32 %v1769_v20, %v1819_v7  ;;  %v6441_v34 = vpop.f32.mrf.mxu3  ;;  %v1770_v20 = vcvt.s32.f32 %v7031_v28  ;;  %v2540_v7 = vsel %vm2404_vm14, %v2400_v29, 0.0  ;;  %v7062_v30 = vld [vmem:[#allocation54_spill] sm:$0xff] }
 0x4ce   :  { %2903 = vadd.xlane.f32.xlu1 %v2902_v14  ;;  %3019 = vmatpush.msra.mxu0 %v2978_v62  ;;  %v2618_v62 = vadd.f32 %v7060_v40, %v6332_v2  ;;  %v7061_v14 = vld [vmem:[#allocation55_spill] sm:$0xff]  ;;  %v2821_v27 = vsel %vm2404_vm14, %v2770_v9, 0.0  ;;  %v2506_v9 = vpop.xlane.xlu2 %2505  ;;  %v2769_v52 = vmul.f32 %v4067_v42, %v6041_v58 }
 0x4cf   :  { %vm1917_vm6 = vcmp.eq.f32.partialorder %v5527_v24, %v1868_v1  ;;  %v1869_v29 = vsub.f32 %v1770_v20, %v1820_v39  ;;  %v7066_v39 = vld [vmem:[#allocation28_spill] sm:$0xff] }
 0x4d0   :  { %3020 = vmatpush.msra.mxu0 %v2977_v61  ;;  %v6433_v26 = vpop.xlane.xlu1 %2514  ;;  %v2974_v61 = vmul.f32 %v7061_v14, %v6348_v12  ;;  %4068 = vtanh.f32 %v2618_v62  ;;  %v7063_v12 = vld [vmem:[#allocation53_spill] sm:$0xff]  ;;  %v6460_v28 = vsel %vm1917_vm6, 1.0, %v6954_v43  ;;  %v2669_v62 = vadd.f32 %v6370_v19, %v2506_v9 }
 0x4d1   :  { %v2972_v2 = vmul.f32 %v7063_v12, %v6317_v45  ;;  %v2401_v1 = vmul.f32 %v6460_v28, %v2346_v60  ;;  %v7065_v45 = vld [vmem:[#allocation32_spill] sm:$0xff]  ;;  %vm1918_vm13 = vcmp.eq.f32.partialorder %v5527_v24, %v1869_v29 }
 0x4d2   :  { %3021 = vmatpush.msra.mxu0 %v2976_v46  ;;  %v2973_v46 = vmul.f32 %v7062_v30, %v6327_v35  ;;  %v7064_v35 = vld [vmem:[#allocation52_spill] sm:$0xff]  ;;  %4070 = vtanh.f32 %v2669_v62  ;;  %v6473_v19 = vsel %vm1918_vm13, 1.0, %v6954_v43 }
 0x4d3   :  { %v2971_v40 = vmul.f32 %v7064_v35, %v6293_v41  ;;  %v2543_v12 = vsel %vm2404_vm14, %v2401_v1, 0.0 }
 0x4d4   :  { %3022 = vmatpush.msra.mxu0 %v2975_v23  ;;  %v2349_v60 = vpop.f32.mrf.mxu2 }
 0x4d5   :  { %2822 = vadd.xlane.f32.xlu0 %v2821_v27  ;;  %v2639_v27 = vadd.f32 %v7065_v45, %v6307_v4  ;;  %v2402_v20 = vmul.f32 %v6473_v19, %v2349_v60 }
 0x4d6   :  { %2541 = vadd.xlane.f32.xlu1 %v2540_v7  ;;  %3023 = vmatpush.msra.mxu0 %v2974_v61  ;;  %v2683_v61 = vpop.f32.mrf.mxu3  ;;  %v2818_v7 = vsel %vm2404_vm14, %v2769_v52, 0.0 }
 0x4d7   :  { %4072 = vtanh.f32 %v2639_v27 }
 0x4d8   :  { %3024 = vmatpush.msra.mxu0 %v2973_v46  ;;  %v6457_v23 = vpop.xlane.xlu1 %2517  ;;  %v4069_v46 = vpop.eup %4068 }
 0x4d9   :  { %v2785_v42 = vmul.f32 %v4069_v46, %v6041_v58  ;;  %v4071_v52 = vpop.eup %4070  ;;  %v6484_v58 = vld [vmem:[%s6800_s8] ss:$0 sm:$0xff]  ;;  %s4408_s8 = smov [#allocation7]  }
 0x4da   :  { %3025 = vmatpush.msra.mxu0 %v2972_v2  ;;  %v2636_v2 = vadd.f32 %v7066_v39, %v6274_v25  ;;  %v2802_v62 = vmul.f32 %v6484_v58, %v4071_v52  ;;  %v2500_v25 = vpop.xlane.xlu0 %2499  ;;  %s3687_s27 = sshll.u32 %s4408_s8, 4  ;;  %s3688_s27 = int_to_ptr.vmem [resolvable:$true] %s3687_s27 }
 0x4db   :  { %v2866_v9 = vsel %vm2404_vm14, %v2785_v42, 0.0  ;;  %v2663_v46 = vadd.f32 %v6344_v59, %v2500_v25 }
 0x4dc   :  { %3026 = vmatpush.msra.mxu0 %v2971_v40 }
 0x4dd   :  { %2819 = vadd.xlane.f32.xlu0 %v2818_v7  ;;  %v4073_v29 = vpop.eup %4072 }
 0x4de   :  { %2544 = vadd.xlane.f32.xlu1 %v2543_v12  ;;  %v2546_v12 = vsel %vm2404_vm14, %v2402_v20, 0.0  ;;  %v2686_v1 = vpop.f32.mrf.mxu3  ;;  %v2792_v27 = vmul.f32 %v6484_v58, %v4073_v29 }
 0x4e0   :  { %v2521_v41 = vpop.xlane.xlu1 %2520  ;;  %v2887_v42 = vsel %vm2404_vm14, %v2792_v27, 0.0 }
 0x4e1   :  { %v2684_v4 = vadd.f32 %v2683_v61, %v2521_v41  ;;  %v2917_v41 = vsel %vm2404_vm14, %v2802_v62, 0.0 }
 0x4e3   :  { %4074 = vtanh.f32 %v2684_v4 }
 0x4e4   :  { %4076 = vtanh.f32 %v2636_v2 }
 0x4e5   :  { %2867 = vadd.xlane.f32.xlu0 %v2866_v9  ;;  %v7067_v9 = vld [vmem:[#allocation42_spill] sm:$0xff] }
 0x4e6   :  { %2547 = vadd.xlane.f32.xlu1 %v2546_v12  ;;  %v2689_v20 = vpop.f32.mrf.mxu3  ;;  %v3846_v52 = vadd.f32 -1.0, %v7067_v9  ;;  %v7069_v9 = vld [vmem:[#allocation23_spill] sm:$0xff] }
 0x4e8   :  { %v2524_v40 = vpop.xlane.xlu1 %2523  ;;  %v1821_v62 = vmul.f32 49.0, %v3846_v52 }
 0x4e9   :  { %v4075_v61 = vpop.eup %4074  ;;  %v2687_v45 = vadd.f32 %v2686_v1, %v2524_v40  ;;  %v1771_v40 = vcvt.s32.f32 %v5741_v6 }
 0x4ea   :  { %v2807_v7 = vmul.f32 %v6484_v58, %v4075_v61  ;;  %v4077_v4 = vpop.eup %4076 }
 0x4eb   :  { %4078 = vtanh.f32 %v2687_v45  ;;  %v2791_v29 = vmul.f32 %v6484_v58, %v4077_v4  ;;  %v1870_v27 = vsub.f32 %v1771_v40, %v1821_v62  ;;  %v2352_v4 = vpop.f32.mrf.mxu2  ;;  %v7070_v40 = vld [vmem:[#allocation20_spill] sm:$0xff] }
 0x4ec   :  { %v2932_v60 = vsel %vm2404_vm14, %v2807_v7, 0.0  ;;  %4080 = vtanh.f32 %v2663_v46  ;;  %v2627_v62 = vadd.f32 %v7070_v40, %v6226_v16 }
 0x4ed   :  { %2933 = vadd.xlane.f32.xlu2 %v2932_v60  ;;  %2918 = vadd.xlane.f32.xlu0 %v2917_v41  ;;  %v2884_v61 = vsel %vm2404_vm14, %v2791_v29, 0.0  ;;  %v7068_v60 = vld [vmem:[#allocation26_spill] sm:$0xff]  ;;  %vm1919_vm8 = vcmp.eq.f32.partialorder %v5527_v24, %v1870_v27 }
 0x4ee   :  { %2888 = vadd.xlane.f32.xlu1 %v2887_v42  ;;  %v2633_v41 = vadd.f32 %v7068_v60, %v6253_v36  ;;  %v2630_v36 = vadd.f32 %v7069_v9, %v6240_v47  ;;  %v2692_v29 = vpop.f32.mrf.mxu3  ;;  %v7071_v60 = vld [vmem:[#allocation21_spill] sm:$0xff] }
 0x4f0   :  { %v2527_v39 = vpop.xlane.xlu1 %2526 }
 0x4f1   :  { %v4079_v2 = vpop.eup %4078  ;;  %v2690_v12 = vadd.f32 %v2689_v20, %v2527_v39  ;;  %v6509_v39 = vsel %vm1919_vm8, 1.0, %v6954_v43 }
 0x4f2   :  { %v2808_v59 = vmul.f32 %v6484_v58, %v4079_v2  ;;  %v4081_v25 = vpop.eup %4080  ;;  %v2403_v2 = vmul.f32 %v6509_v39, %v2352_v4 }
 0x4f3   :  { %4082 = vtanh.f32 %v2690_v12  ;;  %v2800_v7 = vmul.f32 %v6484_v58, %v4081_v25 }
 0x4f4   :  { %v2935_v1 = vsel %vm2404_vm14, %v2808_v59, 0.0  ;;  %4084 = vtanh.f32 %v2633_v41  ;;  %v2549_v52 = vsel %vm2404_vm14, %v2403_v2, 0.0  ;;  %v2624_v41 = vadd.f32 %v7071_v60, %v6214_v37 }
 0x4f5   :  { %2936 = vadd.xlane.f32.xlu2 %v2935_v1  ;;  %v2911_v6 = vsel %vm2404_vm14, %v2800_v7, 0.0  ;;  %4086 = vtanh.f32 %v2630_v36 }
 0x4f6   :  { %2885 = vadd.xlane.f32.xlu1 %v2884_v61  ;;  %v2695_v4 = vpop.f32.mrf.mxu3 }
 0x4f9   :  { %v4083_v45 = vpop.eup %4082 }
 0x4fa   :  { %v2809_v46 = vmul.f32 %v6484_v58, %v4083_v45  ;;  %v4085_v12 = vpop.eup %4084  ;;  %v2503_v45 = vpop.xlane.xlu0 %2502 }
 0x4fb   :  { %v2790_v1 = vmul.f32 %v6484_v58, %v4085_v12  ;;  %v4087_v25 = vpop.eup %4086  ;;  %v7072_v12 = vld [vmem:[#allocation19_spill] sm:$0xff] }
 0x4fc   :  { %v2938_v42 = vsel %vm2404_vm14, %v2809_v46, 0.0  ;;  %v2789_v7 = vmul.f32 %v6484_v58, %v4087_v25 }
 0x4fd   :  { %2939 = vadd.xlane.f32.xlu2 %v2938_v42  ;;  %v2881_v61 = vsel %vm2404_vm14, %v2790_v1, 0.0 }
 0x4fe   :  { %2912 = vadd.xlane.f32.xlu1 %v2911_v6  ;;  %v2878_v16 = vsel %vm2404_vm14, %v2789_v7, 0.0  ;;  %v2698_v60 = vpop.f32.mrf.mxu3 }
 0x500   :  { %v6506_v20 = vpop.xlane.xlu1 %2891 }
 0x502   :  { %v2512_v2 = vpop.xlane.xlu0 %2511 }
 0x503   :  { %v2675_v25 = vadd.f32 %v6400_v38, %v2512_v2 }
 0x506   :  { %2550 = vadd.xlane.f32.xlu1 %v2549_v52 }
 0x508   :  { %v2530_v24 = vpop.xlane.xlu1 %2529 }
 0x509   :  { %v2693_v59 = vadd.f32 %v2692_v29, %v2530_v24  ;;  %v2621_v29 = vadd.f32 %v7072_v12, %v6199_v3  ;;  %v7074_v12 = vld [vmem:[#allocation50_spill] sm:$0xff] }
 0x50b   :  { %4088 = vtanh.f32 %v2693_v59 }
 0x50c   :  { %4090 = vtanh.f32 %v2627_v62 }
 0x50d   :  { %4092 = vtanh.f32 %v2624_v41 }
 0x50e   :  { %2882 = vadd.xlane.f32.xlu1 %v2881_v61 }
 0x510   :  { %v6519_v47 = vpop.xlane.xlu1 %2894 }
 0x511   :  { %v4089_v27 = vpop.eup %4088 }
 0x512   :  { %v2810_v46 = vmul.f32 %v6484_v58, %v4089_v27  ;;  %v4091_v6 = vpop.eup %4090 }
 0x513   :  { %v2788_v52 = vmul.f32 %v6484_v58, %v4091_v6  ;;  %v4093_v24 = vpop.eup %4092 }
 0x514   :  { %v2941_v42 = vsel %vm2404_vm14, %v2810_v46, 0.0  ;;  %v2787_v62 = vmul.f32 %v6484_v58, %v4093_v24 }
 0x515   :  { %2942 = vadd.xlane.f32.xlu2 %v2941_v42  ;;  %v2875_v37 = vsel %vm2404_vm14, %v2788_v52, 0.0  ;;  %v7073_v42 = vld [vmem:[#allocation51_spill] sm:$0xff] }
 0x516   :  { %2879 = vadd.xlane.f32.xlu1 %v2878_v16  ;;  %v2872_v3 = vsel %vm2404_vm14, %v2787_v62, 0.0 }
 0x518   :  { %v2533_v9 = vpop.xlane.xlu1 %2532 }
 0x519   :  { %v2696_v36 = vadd.f32 %v2695_v4, %v2533_v9  ;;  %v2666_v9 = vadd.f32 %v6356_v22, %v2503_v45 }
 0x51b   :  { %4094 = vtanh.f32 %v2696_v36 }
 0x51c   :  { %4096 = vtanh.f32 %v2621_v29 }
 0x51d   :  { %4098 = vtanh.f32 %v2675_v25  ;;  %v2701_v25 = vpop.f32.mrf.mxu3 }
 0x51e   :  { %2876 = vadd.xlane.f32.xlu1 %v2875_v37 }
 0x520   :  { %v6531_v59 = vpop.xlane.xlu0 %2909 }
 0x521   :  { %v4095_v1 = vpop.eup %4094  ;;  %v6533_v40 = vpop.xlane.xlu1 %2897 }
 0x522   :  { %v2811_v61 = vmul.f32 %v6484_v58, %v4095_v1  ;;  %v4097_v7 = vpop.eup %4096 }
 0x523   :  { %v2786_v6 = vmul.f32 %v6484_v58, %v4097_v7  ;;  %v4099_v2 = vpop.eup %4098 }
 0x524   :  { %v2944_v27 = vsel %vm2404_vm14, %v2811_v61, 0.0  ;;  %v2804_v37 = vmul.f32 %v6484_v58, %v4099_v2 }
 0x525   :  { %2945 = vadd.xlane.f32.xlu2 %v2944_v27  ;;  %v2869_v38 = vsel %vm2404_vm14, %v2786_v6, 0.0 }
 0x526   :  { %2873 = vadd.xlane.f32.xlu1 %v2872_v3  ;;  %v2923_v22 = vsel %vm2404_vm14, %v2804_v37, 0.0  ;;  %v7075_v3 = vld [vmem:[#allocation49_spill] sm:$0xff] }
 0x528   :  { %v2835_v46 = vpop.xlane.xlu0 %2834 }
 0x529   :  { %v2536_v41 = vpop.xlane.xlu1 %2535  ;;  %v2970_v16 = vmul.f32 %v7073_v42, %v2835_v46 }
 0x52a   :  { %v2699_v4 = vadd.f32 %v2698_v60, %v2536_v41 }
 0x52b   :  { %3027 = vmatpush.msra.mxu0 %v2970_v16 }
 0x52c   :  { %4100 = vtanh.f32 %v2699_v4  ;;  %v7076_v4 = vld [vmem:[#allocation48_spill] sm:$0xff] }
 0x52d   :  { %4102 = vtanh.f32 %v2666_v9 }
 0x52e   :  { %2870 = vadd.xlane.f32.xlu1 %v2869_v38 }
 0x530   :  { %v2832_v36 = vpop.xlane.xlu0 %2831 }
 0x531   :  { %v6544_v52 = vpop.xlane.xlu1 %2900  ;;  %v2969_v29 = vmul.f32 %v7074_v12, %v2832_v36  ;;  %v2704_v36 = vpop.f32.mrf.mxu3 }
 0x532   :  { %v4101_v24 = vpop.eup %4100 }
 0x533   :  { %3028 = vmatpush.msra.mxu0 %v2969_v29  ;;  %v2812_v1 = vmul.f32 %v6484_v58, %v4101_v24  ;;  %v4103_v45 = vpop.eup %4102 }
 0x534   :  { %v2801_v46 = vmul.f32 %v6484_v58, %v4103_v45 }
 0x535   :  { %v2947_v62 = vsel %vm2404_vm14, %v2812_v1, 0.0  ;;  %v7077_v1 = vld [vmem:[#allocation47_spill] sm:$0xff] }
 0x536   :  { %2948 = vadd.xlane.f32.xlu2 %v2947_v62  ;;  %2924 = vadd.xlane.f32.xlu1 %v2923_v22  ;;  %v2914_v41 = vsel %vm2404_vm14, %v2801_v46, 0.0 }
 0x538   :  { %v2829_v61 = vpop.xlane.xlu0 %2828 }
 0x539   :  { %v2539_v27 = vpop.xlane.xlu1 %2538  ;;  %v2968_v7 = vmul.f32 %v7075_v3, %v2829_v61  ;;  %v2707_v45 = vpop.f32.mrf.mxu3 }
 0x53a   :  { %v2702_v60 = vadd.f32 %v2701_v25, %v2539_v27  ;;  %v7078_v27 = vld [vmem:[#allocation46_spill] sm:$0xff] }
 0x53b   :  { %3029 = vmatpush.msra.mxu0 %v2968_v7 }
 0x53c   :  { %4104 = vtanh.f32 %v2702_v60 }
 0x53e   :  { %2915 = vadd.xlane.f32.xlu1 %v2914_v41 }
 0x540   :  { %v2826_v16 = vpop.xlane.xlu0 %2825 }
 0x541   :  { %v2904_v6 = vpop.xlane.xlu1 %2903  ;;  %v2967_v9 = vmul.f32 %v7076_v4, %v2826_v16 }
 0x542   :  { %v4105_v38 = vpop.eup %4104 }
 0x543   :  { %3030 = vmatpush.msra.mxu0 %v2967_v9  ;;  %v2813_v2 = vmul.f32 %v6484_v58, %v4105_v38  ;;  %v2710_v9 = vpop.f32.mrf.mxu3 }
 0x545   :  { %v2950_v29 = vsel %vm2404_vm14, %v2813_v2, 0.0 }
 0x546   :  { %2951 = vadd.xlane.f32.xlu2 %v2950_v29 }
 0x548   :  { %v2823_v37 = vpop.xlane.xlu0 %2822 }
 0x549   :  { %v2542_v24 = vpop.xlane.xlu1 %2541  ;;  %v2966_v62 = vmul.f32 %v7077_v1, %v2823_v37  ;;  %v2681_v37 = vadd.f32 %v6441_v34, %v6457_v23  ;;  %v2672_v23 = vadd.f32 %v6388_v31, %v6416_v50  ;;  %v2993_v50 = vmul.f32 %v6224_v32, %v2904_v6 }
 0x54a   :  { %v2705_v22 = vadd.f32 %v2704_v36, %v2542_v24 }
 0x54b   :  { %3031 = vmatpush.msra.mxu0 %v2966_v62 }
 0x54c   :  { %4106 = vtanh.f32 %v2705_v22 }
 0x550   :  { %v2820_v61 = vpop.xlane.xlu0 %2819 }
 0x551   :  { %v2545_v25 = vpop.xlane.xlu1 %2544  ;;  %v2965_v7 = vmul.f32 %v7078_v27, %v2820_v61  ;;  %v2678_v61 = vadd.f32 %v6414_v44, %v6433_v26  ;;  %v2907_v26 = vpop.xlane.xlu2 %2906 }
 0x552   :  { %v4107_v46 = vpop.eup %4106  ;;  %v2708_v60 = vadd.f32 %v2707_v45, %v2545_v25  ;;  %v2994_v31 = vmul.f32 %v6145_v55, %v2907_v26  ;;  %v7083_v26 = vld [vmem:[#allocation69_spill] sm:$0xff] }
 0x553   :  { %3032 = vmatpush.msra.mxu0 %v2965_v7  ;;  %v2814_v41 = vmul.f32 %v6484_v58, %v4107_v46 }
 0x554   :  { %4108 = vtanh.f32 %v2708_v60 }
 0x555   :  { %v2953_v16 = vsel %vm2404_vm14, %v2814_v41, 0.0 }
 0x556   :  { %2954 = vadd.xlane.f32.xlu2 %v2953_v16 }
 0x559   :  { %v2548_v38 = vpop.xlane.xlu1 %2547 }
 0x55a   :  { %v4109_v2 = vpop.eup %4108  ;;  %v2711_v36 = vadd.f32 %v2710_v9, %v2548_v38  ;;  %v2995_v38 = vmul.f32 %v6171_v8, %v6531_v59  ;;  %v2991_v59 = vmul.f32 %v6164_v48, %v6533_v40 }
 0x55b   :  { %v2815_v29 = vmul.f32 %v6484_v58, %v4109_v2 }
 0x55c   :  { %4110 = vtanh.f32 %v2711_v36 }
 0x55d   :  { %v2956_v24 = vsel %vm2404_vm14, %v2815_v29, 0.0  ;;  %4112 = vtanh.f32 %v2681_v37  ;;  %v2713_v29 = vpop.f32.mrf.mxu3 }
 0x55e   :  { %2957 = vadd.xlane.f32.xlu2 %v2956_v24  ;;  %4114 = vtanh.f32 %v2678_v61 }
 0x55f   :  { %4116 = vtanh.f32 %v2672_v23 }
 0x561   :  { %v2889_v62 = vpop.xlane.xlu1 %2888 }
 0x562   :  { %v4111_v22 = vpop.eup %4110 }
 0x563   :  { %v2816_v45 = vmul.f32 %v6484_v58, %v4111_v22  ;;  %v4113_v7 = vpop.eup %4112  ;;  %v2992_v22 = vmul.f32 %v6197_v0, %v6544_v52 }
 0x564   :  { %v2806_v34 = vmul.f32 %v6484_v58, %v4113_v7  ;;  %v4115_v41 = vpop.eup %4114  ;;  %v7080_v7 = vld [vmem:[#allocation31_spill] sm:$0xff] }
 0x565   :  { %v2959_v25 = vsel %vm2404_vm14, %v2816_v45, 0.0  ;;  %v2805_v9 = vmul.f32 %v6484_v58, %v4115_v41  ;;  %v4117_v36 = vpop.eup %4116 }
 0x566   :  { %2960 = vadd.xlane.f32.xlu2 %v2959_v25  ;;  %v2929_v60 = vsel %vm2404_vm14, %v2806_v34, 0.0  ;;  %v2803_v24 = vmul.f32 %v6484_v58, %v4117_v36  ;;  %v7079_v25 = vld [vmem:[#allocation29_spill] sm:$0xff]  ;;  %v2989_v34 = vmul.f32 %v7080_v7, %v6506_v20  ;;  %v7084_v20 = vld [vmem:[#allocation68_spill] sm:$0xff]  ;;  %v2934_v36 = vpop.xlane.xlu2 %2933 }
 0x567   :  { %v2926_v2 = vsel %vm2404_vm14, %v2805_v9, 0.0  ;;  %v2990_v6 = vmul.f32 %v7079_v25, %v6519_v47 }
 0x568   :  { %v2920_v61 = vsel %vm2404_vm14, %v2803_v24, 0.0  ;;  %v2868_v24 = vpop.xlane.xlu0 %2867 }
 0x569   :  { %v2886_v46 = vpop.xlane.xlu1 %2885 }
 0x56e   :  { %2930 = vadd.xlane.f32.xlu2 %v2929_v60  ;;  %v7081_v60 = vld [vmem:[#allocation41_spill] sm:$0xff] }
 0x56f   :  { %v2988_v41 = vmul.f32 %v7081_v60, %v2889_v62  ;;  %v7085_v62 = vld [vmem:[#allocation67_spill] sm:$0xff] }
 0x571   :  { %v2913_v16 = vpop.xlane.xlu1 %2912 }
 0x572   :  { %v2996_v44 = vmul.f32 %v6251_v17, %v2913_v16  ;;  %v7082_v16 = vld [vmem:[#allocation70_spill] sm:$0xff] }
 0x573   :  { %v2987_v9 = vmul.f32 %v7082_v16, %v2886_v46  ;;  %v7086_v46 = vld [vmem:[#allocation66_spill] sm:$0xff] }
 0x574   :  { %3037 = vmatpush.msra.mxu1 %v2996_v44 }
 0x576   :  { %2927 = vadd.xlane.f32.xlu2 %v2926_v2  ;;  %3038 = vmatpush.msra.mxu1 %v2995_v38 }
 0x578   :  { %3039 = vmatpush.msra.mxu1 %v2994_v31 }
 0x579   :  { %v2551_v37 = vpop.xlane.xlu1 %2550 }
 0x57a   :  { %v2714_v45 = vadd.f32 %v2713_v29, %v2551_v37  ;;  %3040 = vmatpush.msra.mxu1 %v2993_v50 }
 0x57c   :  { %4118 = vtanh.f32 %v2714_v45  ;;  %3041 = vmatpush.msra.mxu1 %v2992_v22 }
 0x57e   :  { %2921 = vadd.xlane.f32.xlu2 %v2920_v61  ;;  %3042 = vmatpush.msra.mxu1 %v2991_v59  ;;  %v7087_v59 = vld [vmem:[#allocation65_spill] sm:$0xff] }
 0x580   :  { %3043 = vmatpush.msra.mxu1 %v2990_v6  ;;  %v7088_v6 = vld [vmem:[#allocation64_spill] sm:$0xff] }
 0x581   :  { %v2883_v23 = vpop.xlane.xlu1 %2882 }
 0x582   :  { %v4119_v52 = vpop.eup %4118  ;;  %3044 = vmatpush.msra.mxu1 %v2989_v34  ;;  %v2986_v47 = vmul.f32 %v7083_v26, %v2883_v23  ;;  %v2981_v34 = vmul.f32 %v7088_v6, %v2868_v24  ;;  %v4407_v24 = vmov 1.0  }
 0x583   :  { %v2817_v40 = vmul.f32 %v6484_v58, %v4119_v52  ;;  %v2937_v58 = vpop.xlane.xlu2 %2936 }
 0x584   :  { %3045 = vmatpush.msra.mxu1 %v2988_v41 }
 0x585   :  { %v2962_v44 = vsel %vm2404_vm14, %v2817_v40, 0.0 }
 0x586   :  { %2963 = vadd.xlane.f32.xlu2 %v2962_v44  ;;  %3046 = vmatpush.msra.mxu1 %v2987_v9  ;;  %v7089_v44 = vld [vmem:[#allocation33_spill] sm:$0xff] }
 0x588   :  { %3047 = vmatpush.msra.mxu1 %v2986_v47  ;;  %v2026_v47 = vadd.s32 1, %v7089_v44 }
 0x589   :  { %v2880_v38 = vpop.xlane.xlu1 %2879 }
 0x58a   :  { %v2985_v2 = vmul.f32 %v7084_v20, %v2880_v38  ;;  %v2021_v38 = vmul.u32 49, %v7089_v44 }
 0x58b   :  { %v2940_v22 = vpop.xlane.xlu2 %2939 }
 0x58c   :  { %3048 = vmatpush.msra.mxu1 %v2985_v2  ;;  %v2027_v2 = vmul.u32 49, %v2026_v47 }
 0x591   :  { %v2877_v31 = vpop.xlane.xlu1 %2876 }
 0x592   :  { %v2984_v50 = vmul.f32 %v7085_v62, %v2877_v31  ;;  %v7090_v31 = vld [vmem:[#allocation34_spill] sm:$0xff] }
 0x593   :  { %v2943_v23 = vpop.xlane.xlu2 %2942  ;;  %vm2022_vm0 = vcmp.ge.s32.totalorder %v7090_v31, %v2021_v38  ;;  %vm2028_vm11 = vcmp.lt.s32.totalorder %v7090_v31, %v2027_v2 }
 0x594   :  { %3049 = vmatpush.msra.mxu1 %v2984_v50  ;;  %v2018_v50 = vadd.s32 128, %v7090_v31  ;;  %vm6605_vm7 = vmand %vm2022_vm0, %vm2028_vm11 }
 0x595   :  { %3949 = vmatmul.msk.f32.vlgmr.msra.gmra.mxu0 %vm6605_vm7, %v4407_v24 }
 0x596   :  { %vm2023_vm12 = vcmp.ge.s32.totalorder %v2018_v50, %v2021_v38  ;;  %vm2029_vm3 = vcmp.lt.s32.totalorder %v2018_v50, %v2027_v2 }
 0x597   :  { %vm6611_vm4 = vmand %vm2023_vm12, %vm2029_vm3 }
 0x599   :  { %v2874_v29 = vpop.xlane.xlu1 %2873 }
 0x59a   :  { %v2983_v37 = vmul.f32 %v7086_v46, %v2874_v29 }
 0x59b   :  { %v2946_v52 = vpop.xlane.xlu2 %2945 }
 0x59c   :  { %3050 = vmatpush.msra.mxu1 %v2983_v37  ;;  %v7091_v37 = vmov 0  ;;  %v3007_v6 = vmul.f32 %v6354_v53, %v2946_v52 }
 0x59d   :  { %v7092_v37 = vsel %vm6605_vm7, 4294967295, %v7091_v37 }
 0x59e   :  { %7093 = vst [vmem:[#allocation24_spill] sm:$0xff] %v7092_v37 }
 0x5a1   :  { %v2871_v45 = vpop.xlane.xlu1 %2870 }
 0x5a2   :  { %v2982_v61 = vmul.f32 %v7087_v59, %v2871_v45  ;;  %v7094_v45 = vmov 0 }
 0x5a3   :  { %v7095_v45 = vsel %vm6611_vm4, 4294967295, %v7094_v45 }
 0x5a4   :  { %3051 = vmatpush.msra.mxu1 %v2982_v61  ;;  %7096 = vst [vmem:[#allocation11_spill] sm:$0xff] %v7095_v45  ;;  %v3006_v45 = vmul.f32 %v6335_v33, %v2943_v23  ;;  %v7097_v23 = vld [vmem:[#allocation25_spill] sm:$0xff] }
 0x5a6   :  { %3052 = vmatpush.msra.mxu1 %v2981_v34 }
 0x5a7   :  { %3950 = vmatmul.msk.f32.vlgmr.msra.gmra.mxu1 %vm6611_vm4, %v4407_v24 }
 0x5a9   :  { %v2949_v41 = vpop.xlane.xlu2 %2948 }
 0x5aa   :  { %v3008_v27 = vmul.f32 %v6380_v57, %v2949_v41 }
 0x5b9   :  { %v2952_v40 = vpop.xlane.xlu2 %2951 }
 0x5ba   :  { %v3009_v50 = vmul.f32 %v6403_v56, %v2952_v40  ;;  %v3003_v40 = vmul.f32 %v6297_v5, %v2934_v36 }
 0x5c9   :  { %v2955_v9 = vpop.xlane.xlu2 %2954 }
 0x5ca   :  { %v3010_v47 = vmul.f32 %v6436_v11, %v2955_v9  ;;  %v3004_v9 = vmul.f32 %v6310_v15, %v2937_v58  ;;  %v2919_v58 = vpop.xlane.xlu0 %2918 }
 0x5d1   :  { %v2958_v29 = vpop.xlane.xlu2 %2957 }
 0x5d2   :  { %v3011_v44 = vmul.f32 %v6460_v28, %v2958_v29 }
 0x5d9   :  { %v2961_v61 = vpop.xlane.xlu2 %2960 }
 0x5da   :  { %v3012_v34 = vmul.f32 %v6473_v19, %v2961_v61  ;;  %v3005_v61 = vmul.f32 %v6320_v54, %v2940_v22  ;;  %v2019_v22 = vadd.s32 256, %v7090_v31 }
 0x5dc   :  { %3057 = vmatpush.msrb.mxu0 %v3012_v34  ;;  %v2925_v34 = vpop.xlane.xlu1 %2924  ;;  %vm2024_vm15 = vcmp.ge.s32.totalorder %v2019_v22, %v2021_v38  ;;  %vm2030_vm5 = vcmp.lt.s32.totalorder %v2019_v22, %v2027_v2  ;;  %v4145_v22 = vld [vmem:[#allocation2 + $0x4c0] sm:$0xff] }
 0x5dd   :  { %vm6635_vm6 = vmand %vm2024_vm15, %vm2030_vm5 }
 0x5de   :  { %3058 = vmatpush.msrb.mxu0 %v3011_v44  ;;  %v7098_v44 = vld [vmem:[#allocation43_spill] sm:$0xff] }
 0x5e0   :  { %3059 = vmatpush.msrb.mxu0 %v3010_v47 }
 0x5e1   :  { %v2931_v37 = vpop.xlane.xlu2 %2930 }
 0x5e2   :  { %3060 = vmatpush.msrb.mxu0 %v3009_v50  ;;  %v3002_v41 = vmul.f32 %v6279_v10, %v2931_v37  ;;  %v7099_v37 = vld [vmem:[#allocation14_spill] sm:$0xff] }
 0x5e3   :  { %v2998_v50 = vmul.f32 %v7099_v37, %v2919_v58  ;;  %v4148_v58 = vld [vmem:[#allocation2 + $0x80] sm:$0xff] }
 0x5e4   :  { %3061 = vmatpush.msrb.mxu0 %v3008_v27  ;;  %v2020_v27 = vadd.s32 384, %v7090_v31  ;;  %v2916_v36 = vpop.xlane.xlu1 %2915  ;;  %v4195_v31 = vld [vmem:[#allocation2 + $0x3a8] sm:$0xff] }
 0x5e6   :  { %3062 = vmatpush.msrb.mxu0 %v3007_v6  ;;  %vm2025_vm10 = vcmp.ge.s32.totalorder %v2020_v27, %v2021_v38  ;;  %vm2031_vm9 = vcmp.lt.s32.totalorder %v2020_v27, %v2027_v2  ;;  %v4138_v38 = vld [vmem:[#allocation2 + $0x120] sm:$0xff] }
 0x5e7   :  { %vm2035_vm2 = vmand %vm2025_vm10, %vm2031_vm9  ;;  %v4139_v2 = vld [vmem:[#allocation2 + $0x520] sm:$0xff] }
 0x5e8   :  { %3063 = vmatpush.msrb.mxu0 %v3006_v45  ;;  %v3000_v45 = vmul.f32 %v7097_v23, %v2925_v34  ;;  %v4143_v27 = vld [vmem:[#allocation2 + $0x4e0] sm:$0xff] }
 0x5e9   :  { %v2928_v29 = vpop.xlane.xlu2 %2927 }
 0x5ea   :  { %3064 = vmatpush.msrb.mxu0 %v3005_v61  ;;  %v3001_v52 = vmul.f32 %v6259_v13, %v2928_v29  ;;  %v7100_v61 = vld [vmem:[#allocation15_spill] sm:$0xff] }
 0x5eb   :  { %v2997_v29 = vmul.f32 %v7100_v61, %v2916_v36  ;;  %v4151_v36 = vld [vmem:[#allocation2 + $0x460] sm:$0xff] }
 0x5ec   :  { %3065 = vmatpush.msrb.mxu0 %v3004_v9 }
 0x5ee   :  { %3066 = vmatpush.msrb.mxu0 %v3003_v40  ;;  %v6641_v40 = vsel %vm2035_vm2, 1.0, %v6954_v43 }
 0x5f0   :  { %3067 = vmatpush.msrb.mxu0 %v3002_v41  ;;  %v4141_v41 = vld [vmem:[#allocation2 + $0x500] sm:$0xff] }
 0x5f1   :  { %v2922_v6 = vpop.xlane.xlu2 %2921 }
 0x5f2   :  { %3068 = vmatpush.msrb.mxu0 %v3001_v52  ;;  %v2999_v47 = vmul.f32 %v7098_v44, %v2922_v6  ;;  %v4142_v52 = vld [vmem:[#allocation2 + $0xe0] sm:$0xff] }
 0x5f3   :  { %v4144_v6 = vld [vmem:[#allocation2 + $0xc0] sm:$0xff] }
 0x5f4   :  { %3069 = vmatpush.msrb.mxu0 %v3000_v45  ;;  %v4147_v45 = vld [vmem:[#allocation2 + $0x4a0] sm:$0xff] }
 0x5f6   :  { %3070 = vmatpush.msrb.mxu0 %v2999_v47  ;;  %v4150_v47 = vld [vmem:[#allocation2 + $0x60] sm:$0xff] }
 0x5f8   :  { %3071 = vmatpush.msrb.mxu0 %v2998_v50  ;;  %v4153_v50 = vld [vmem:[#allocation2 + $0x440] sm:$0xff] }
 0x5f9   :  { %v2964_v9 = vpop.xlane.xlu2 %2963 }
 0x5fa   :  { %v3013_v34 = vmul.f32 %v6509_v39, %v2964_v9  ;;  %3072 = vmatpush.msrb.mxu0 %v2997_v29  ;;  %v4155_v29 = vld [vmem:[#allocation2 + $0x420] sm:$0xff] }
 0x5fb   :  { %3951 = vmatmul.msk.f32.vlgmr.msrb.gmra.mxu0 %vm6635_vm6, %v4407_v24  ;;  %v4140_v24 = vld [vmem:[#allocation2 + $0x100] sm:$0xff] }
 0x5fc   :  { %3970 = vmatpush.xpose.msk.msra.mxu0 %vm2404_vm14, %v6251_v17  ;;  %3092 = vmatpush.msrb.mxu1 %v3013_v34  ;;  %v4156_v9 = vld [vmem:[#allocation2] sm:$0xff] }
 0x5fd   :  { %3952 = vmatmul.msk.f32.vlgmr.msrb.gmra.mxu1 %vm1526_vm1, %v6641_v40  ;;  %v4157_v34 = vld [vmem:[#allocation2 + $0x400] sm:$0xff] }
 0x5fe   :  { %3953 = vmatpush.xpose.msk.msra.mxu1 %vm2404_vm14, %v5898_v51  ;;  %v7103_v51 = vld [vmem:[#allocation59_spill] sm:$0xff] }
 0x600   :  { %3971 = vmatpush.xpose.msk.msra.mxu0 %vm2404_vm14, %v6171_v8  ;;  %v7106_v8 = vld [vmem:[#allocation46_spill] sm:$0xff] }
 0x602   :  { %3954 = vmatpush.xpose.msk.msra.mxu1 %vm2404_vm14, %v7052_v63 }
 0x604   :  { %3972 = vmatpush.xpose.msk.msra.mxu0 %vm2404_vm14, %v6145_v55  ;;  %v7104_v55 = vld [vmem:[#allocation53_spill] sm:$0xff] }
 0x606   :  { %3955 = vmatpush.xpose.msk.msra.mxu1 %vm2404_vm14, %v7055_v49 }
 0x608   :  { %3973 = vmatpush.xpose.msk.msra.mxu0 %vm2404_vm14, %v6224_v32 }
 0x60a   :  { %3956 = vmatpush.xpose.msk.msra.mxu1 %vm2404_vm14, %v7056_v21 }
 0x60c   :  { %3974 = vmatpush.xpose.msk.msra.mxu0 %vm2404_vm14, %v6197_v0 }
 0x60e   :  { %3957 = vmatpush.xpose.msk.msra.mxu1 %vm2404_vm14, %v7103_v51  ;;  %v4158_v51 = vld [vmem:[#allocation2 + $0x3e0] sm:$0xff] }
 0x610   :  { %3975 = vmatpush.xpose.msk.msra.mxu0 %vm2404_vm14, %v6164_v48  ;;  %v7105_v48 = vld [vmem:[#allocation64_spill] sm:$0xff] }
 0x612   :  { %3958 = vmatpush.xpose.msk.msra.mxu1 %vm2404_vm14, %v7059_v18  ;;  %v3034_v0 = vpop.f32.mrf.mxu0 }
 0x614   :  { %3976 = vmatpush.xpose.msk.msra.mxu0 %vm2404_vm14, %v7079_v25  ;;  %v4129_v25 = vld [vmem:[#allocation2 + $0x5c0] sm:$0xff] }
 0x616   :  { %3959 = vmatpush.xpose.msk.msra.mxu1 %vm2404_vm14, %v7061_v14 }
 0x618   :  { %3977 = vmatpush.xpose.msk.msra.mxu0 %vm2404_vm14, %v7080_v7  ;;  %v4130_v7 = vld [vmem:[#allocation2 + $0x1a0] sm:$0xff] }
 0x61a   :  { %3960 = vmatpush.xpose.msk.msra.mxu1 %vm2404_vm14, %v7062_v30 }
 0x61c   :  { %3978 = vmatpush.xpose.msk.msra.mxu0 %vm2404_vm14, %v7081_v60  ;;  %v4131_v60 = vld [vmem:[#allocation2 + $0x5a0] sm:$0xff] }
 0x61e   :  { %3961 = vmatpush.xpose.msk.msra.mxu1 %vm2404_vm14, %v7104_v55  ;;  %v4159_v55 = vld [vmem:[#allocation2 + $0x1e8] sm:$0xff] }
 0x620   :  { %3979 = vmatpush.xpose.msk.msra.mxu0 %vm2404_vm14, %v7082_v16  ;;  %v4132_v16 = vld [vmem:[#allocation2 + $0x180] sm:$0xff] }
 0x622   :  { %3962 = vmatpush.xpose.msk.msra.mxu1 %vm2404_vm14, %v7064_v35 }
 0x624   :  { %3980 = vmatpush.xpose.msk.msra.mxu0 %vm2404_vm14, %v7083_v26  ;;  %v3054_v32 = vpop.f32.mrf.mxu1  ;;  %v4133_v26 = vld [vmem:[#allocation2 + $0x580] sm:$0xff] }
 0x625   :  { %v3055_v17 = vadd.f32 %v3054_v32, %v3034_v0  ;;  %v4162_v0 = vld [vmem:[#allocation2 + $0x3a0] sm:$0xff]  ;;  %v4163_v32 = vld [vmem:[#allocation2 + $0x1a8] sm:$0xff] }
 0x626   :  { %3963 = vmatpush.xpose.msk.msra.mxu1 %vm2404_vm14, %v7073_v42 }
 0x628   :  { %3981 = vmatpush.xpose.msk.msra.mxu0 %vm2404_vm14, %v7084_v20  ;;  %v4134_v20 = vld [vmem:[#allocation2 + $0x160] sm:$0xff] }
 0x62a   :  { %3964 = vmatpush.xpose.msk.msra.mxu1 %vm2404_vm14, %v7074_v12 }
 0x62c   :  { %3982 = vmatpush.xpose.msk.msra.mxu0 %vm2404_vm14, %v7085_v62  ;;  %v4135_v62 = vld [vmem:[#allocation2 + $0x560] sm:$0xff] }
 0x62e   :  { %3965 = vmatpush.xpose.msk.msra.mxu1 %vm2404_vm14, %v7075_v3  ;;  %v4126_v3 = vld [vmem:[#allocation2 + $0x1e0] sm:$0xff] }
 0x630   :  { %3983 = vmatpush.xpose.msk.msra.mxu0 %vm2404_vm14, %v7086_v46  ;;  %v4136_v46 = vld [vmem:[#allocation2 + $0x140] sm:$0xff] }
 0x632   :  { %3966 = vmatpush.xpose.msk.msra.mxu1 %vm2404_vm14, %v7076_v4  ;;  %v4127_v4 = vld [vmem:[#allocation2 + $0x5e0] sm:$0xff] }
 0x634   :  { %3984 = vmatpush.xpose.msk.msra.mxu0 %vm2404_vm14, %v7087_v59  ;;  %v4137_v59 = vld [vmem:[#allocation2 + $0x540] sm:$0xff] }
 0x636   :  { %3967 = vmatpush.xpose.msk.msra.mxu1 %vm2404_vm14, %v7077_v1  ;;  %v4128_v1 = vld [vmem:[#allocation2 + $0x1c0] sm:$0xff] }
 0x638   :  { %3985 = vmatpush.xpose.msk.msra.mxu0 %vm2404_vm14, %v7105_v48  ;;  %v4160_v48 = vld [vmem:[#allocation2 + $0x3c0] sm:$0xff] }
 0x63a   :  { %3968 = vmatpush.xpose.msk.msra.mxu1 %vm2404_vm14, %v7106_v8  ;;  %v4161_v8 = vld [vmem:[#allocation2 + $0x1c8] sm:$0xff] }
 0x63c   :  { %4004 = vmatpush.xpose.msk.msrb.mxu0 %vm2404_vm14, %v6509_v39 }
 0x63e   :  { %3987 = vmatpush.xpose.msk.msrb.mxu1 %vm2404_vm14, %v6473_v19 }
 0x642   :  { %3988 = vmatpush.xpose.msk.msrb.mxu1 %vm2404_vm14, %v6460_v28 }
 0x646   :  { %3989 = vmatpush.xpose.msk.msrb.mxu1 %vm2404_vm14, %v6436_v11 }
 0x64a   :  { %3990 = vmatpush.xpose.msk.msrb.mxu1 %vm2404_vm14, %v6403_v56 }
 0x64e   :  { %3991 = vmatpush.xpose.msk.msrb.mxu1 %vm2404_vm14, %v6380_v57 }
 0x652   :  { %3992 = vmatpush.xpose.msk.msrb.mxu1 %vm2404_vm14, %v6354_v53 }
 0x656   :  { %3993 = vmatpush.xpose.msk.msrb.mxu1 %vm2404_vm14, %v6335_v33 }
 0x65a   :  { %3994 = vmatpush.xpose.msk.msrb.mxu1 %vm2404_vm14, %v6320_v54 }
 0x65e   :  { %3995 = vmatpush.xpose.msk.msrb.mxu1 %vm2404_vm14, %v6310_v15 }
 0x662   :  { %3996 = vmatpush.xpose.msk.msrb.mxu1 %vm2404_vm14, %v6297_v5 }
 0x666   :  { %3997 = vmatpush.xpose.msk.msrb.mxu1 %vm2404_vm14, %v6279_v10 }
 0x66a   :  { %3998 = vmatpush.xpose.msk.msrb.mxu1 %vm2404_vm14, %v6259_v13 }
 0x66e   :  { %3999 = vmatpush.xpose.msk.msrb.mxu1 %vm2404_vm14, %v7097_v23  ;;  %v4146_v23 = vld [vmem:[#allocation2 + $0xa0] sm:$0xff] }
 0x672   :  { %4000 = vmatpush.xpose.msk.msrb.mxu1 %vm2404_vm14, %v7098_v44  ;;  %v4149_v44 = vld [vmem:[#allocation2 + $0x480] sm:$0xff] }
 0x676   :  { %4001 = vmatpush.xpose.msk.msrb.mxu1 %vm2404_vm14, %v7099_v37  ;;  %v4152_v37 = vld [vmem:[#allocation2 + $0x40] sm:$0xff] }
 0x678   :  { %v3074_v5 = vpop.f32.mrf.mxu0 }
 0x679   :  { %v3075_v10 = vadd.f32 %v3074_v5, %v3055_v17  ;;  %v4164_v17 = vld [vmem:[#allocation2 + $0x380] sm:$0xff]  ;;  %v4165_v5 = vld [vmem:[#allocation2 + $0x188] sm:$0xff] }
 0x67a   :  { %4002 = vmatpush.xpose.msk.msrb.mxu1 %vm2404_vm14, %v7100_v61  ;;  %v3094_v15 = vpop.f32.mrf.mxu1  ;;  %v4154_v61 = vld [vmem:[#allocation2 + $0x20] sm:$0xff] }
 0x67b   :  { %v3095_v54 = vadd.f32 %v3094_v15, %v3075_v10  ;;  %v4166_v10 = vld [vmem:[#allocation2 + $0x360] sm:$0xff]  ;;  %v4167_v15 = vld [vmem:[#allocation2 + $0x168] sm:$0xff] }
 0x67d   :  { %v3097_v13 = vsel %vm2404_vm14, %v3095_v54, -inf }
 0x67e   :  { %3098 = vmax.xlane.f32.xlu0 %v3097_v13  ;;  %v4169_v13 = vld [vmem:[#allocation2 + $0x148] sm:$0xff] }
 0x6f1   :  { %v3099_v33 = vpop.xlane.xlu0 %3098 }
 0x6f2   :  { %v3100_v53 = vsub.f32 %v3095_v54, %v3099_v33  ;;  %v4168_v54 = vld [vmem:[#allocation2 + $0x340] sm:$0xff] }
 0x6f3   :  { %v4170_v33 = vld [vmem:[#allocation2 + $0x320] sm:$0xff] }
 0x6f4   :  { %v3101_v57 = vmul.f32 1.442695, %v3100_v53  ;;  %v4171_v53 = vld [vmem:[#allocation2 + $0x128] sm:$0xff] }
 0x6f6   :  { %4120 = vpow2.f32 %v3101_v57  ;;  %v4172_v57 = vld [vmem:[#allocation2 + $0x300] sm:$0xff] }
 0x6fc   :  { %v4121_v56 = vpop.eup %4120 }
 0x6fd   :  { %v3103_v63 = vsel %vm2404_vm14, %v4121_v56, 0.0 }
 0x6fe   :  { %3104 = vadd.xlane.f32.xlu1 %v3103_v63  ;;  %v4174_v63 = vld [vmem:[#allocation2 + $0x2e0] sm:$0xff] }
 0x771   :  { %v3105_v49 = vpop.xlane.xlu1 %3104 }
 0x772   :  { %4122 = vrcp.f32 %v3105_v49  ;;  %v3117_v14 = vand.u32 2147483648, %v3105_v49  ;;  %v3115_v28 = vand.u32 2147483647, %v3105_v49  ;;  %vm3111_vm8 = vweird.f32 %v3105_v49 }
 0x774   :  { %v3118_v19 = vor.u32 1.1754944e-38, %v3117_v14  ;;  %vm3116_vm11 = vcmp.eq.f32.partialorder %v3115_v28, 8.507059e+37  ;;  %v4179_v14 = vld [vmem:[#allocation2 + $0xa8] sm:$0xff] }
 0x775   :  { %v4181_v28 = vld [vmem:[#allocation2 + $0x88] sm:$0xff] }
 0x778   :  { %v4123_v21 = vpop.eup %4122 }
 0x779   :  { %v3107_v11 = vmul.f32 %v4123_v21, %v3105_v49  ;;  %vm3112_vm13 = vweird.f32 %v4123_v21  ;;  %v4175_v49 = vld [vmem:[#allocation2 + $0xe8] sm:$0xff] }
 0x77a   :  { %vm3113_vm0 = vmor %vm3111_vm8, %vm3112_vm13 }
 0x77b   :  { %v3108_v18 = vsub.f32 1.0, %v3107_v11  ;;  %v4177_v11 = vld [vmem:[#allocation2 + $0xc8] sm:$0xff] }
 0x77d   :  { %v3109_v30 = vmul.f32 %v4123_v21, %v3108_v18  ;;  %v4178_v18 = vld [vmem:[#allocation2 + $0x2a0] sm:$0xff] }
 0x77f   :  { %v3110_v35 = vadd.f32 %v4123_v21, %v3109_v30  ;;  %v4180_v30 = vld [vmem:[#allocation2 + $0x280] sm:$0xff] }
 0x781   :  { %v3114_v39 = vsel %vm3113_vm0, %v4123_v21, %v3110_v35  ;;  %v4176_v21 = vld [vmem:[#allocation2 + $0x2c0] sm:$0xff] }
 0x782   :  { %v3119_v42 = vsel %vm3116_vm11, %v3118_v19, %v3114_v39  ;;  %v4182_v35 = vld [vmem:[#allocation2 + $0x260] sm:$0xff]  ;;  %v4183_v19 = vld [vmem:[#allocation2 + $0x68] sm:$0xff] }
 0x783   :  { %v3120_v12 = vmul.f32 %v4121_v56, %v3119_v42  ;;  %v4173_v56 = vld [vmem:[#allocation2 + $0x108] sm:$0xff]  ;;  %v4184_v39 = vld [vmem:[#allocation2 + $0x240] sm:$0xff] }
 0x784   :  { %v4185_v42 = vld [vmem:[#allocation2 + $0x48] sm:$0xff] }
 0x785   :  { %3969 = vmatmul.msk.f32.vlgmr.msra.gmra.mxu1 %vm2404_vm14, %v3120_v12  ;;  %3986 = vmatmul.msk.f32.vlgmr.msra.gmra.mxu0 %vm2404_vm14, %v3120_v12 }
 0x786   :  { %3358 = vmatpush.msra.mxu0 %v4126_v3  ;;  %3398 = vmatpush.msra.mxu1 %v4127_v4  ;;  %v4187_v3 = vld [vmem:[#allocation2 + $0x28] sm:$0xff]  ;;  %v4188_v4 = vld [vmem:[#allocation2 + $0x200] sm:$0xff] }
 0x788   :  { %3359 = vmatpush.msra.mxu0 %v4128_v1  ;;  %3399 = vmatpush.msra.mxu1 %v4129_v25  ;;  %v4189_v1 = vld [vmem:[#allocation2 + $0x8] sm:$0xff]  ;;  %v4241_v25 = vld [vmem:[#allocation2 + $0xf0] sm:$0xff] }
 0x78a   :  { %3360 = vmatpush.msra.mxu0 %v4130_v7  ;;  %3400 = vmatpush.msra.mxu1 %v4131_v60  ;;  %v3896_v7 = vsel %vm6605_vm7, 1.0, %v6954_v43 }
 0x78c   :  { %3361 = vmatpush.msra.mxu0 %v4132_v16  ;;  %3401 = vmatpush.msra.mxu1 %v4133_v26 }
 0x78d   :  { %4003 = vmatmul.msk.f32.vlgmr.msrb.gmra.mxu1 %vm2404_vm14, %v3120_v12  ;;  %4005 = vmatmul.msk.f32.vlgmr.msrb.gmra.mxu0 %vm2404_vm14, %v3120_v12  ;;  %v4186_v12 = vld [vmem:[#allocation2 + $0x220] sm:$0xff] }
 0x78e   :  { %3362 = vmatpush.msra.mxu0 %v4134_v20  ;;  %3402 = vmatpush.msra.mxu1 %v4135_v62  ;;  %v4190_v20 = vld [vmem:[#allocation2 + $0x600] sm:$0xff]  ;;  %v4246_v62 = vld [vmem:[#allocation2 + $0x290] sm:$0xff] }
 0x790   :  { %3363 = vmatpush.msra.mxu0 %v4136_v46  ;;  %3403 = vmatpush.msra.mxu1 %v4137_v59  ;;  %v3897_v46 = vsel %vm6611_vm4, 1.0, %v6954_v43  ;;  %v3898_v59 = vsel %vm6635_vm6, 1.0, %v6954_v43  ;;  %v4196_v43 = vld [vmem:[#allocation2 + $0x5a8] sm:$0xff] }
 0x792   :  { %3364 = vmatpush.msra.mxu0 %v4138_v38  ;;  %3404 = vmatpush.msra.mxu1 %v4139_v2 }
 0x794   :  { %3365 = vmatpush.msra.mxu0 %v4140_v24  ;;  %3405 = vmatpush.msra.mxu1 %v4141_v41  ;;  %v4191_v41 = vld [vmem:[#allocation2 + $0x3e8] sm:$0xff] }
 0x796   :  { %3366 = vmatpush.msra.mxu0 %v4142_v52  ;;  %3406 = vmatpush.msra.mxu1 %v4143_v27  ;;  %v4192_v52 = vld [vmem:[#allocation2 + $0x5e8] sm:$0xff] }
 0x797   :  { %v4193_v27 = vld [vmem:[#allocation2 + $0x3c8] sm:$0xff] }
 0x798   :  { %3367 = vmatpush.msra.mxu0 %v4144_v6  ;;  %3407 = vmatpush.msra.mxu1 %v4145_v22  ;;  %v4194_v6 = vld [vmem:[#allocation2 + $0x5c8] sm:$0xff] }
 0x79a   :  { %3368 = vmatpush.msra.mxu0 %v4146_v23  ;;  %3408 = vmatpush.msra.mxu1 %v4147_v45  ;;  %v4197_v45 = vld [vmem:[#allocation2 + $0x388] sm:$0xff] }
 0x79c   :  { %3369 = vmatpush.msra.mxu0 %v4148_v58  ;;  %3409 = vmatpush.msra.mxu1 %v4149_v44  ;;  %v4198_v58 = vld [vmem:[#allocation2 + $0x588] sm:$0xff] }
 0x79d   :  { %v4199_v44 = vld [vmem:[#allocation2 + $0x368] sm:$0xff] }
 0x79e   :  { %3370 = vmatpush.msra.mxu0 %v4150_v47  ;;  %3410 = vmatpush.msra.mxu1 %v4151_v36  ;;  %v4200_v47 = vld [vmem:[#allocation2 + $0x568] sm:$0xff] }
 0x79f   :  { %v4201_v36 = vld [vmem:[#allocation2 + $0x348] sm:$0xff] }
 0x7a0   :  { %3371 = vmatpush.msra.mxu0 %v4152_v37  ;;  %3411 = vmatpush.msra.mxu1 %v4153_v50  ;;  %v4202_v37 = vld [vmem:[#allocation2 + $0x548] sm:$0xff] }
 0x7a1   :  { %v4203_v50 = vld [vmem:[#allocation2 + $0x328] sm:$0xff] }
 0x7a2   :  { %3372 = vmatpush.msra.mxu0 %v4154_v61  ;;  %3412 = vmatpush.msra.mxu1 %v4155_v29  ;;  %v4205_v61 = vld [vmem:[#allocation2 + $0x308] sm:$0xff] }
 0x7a3   :  { %v4206_v29 = vld [vmem:[#allocation2 + $0x508] sm:$0xff] }
 0x7a4   :  { %3373 = vmatpush.msra.mxu0 %v4156_v9  ;;  %3413 = vmatpush.msra.mxu1 %v4157_v34  ;;  %v4207_v9 = vld [vmem:[#allocation2 + $0x2e8] sm:$0xff] }
 0x7a5   :  { %v4208_v34 = vld [vmem:[#allocation2 + $0x4e8] sm:$0xff] }
 0x7a6   :  { %3378 = vmatpush.msrb.mxu0 %v4158_v51  ;;  %3438 = vmatpush.msrb.mxu1 %v4159_v55  ;;  %v4209_v51 = vld [vmem:[#allocation2 + $0x2c8] sm:$0xff] }
 0x7a7   :  { %v4210_v55 = vld [vmem:[#allocation2 + $0x4c8] sm:$0xff] }
 0x7a8   :  { %3379 = vmatpush.msrb.mxu0 %v4160_v48  ;;  %3439 = vmatpush.msrb.mxu1 %v4161_v8  ;;  %v4211_v48 = vld [vmem:[#allocation2 + $0x2a8] sm:$0xff] }
 0x7a9   :  { %v4212_v8 = vld [vmem:[#allocation2 + $0x4a8] sm:$0xff] }
 0x7aa   :  { %3380 = vmatpush.msrb.mxu0 %v4162_v0  ;;  %3440 = vmatpush.msrb.mxu1 %v4163_v32  ;;  %v4213_v0 = vld [vmem:[#allocation2 + $0x288] sm:$0xff] }
 0x7ab   :  { %v4214_v32 = vld [vmem:[#allocation2 + $0x488] sm:$0xff] }
 0x7ac   :  { %3381 = vmatpush.msrb.mxu0 %v4164_v17  ;;  %3441 = vmatpush.msrb.mxu1 %v4165_v5  ;;  %v4215_v17 = vld [vmem:[#allocation2 + $0x268] sm:$0xff] }
 0x7ad   :  { %v4216_v5 = vld [vmem:[#allocation2 + $0x468] sm:$0xff] }
 0x7ae   :  { %3382 = vmatpush.msrb.mxu0 %v4166_v10  ;;  %3442 = vmatpush.msrb.mxu1 %v4167_v15  ;;  %v4217_v10 = vld [vmem:[#allocation2 + $0x248] sm:$0xff] }
 0x7af   :  { %v4218_v15 = vld [vmem:[#allocation2 + $0x448] sm:$0xff] }
 0x7b0   :  { %3383 = vmatpush.msrb.mxu0 %v4168_v54  ;;  %3443 = vmatpush.msrb.mxu1 %v4169_v13  ;;  %v4219_v54 = vld [vmem:[#allocation2 + $0x228] sm:$0xff] }
 0x7b1   :  { %v4220_v13 = vld [vmem:[#allocation2 + $0x428] sm:$0xff] }
 0x7b2   :  { %3384 = vmatpush.msrb.mxu0 %v4170_v33  ;;  %3444 = vmatpush.msrb.mxu1 %v4171_v53  ;;  %v4221_v33 = vld [vmem:[#allocation2 + $0x208] sm:$0xff] }
 0x7b3   :  { %v4222_v53 = vld [vmem:[#allocation2 + $0x408] sm:$0xff] }
 0x7b4   :  { %3385 = vmatpush.msrb.mxu0 %v4172_v57  ;;  %3445 = vmatpush.msrb.mxu1 %v4173_v56  ;;  %v4223_v57 = vld [vmem:[#allocation2 + $0x608] sm:$0xff]  ;;  %v4224_v56 = vld [vmem:[#allocation2 + $0x3f0] sm:$0xff] }
 0x7b6   :  { %3386 = vmatpush.msrb.mxu0 %v4174_v63  ;;  %3446 = vmatpush.msrb.mxu1 %v4175_v49  ;;  %v4225_v63 = vld [vmem:[#allocation2 + $0x1f0] sm:$0xff] }
 0x7b7   :  { %v4226_v49 = vld [vmem:[#allocation2 + $0x3d0] sm:$0xff] }
 0x7b8   :  { %3387 = vmatpush.msrb.mxu0 %v4176_v21  ;;  %3447 = vmatpush.msrb.mxu1 %v4177_v11  ;;  %v4227_v21 = vld [vmem:[#allocation2 + $0x1d0] sm:$0xff] }
 0x7b9   :  { %v4228_v11 = vld [vmem:[#allocation2 + $0x3b0] sm:$0xff] }
 0x7ba   :  { %3388 = vmatpush.msrb.mxu0 %v4178_v18  ;;  %3448 = vmatpush.msrb.mxu1 %v4179_v14  ;;  %v4229_v18 = vld [vmem:[#allocation2 + $0x1b0] sm:$0xff] }
 0x7bb   :  { %v4230_v14 = vld [vmem:[#allocation2 + $0x390] sm:$0xff] }
 0x7bc   :  { %3389 = vmatpush.msrb.mxu0 %v4180_v30  ;;  %3449 = vmatpush.msrb.mxu1 %v4181_v28  ;;  %v4231_v30 = vld [vmem:[#allocation2 + $0x190] sm:$0xff] }
 0x7bd   :  { %v4232_v28 = vld [vmem:[#allocation2 + $0x370] sm:$0xff] }
 0x7be   :  { %3390 = vmatpush.msrb.mxu0 %v4182_v35  ;;  %3450 = vmatpush.msrb.mxu1 %v4183_v19  ;;  %v4233_v35 = vld [vmem:[#allocation2 + $0x170] sm:$0xff] }
 0x7bf   :  { %v4234_v19 = vld [vmem:[#allocation2 + $0x350] sm:$0xff] }
 0x7c0   :  { %3391 = vmatpush.msrb.mxu0 %v4184_v39  ;;  %3451 = vmatpush.msrb.mxu1 %v4185_v42  ;;  %v4235_v39 = vld [vmem:[#allocation2 + $0x150] sm:$0xff] }
 0x7c1   :  { %v4236_v42 = vld [vmem:[#allocation2 + $0x330] sm:$0xff] }
 0x7c2   :  { %3392 = vmatpush.msrb.mxu0 %v4186_v12  ;;  %3452 = vmatpush.msrb.mxu1 %v4187_v3  ;;  %v4237_v12 = vld [vmem:[#allocation2 + $0x130] sm:$0xff] }
 0x7c3   :  { %v4238_v3 = vld [vmem:[#allocation2 + $0x310] sm:$0xff] }
 0x7c4   :  { %3393 = vmatpush.msrb.mxu0 %v4188_v4  ;;  %3453 = vmatpush.msrb.mxu1 %v4189_v1  ;;  %v4239_v4 = vld [vmem:[#allocation2 + $0x110] sm:$0xff] }
 0x7c5   :  { %v4240_v1 = vld [vmem:[#allocation2 + $0x2f0] sm:$0xff] }
 0x802   :  { %v3288_v60 = vpop.f32.mrf.mxu1  ;;  %v3308_v26 = vpop.f32.mrf.mxu0 }
 0x803   :  { %v6754_v16 = vmul.f32 %v3896_v7, %v3288_v60  ;;  %v6763_v2 = vmul.f32 %v3897_v46, %v3308_v26  ;;  %v4242_v7 = vld [vmem:[#allocation2 + $0x2d0] sm:$0xff] }
 0x804   :  { %v4243_v60 = vld [vmem:[#allocation2 + $0xd0] sm:$0xff] }
 0x805   :  { %3374 = vmatmul.f32.vlgmr.msra.gmra.mxu0 %v6754_v16  ;;  %v4244_v26 = vld [vmem:[#allocation2 + $0x2b0] sm:$0xff] }
 0x806   :  { %3433 = vmatpush.msra.mxu0 %v4190_v20  ;;  %v4245_v20 = vld [vmem:[#allocation2 + $0xb0] sm:$0xff] }
 0x807   :  { %v4247_v46 = vld [vmem:[#allocation2 + $0x90] sm:$0xff] }
 0x80a   :  { %v3328_v38 = vpop.f32.mrf.mxu1  ;;  %v3348_v22 = vpop.f32.mrf.mxu0 }
 0x80b   :  { %v6765_v24 = vmul.f32 %v3898_v59, %v3328_v38  ;;  %v6770_v23 = vmul.f32 %v6641_v40, %v3348_v22  ;;  %v4204_v40 = vld [vmem:[#allocation2 + $0x528] sm:$0xff]  ;;  %v4248_v59 = vld [vmem:[#allocation2 + $0x270] sm:$0xff] }
 0x80c   :  { %v4249_v38 = vld [vmem:[#allocation2 + $0x70] sm:$0xff] }
 0x80d   :  { %3394 = vmatmul.f32.vlgmr.msrb.gmra.mxu0 %v6763_v2  ;;  %3414 = vmatmul.f32.vlgmr.msra.gmra.mxu1 %v6765_v24  ;;  %v4254_v22 = vld [vmem:[#allocation2 + $0x210] sm:$0xff] }
 0x80e   :  { %3458 = vmatpush.msrb.mxu0 %v4191_v41  ;;  %3478 = vmatpush.msra.mxu1 %v4192_v52  ;;  %v4250_v41 = vld [vmem:[#allocation2 + $0x250] sm:$0xff] }
 0x80f   :  { %v4251_v52 = vld [vmem:[#allocation2 + $0x50] sm:$0xff] }
 0x810   :  { %3459 = vmatpush.msrb.mxu0 %v4193_v27  ;;  %3479 = vmatpush.msra.mxu1 %v4194_v6  ;;  %v4252_v27 = vld [vmem:[#allocation2 + $0x230] sm:$0xff] }
 0x811   :  { %v4253_v6 = vld [vmem:[#allocation2 + $0x30] sm:$0xff] }
 0x812   :  { %3460 = vmatpush.msrb.mxu0 %v4195_v31  ;;  %3480 = vmatpush.msra.mxu1 %v4196_v43  ;;  %v4255_v31 = vld [vmem:[#allocation2 + $0x610] sm:$0xff] }
 0x813   :  { %v4256_v43 = vld [vmem:[#allocation2 + $0x10] sm:$0xff] }
 0x814   :  { %3461 = vmatpush.msrb.mxu0 %v4197_v45  ;;  %3481 = vmatpush.msra.mxu1 %v4198_v58  ;;  %v4257_v45 = vld [vmem:[#allocation2 + $0x5f0] sm:$0xff]  ;;  %v4258_v58 = vld [vmem:[#allocation2 + $0x1f8] sm:$0xff] }
 0x815   :  { %4006 = vmatmul.msk.f32.vlgmr.msra.gmra.mxu0 %vm1526_vm1, %v6770_v23  ;;  %3454 = vmatmul.f32.vlgmr.msrb.gmra.mxu1 %v6754_v16 }
 0x816   :  { %3462 = vmatpush.msrb.mxu0 %v4199_v44  ;;  %3482 = vmatpush.msra.mxu1 %v4200_v47  ;;  %v4259_v44 = vld [vmem:[#allocation2 + $0x5d0] sm:$0xff]  ;;  %v4260_v47 = vld [vmem:[#allocation2 + $0x1d8] sm:$0xff] }
 0x818   :  { %3463 = vmatpush.msrb.mxu0 %v4201_v36  ;;  %3483 = vmatpush.msra.mxu1 %v4202_v37  ;;  %v4261_v36 = vld [vmem:[#allocation2 + $0x5b0] sm:$0xff]  ;;  %v4262_v37 = vld [vmem:[#allocation2 + $0x1b8] sm:$0xff] }
 0x81a   :  { %3464 = vmatpush.msrb.mxu0 %v4203_v50  ;;  %3484 = vmatpush.msra.mxu1 %v4204_v40  ;;  %v4263_v50 = vld [vmem:[#allocation2 + $0x590] sm:$0xff]  ;;  %v4264_v40 = vld [vmem:[#allocation2 + $0x198] sm:$0xff] }
 0x81c   :  { %3465 = vmatpush.msrb.mxu0 %v4205_v61  ;;  %3485 = vmatpush.msra.mxu1 %v4206_v29  ;;  %v4265_v61 = vld [vmem:[#allocation2 + $0x570] sm:$0xff]  ;;  %v4266_v29 = vld [vmem:[#allocation2 + $0x178] sm:$0xff] }
 0x81e   :  { %3466 = vmatpush.msrb.mxu0 %v4207_v9  ;;  %3486 = vmatpush.msra.mxu1 %v4208_v34  ;;  %v4267_v9 = vld [vmem:[#allocation2 + $0x550] sm:$0xff]  ;;  %v4268_v34 = vld [vmem:[#allocation2 + $0x158] sm:$0xff] }
 0x820   :  { %3467 = vmatpush.msrb.mxu0 %v4209_v51  ;;  %3487 = vmatpush.msra.mxu1 %v4210_v55  ;;  %v4269_v51 = vld [vmem:[#allocation2 + $0x530] sm:$0xff]  ;;  %v4270_v55 = vld [vmem:[#allocation2 + $0x138] sm:$0xff] }
 0x822   :  { %3468 = vmatpush.msrb.mxu0 %v4211_v48  ;;  %3488 = vmatpush.msra.mxu1 %v4212_v8  ;;  %v4271_v48 = vld [vmem:[#allocation2 + $0x510] sm:$0xff]  ;;  %v4272_v8 = vld [vmem:[#allocation2 + $0x118] sm:$0xff] }
 0x824   :  { %3469 = vmatpush.msrb.mxu0 %v4213_v0  ;;  %3489 = vmatpush.msra.mxu1 %v4214_v32  ;;  %v4273_v0 = vld [vmem:[#allocation2 + $0x4f0] sm:$0xff]  ;;  %v4274_v32 = vld [vmem:[#allocation2 + $0xf8] sm:$0xff] }
 0x826   :  { %3470 = vmatpush.msrb.mxu0 %v4215_v17  ;;  %3490 = vmatpush.msra.mxu1 %v4216_v5  ;;  %v4275_v17 = vld [vmem:[#allocation2 + $0x4d0] sm:$0xff]  ;;  %v4276_v5 = vld [vmem:[#allocation2 + $0xd8] sm:$0xff] }
 0x828   :  { %3471 = vmatpush.msrb.mxu0 %v4217_v10  ;;  %3491 = vmatpush.msra.mxu1 %v4218_v15  ;;  %v4277_v10 = vld [vmem:[#allocation2 + $0x4b0] sm:$0xff]  ;;  %v4278_v15 = vld [vmem:[#allocation2 + $0xb8] sm:$0xff] }
 0x82a   :  { %3472 = vmatpush.msrb.mxu0 %v4219_v54  ;;  %3492 = vmatpush.msra.mxu1 %v4220_v13  ;;  %v4279_v54 = vld [vmem:[#allocation2 + $0x490] sm:$0xff]  ;;  %v4280_v13 = vld [vmem:[#allocation2 + $0x98] sm:$0xff] }
 0x82c   :  { %3473 = vmatpush.msrb.mxu0 %v4221_v33  ;;  %3493 = vmatpush.msra.mxu1 %v4222_v53  ;;  %v4281_v33 = vld [vmem:[#allocation2 + $0x470] sm:$0xff]  ;;  %v4282_v53 = vld [vmem:[#allocation2 + $0x78] sm:$0xff] }
 0x82d   :  { %3474 = vmatmul.f32.vlgmr.msrb.gmra.mxu0 %v6763_v2  ;;  %3494 = vmatmul.f32.vlgmr.msra.gmra.mxu1 %v6765_v24 }
 0x82e   :  { %3513 = vmatpush.msra.mxu0 %v4223_v57  ;;  %3538 = vmatpush.msrb.mxu1 %v4224_v56  ;;  %v4283_v57 = vld [vmem:[#allocation2 + $0x450] sm:$0xff]  ;;  %v4284_v56 = vld [vmem:[#allocation2 + $0x58] sm:$0xff] }
 0x830   :  { %3518 = vmatpush.msrb.mxu0 %v4225_v63  ;;  %3539 = vmatpush.msrb.mxu1 %v4226_v49  ;;  %v4285_v63 = vld [vmem:[#allocation2 + $0x430] sm:$0xff]  ;;  %v4286_v49 = vld [vmem:[#allocation2 + $0x38] sm:$0xff] }
 0x832   :  { %3519 = vmatpush.msrb.mxu0 %v4227_v21  ;;  %3540 = vmatpush.msrb.mxu1 %v4228_v11  ;;  %v4287_v21 = vld [vmem:[#allocation2 + $0x410] sm:$0xff]  ;;  %v4288_v11 = vld [vmem:[#allocation2 + $0x18] sm:$0xff] }
 0x834   :  { %3520 = vmatpush.msrb.mxu0 %v4229_v18  ;;  %3541 = vmatpush.msrb.mxu1 %v4230_v14  ;;  %v4289_v18 = vld [vmem:[#allocation2 + $0x5f8] sm:$0xff] }
 0x835   :  { %4007 = vmatmul.msk.f32.vlgmr.msra.gmra.mxu0 %vm1526_vm1, %v6770_v23  ;;  %v4290_v14 = vld [vmem:[#allocation2 + $0x3f8] sm:$0xff] }
 0x836   :  { %3521 = vmatpush.msrb.mxu0 %v4231_v30  ;;  %3542 = vmatpush.msrb.mxu1 %v4232_v28  ;;  %v4291_v30 = vld [vmem:[#allocation2 + $0x5d8] sm:$0xff] }
 0x837   :  { %v4292_v28 = vld [vmem:[#allocation2 + $0x3d8] sm:$0xff] }
 0x838   :  { %3522 = vmatpush.msrb.mxu0 %v4233_v35  ;;  %3543 = vmatpush.msrb.mxu1 %v4234_v19  ;;  %v4293_v35 = vld [vmem:[#allocation2 + $0x5b8] sm:$0xff] }
 0x839   :  { %v4294_v19 = vld [vmem:[#allocation2 + $0x3b8] sm:$0xff] }
 0x83a   :  { %3523 = vmatpush.msrb.mxu0 %v4235_v39  ;;  %3544 = vmatpush.msrb.mxu1 %v4236_v42  ;;  %v4295_v39 = vld [vmem:[#allocation2 + $0x598] sm:$0xff] }
 0x83b   :  { %v4296_v42 = vld [vmem:[#allocation2 + $0x398] sm:$0xff] }
 0x83c   :  { %3524 = vmatpush.msrb.mxu0 %v4237_v12  ;;  %3545 = vmatpush.msrb.mxu1 %v4238_v3  ;;  %v4297_v12 = vld [vmem:[#allocation2 + $0x578] sm:$0xff] }
 0x83d   :  { %v4298_v3 = vld [vmem:[#allocation2 + $0x378] sm:$0xff] }
 0x83e   :  { %3525 = vmatpush.msrb.mxu0 %v4239_v4  ;;  %3546 = vmatpush.msrb.mxu1 %v4240_v1  ;;  %v4299_v4 = vld [vmem:[#allocation2 + $0x558] sm:$0xff] }
 0x83f   :  { %v4300_v1 = vld [vmem:[#allocation2 + $0x358] sm:$0xff] }
 0x840   :  { %3526 = vmatpush.msrb.mxu0 %v4241_v25  ;;  %3547 = vmatpush.msrb.mxu1 %v4242_v7  ;;  %v4302_v25 = vld [vmem:[#allocation2 + $0x338] sm:$0xff] }
 0x841   :  { %v4303_v7 = vld [vmem:[#allocation2 + $0x518] sm:$0xff] }
 0x842   :  { %3527 = vmatpush.msrb.mxu0 %v4243_v60  ;;  %3548 = vmatpush.msrb.mxu1 %v4244_v26  ;;  %v4304_v60 = vld [vmem:[#allocation2 + $0x318] sm:$0xff] }
 0x843   :  { %v4305_v26 = vld [vmem:[#allocation2 + $0x4f8] sm:$0xff] }
 0x844   :  { %3528 = vmatpush.msrb.mxu0 %v4245_v20  ;;  %3549 = vmatpush.msrb.mxu1 %v4246_v62  ;;  %v4306_v20 = vld [vmem:[#allocation2 + $0x2f8] sm:$0xff] }
 0x845   :  { %v4307_v62 = vld [vmem:[#allocation2 + $0x4d8] sm:$0xff] }
 0x846   :  { %3529 = vmatpush.msrb.mxu0 %v4247_v46  ;;  %3550 = vmatpush.msrb.mxu1 %v4248_v59  ;;  %v4308_v46 = vld [vmem:[#allocation2 + $0x2d8] sm:$0xff] }
 0x847   :  { %v4309_v59 = vld [vmem:[#allocation2 + $0x4b8] sm:$0xff] }
 0x848   :  { %3530 = vmatpush.msrb.mxu0 %v4249_v38  ;;  %3551 = vmatpush.msrb.mxu1 %v4250_v41  ;;  %v4310_v38 = vld [vmem:[#allocation2 + $0x2b8] sm:$0xff] }
 0x84a   :  { %3531 = vmatpush.msrb.mxu0 %v4251_v52  ;;  %3552 = vmatpush.msrb.mxu1 %v4252_v27  ;;  %v4311_v52 = vld [vmem:[#allocation2 + $0x498] sm:$0xff] }
 0x84b   :  { %v4312_v27 = vld [vmem:[#allocation2 + $0x298] sm:$0xff] }
 0x84c   :  { %3532 = vmatpush.msrb.mxu0 %v4253_v6  ;;  %3553 = vmatpush.msrb.mxu1 %v4254_v22  ;;  %v4313_v6 = vld [vmem:[#allocation2 + $0x478] sm:$0xff] }
 0x84d   :  { %3554 = vmatmul.f32.vlgmr.msrb.gmra.mxu1 %v6763_v2  ;;  %v4314_v22 = vld [vmem:[#allocation2 + $0x278] sm:$0xff] }
 0x84e   :  { %3593 = vmatpush.msra.mxu1 %v4255_v31  ;;  %3533 = vmatpush.msrb.mxu0 %v4256_v43  ;;  %v4315_v31 = vld [vmem:[#allocation2 + $0x458] sm:$0xff] }
 0x84f   :  { %3534 = vmatmul.f32.vlgmr.msrb.gmra.mxu0 %v6754_v16  ;;  %v4316_v43 = vld [vmem:[#allocation2 + $0x258] sm:$0xff] }
 0x850   :  { %3558 = vmatpush.msra.mxu0 %v4257_v45  ;;  %3598 = vmatpush.msrb.mxu1 %v4258_v58  ;;  %v4317_v45 = vld [vmem:[#allocation2 + $0x438] sm:$0xff] }
 0x851   :  { %v4318_v58 = vld [vmem:[#allocation2 + $0x238] sm:$0xff] }
 0x852   :  { %3559 = vmatpush.msra.mxu0 %v4259_v44  ;;  %3599 = vmatpush.msrb.mxu1 %v4260_v47  ;;  %v4319_v47 = vld [vmem:[#allocation2 + $0x418] sm:$0xff] }
 0x854   :  { %3560 = vmatpush.msra.mxu0 %v4261_v36  ;;  %3600 = vmatpush.msrb.mxu1 %v4262_v37  ;;  %v4320_v36 = vld [vmem:[#allocation2 + $0x218] sm:$0xff] }
 0x855   :  { %4008 = vmatmul.msk.f32.vlgmr.msra.gmra.mxu1 %vm1526_vm1, %v6770_v23 }
 0x856   :  { %3561 = vmatpush.msra.mxu0 %v4263_v50  ;;  %3601 = vmatpush.msrb.mxu1 %v4264_v40  ;;  %v4321_v50 = vld [vmem:[#allocation2 + $0x618] sm:$0xff] }
 0x858   :  { %3562 = vmatpush.msra.mxu0 %v4265_v61  ;;  %3602 = vmatpush.msrb.mxu1 %v4266_v29 }
 0x85a   :  { %3563 = vmatpush.msra.mxu0 %v4267_v9  ;;  %3603 = vmatpush.msrb.mxu1 %v4268_v34 }
 0x85c   :  { %3564 = vmatpush.msra.mxu0 %v4269_v51  ;;  %3604 = vmatpush.msrb.mxu1 %v4270_v55 }
 0x85e   :  { %3565 = vmatpush.msra.mxu0 %v4271_v48  ;;  %3605 = vmatpush.msrb.mxu1 %v4272_v8 }
 0x860   :  { %3566 = vmatpush.msra.mxu0 %v4273_v0  ;;  %3606 = vmatpush.msrb.mxu1 %v4274_v32 }
 0x862   :  { %3567 = vmatpush.msra.mxu0 %v4275_v17  ;;  %3607 = vmatpush.msrb.mxu1 %v4276_v5 }
 0x864   :  { %3568 = vmatpush.msra.mxu0 %v4277_v10  ;;  %3608 = vmatpush.msrb.mxu1 %v4278_v15 }
 0x866   :  { %3569 = vmatpush.msra.mxu0 %v4279_v54  ;;  %3609 = vmatpush.msrb.mxu1 %v4280_v13 }
 0x868   :  { %3570 = vmatpush.msra.mxu0 %v4281_v33  ;;  %3610 = vmatpush.msrb.mxu1 %v4282_v53 }
 0x86a   :  { %3571 = vmatpush.msra.mxu0 %v4283_v57  ;;  %3611 = vmatpush.msrb.mxu1 %v4284_v56 }
 0x86c   :  { %3572 = vmatpush.msra.mxu0 %v4285_v63  ;;  %3612 = vmatpush.msrb.mxu1 %v4286_v49 }
 0x86e   :  { %3573 = vmatpush.msra.mxu0 %v4287_v21  ;;  %3613 = vmatpush.msrb.mxu1 %v4288_v11 }
 0x86f   :  { %3574 = vmatmul.f32.vlgmr.msra.gmra.mxu0 %v6765_v24  ;;  %3614 = vmatmul.f32.vlgmr.msrb.gmra.mxu1 %v6754_v16  ;;  %v4301_v16 = vld [vmem:[#allocation2 + $0x538] sm:$0xff] }
 0x870   :  { %3638 = vmatpush.msra.mxu1 %v4289_v18  ;;  %3618 = vmatpush.msrb.mxu0 %v4290_v14 }
 0x872   :  { %3639 = vmatpush.msra.mxu1 %v4291_v30  ;;  %3619 = vmatpush.msrb.mxu0 %v4292_v28 }
 0x874   :  { %3640 = vmatpush.msra.mxu1 %v4293_v35  ;;  %3620 = vmatpush.msrb.mxu0 %v4294_v19 }
 0x876   :  { %3641 = vmatpush.msra.mxu1 %v4295_v39  ;;  %3621 = vmatpush.msrb.mxu0 %v4296_v42 }
 0x878   :  { %3642 = vmatpush.msra.mxu1 %v4297_v12  ;;  %3622 = vmatpush.msrb.mxu0 %v4298_v3 }
 0x87a   :  { %3643 = vmatpush.msra.mxu1 %v4299_v4  ;;  %3623 = vmatpush.msrb.mxu0 %v4300_v1 }
 0x87c   :  { %3644 = vmatpush.msra.mxu1 %v4301_v16  ;;  %3624 = vmatpush.msrb.mxu0 %v4302_v25 }
 0x87e   :  { %3645 = vmatpush.msra.mxu1 %v4303_v7  ;;  %3625 = vmatpush.msrb.mxu0 %v4304_v60 }
 0x880   :  { %3646 = vmatpush.msra.mxu1 %v4305_v26  ;;  %3626 = vmatpush.msrb.mxu0 %v4306_v20 }
 0x882   :  { %3647 = vmatpush.msra.mxu1 %v4307_v62  ;;  %3627 = vmatpush.msrb.mxu0 %v4308_v46  ;;  %v3375_v41 = vpop.f32.mrf.mxu0 }
 0x884   :  { %3648 = vmatpush.msra.mxu1 %v4309_v59  ;;  %3628 = vmatpush.msrb.mxu0 %v4310_v38 }
 0x886   :  { %3649 = vmatpush.msra.mxu1 %v4311_v52  ;;  %3629 = vmatpush.msrb.mxu0 %v4312_v27 }
 0x888   :  { %3650 = vmatpush.msra.mxu1 %v4313_v6  ;;  %3630 = vmatpush.msrb.mxu0 %v4314_v22 }
 0x88a   :  { %3651 = vmatpush.msra.mxu1 %v4315_v31  ;;  %3631 = vmatpush.msrb.mxu0 %v4316_v43  ;;  %v3395_v44 = vpop.f32.mrf.mxu0  ;;  %v3415_v40 = vpop.f32.mrf.mxu1 }
 0x88b   :  { %v3396_v37 = vadd.f32 %v3395_v44, %v3375_v41 }
 0x88c   :  { %3652 = vmatpush.msra.mxu1 %v4317_v45  ;;  %3632 = vmatpush.msrb.mxu0 %v4318_v58 }
 0x88d   :  { %v3416_v61 = vadd.f32 %v3415_v40, %v3396_v37 }
 0x88e   :  { %3653 = vmatpush.msra.mxu1 %v4319_v47  ;;  %3633 = vmatpush.msrb.mxu0 %v4320_v36 }
 0x88f   :  { %3654 = vmatmul.f32.vlgmr.msra.gmra.mxu1 %v6765_v24  ;;  %3634 = vmatmul.f32.vlgmr.msrb.gmra.mxu0 %v6763_v2 }
 0x890   :  { %3673 = vmatpush.msra.mxu0 %v4321_v50 }
 0x892   :  { %v3435_v29 = vpop.f32.mrf.mxu0  ;;  %v3455_v34 = vpop.f32.mrf.mxu1 }
 0x893   :  { %v3436_v9 = vadd.f32 %v3435_v29, %v3416_v61 }
 0x895   :  { %3678 = vst [vmem:[#allocation7] sm:$0xff] %v3436_v9 }
 0x897   :  { %4009 = vmatmul.msk.f32.vlgmr.msra.gmra.mxu0 %vm1526_vm1, %v6770_v23 }
 0x8aa   :  { %v3475_v51 = vpop.f32.mrf.mxu0  ;;  %v3495_v48 = vpop.f32.mrf.mxu1 }
 0x8ab   :  { %v3476_v55 = vadd.f32 %v3475_v51, %v3455_v34 }
 0x8ad   :  { %v3496_v8 = vadd.f32 %v3495_v48, %v3476_v55 }
 0x8b2   :  { %v3515_v0 = vpop.f32.mrf.mxu0 }
 0x8b3   :  { %v3516_v24 = vadd.f32 %v3515_v0, %v3496_v8 }
 0x8b5   :  { %3679 = vst [vmem:[#allocation7 + $0x8] sm:$0xff] %v3516_v24 }
 0x8ca   :  { %v3555_v2 = vpop.f32.mrf.mxu1 }
 0x8cc   :  { %v3535_v32 = vpop.f32.mrf.mxu0 }
 0x8cd   :  { %v3556_v17 = vadd.f32 %v3555_v2, %v3535_v32 }
 0x8d2   :  { %v3595_v15 = vpop.f32.mrf.mxu1 }
 0x8ec   :  { %v3575_v5 = vpop.f32.mrf.mxu0  ;;  %v3615_v13 = vpop.f32.mrf.mxu1 }
 0x8ed   :  { %v3576_v10 = vadd.f32 %v3575_v5, %v3556_v17 }
 0x8ef   :  { %v3596_v54 = vadd.f32 %v3595_v15, %v3576_v10 }
 0x8f1   :  { %3680 = vst [vmem:[#allocation7 + $0x10] sm:$0xff] %v3596_v54 }
 0x90c   :  { %v3635_v33 = vpop.f32.mrf.mxu0  ;;  %v3655_v53 = vpop.f32.mrf.mxu1 }
 0x90d   :  { %v3636_v23 = vadd.f32 %v3635_v33, %v3615_v13 }
 0x90f   :  { %v3656_v57 = vadd.f32 %v3655_v53, %v3636_v23 }
 0x914   :  { %v3675_v56 = vpop.f32.mrf.mxu0 }
 0x915   :  { %v3676_v63 = vadd.f32 %v3675_v56, %v3656_v57 }
 0x917   :  { %3681 = vst [vmem:[#allocation7 + $0x18] sm:$0xff] %v3676_v63 }
 0x918   :  { %3692 = dma.vmem_to_hbm [thread:$0]  %s3688_s27, 512, %s3690_s30, [#allocation4]  }
 0x919   :  { %4398 = dma.done.wait [#allocation4], 512  }
 0x91a   :  { %4399 = vsyncadd [#allocation4], 4294966784 }
 0x91b   :  { %3697 = vsyncpa [#allocation3], 1 }
 0x91c   :  { %3698 = vsyncpa [#allocation6], 1 }
 0x91d   :  { %3699 = vsyncpa [#allocation4], 1 }

</bundles_post_ra>
